<compile_context>
chip_gen: v5e
topology: v5e:2x2
jax: 0.10.0
libtpu: 0.0.40
codegen_flags: <defaults>
</compile_context>

<pallas_src>
import functools

import jax
import jax.numpy as jnp
import numpy as np
from jax.experimental import pallas as pl
from jax.experimental.pallas import tpu as pltpu


def _round_up(x, m):
    return (x + m - 1) // m * m


# ----------------------------------------------------------------------------
# Fused forward kernel (one row-tile per grid step).
# ----------------------------------------------------------------------------
def _fused_kernel(rowdata_ref, ef_ref, af_ref, slab_ref, out_ref, *,
                  layout, ne_list, hyper_d, H, own_d, n_agents, n_actions,
                  n_enemies, e_d_pad, a_d_pad, n_allies, out_w):
    f32 = jnp.float32
    rt = out_ref.shape[0]                       # rows in this tile

    def P(name):                                # static slab slice (free view)
        r0, nr, nc = layout[name]
        return slab_ref[r0:r0 + nr, 0:nc]

    rowdata = rowdata_ref[...]                  # [rt, own_d + 2 + H]
    own = rowdata[:, :own_d]
    aidx = rowdata[:, own_d:own_d + 1].astype(jnp.int32)
    actidx = rowdata[:, own_d + 1:own_d + 2].astype(jnp.int32)
    h_in = rowdata[:, own_d + 2:own_d + 2 + H]

    # ---- own fc1 + id/last-action embeddings as a gather-free one-hot matmul
    n_ids = n_agents + n_actions
    iota = jax.lax.broadcasted_iota(jnp.int32, (rt, n_ids), 1)
    onehot = ((iota == aidx).astype(f32)
              + (iota == (actidx + n_agents)).astype(f32))
    emb = (jnp.dot(own, P("fc1w"), preferred_element_type=f32) + P("fc1b")
           + jnp.dot(onehot, P("emb_tbl"), preferred_element_type=f32))

    ef_all = ef_ref[...]                        # [n_enemies, rt, e_d_pad]
    af_all = af_ref[...]                        # [n_allies,  rt, a_d_pad]

    # ---- enemy hypernets (head-softmax already folded into the weights) ----
    wb_list = []
    off = 0
    for i, ne_i in enumerate(ne_list):
        efi = ef_all[off:off + ne_i].reshape(ne_i * rt, e_d_pad)
        off += ne_i
        # one matmul gives both the h1 pre-activation and the b2-bias term
        hb = jnp.dot(efi, P(f"e{i}_w1b"), preferred_element_type=f32)
        h1 = jnp.maximum(hb[:, :hyper_d] + P(f"e{i}_b1"), 0.0)
        # Khatri-Rao rows (ef (x) h1) -> single K = e_d_pad*hyper_d MXU matmul
        kron = jnp.concatenate(
            [efi[:, k:k + 1] * h1 for k in range(e_d_pad)], axis=1)
        contrib = (jnp.dot(kron, P(f"e{i}_w2kr"), preferred_element_type=f32)
                   + hb[:, hyper_d:]).reshape(ne_i, rt, H)
        emb = emb + jnp.sum(contrib, axis=0)
        # head-folded attack-head hypernet output: [ne_i*rt, H+1]
        wb = jnp.dot(h1, P(f"e{i}_wq"), preferred_element_type=f32) + P(f"e{i}_bq")
        wb_list.append(wb)

    # ---- ally hypernet (non-MMM branch), same Khatri-Rao scheme ----
    afl = af_all.reshape(n_allies * rt, a_d_pad)
    hb_a = jnp.dot(afl, P("a_w1b"), preferred_element_type=f32)
    h1a = jnp.maximum(hb_a[:, :hyper_d] + P("a_b1"), 0.0)
    kron_a = jnp.concatenate(
        [afl[:, k:k + 1] * h1a for k in range(a_d_pad)], axis=1)
    contrib_a = (jnp.dot(kron_a, P("a_w2kr"), preferred_element_type=f32)
                 + hb_a[:, hyper_d:]).reshape(n_allies, rt, H)
    emb = emb + jnp.sum(contrib_a, axis=0)

    x = jnp.maximum(emb, 0.0)

    # ---- GRU cell, split weights: no [x|h] lane concat ----
    gx = jnp.dot(x, P("gru_wx"), preferred_element_type=f32) + P("gru_bih")
    gh = jnp.dot(h_in, P("gru_wh"), preferred_element_type=f32) + P("gru_bhh")
    r = jax.nn.sigmoid(gx[:, 0:H] + gh[:, 0:H])
    z = jax.nn.sigmoid(gx[:, H:2 * H] + gh[:, H:2 * H])
    n = jnp.tanh(gx[:, 2 * H:3 * H] + r * gh[:, 2 * H:3 * H])
    hh = (1.0 - z) * n + z * h_in

    # ---- normal-action head ----
    q_normal = jnp.dot(hh, P("fc2nw"), preferred_element_type=f32) + P("fc2nb")

    # ---- attack heads, batched: one multiply + one lane reduce for all
    #      enemies, then a single small transpose into lane columns ----
    wb_all = jnp.concatenate(wb_list, axis=0).reshape(n_enemies, rt, H + 1)
    q_att = jnp.sum(hh[None, :, :] * wb_all[:, :, :H], axis=-1) + wb_all[:, :, H]
    q_attack = q_att.T                                  # [rt, n_enemies]

    # ---- one lane-dense unmasked store: [q_normal | q_attack | pad | hh] ----
    pad_w = out_w - (6 + n_enemies) - H
    pieces = [q_normal, q_attack]
    if pad_w > 0:
        pieces.append(jnp.zeros((rt, pad_w), f32))
    pieces.append(hh)
    out_ref[...] = jnp.concatenate(pieces, axis=1)


# ----------------------------------------------------------------------------
# Wrapper: layout plumbing + exact (data-independent) parameter folds, then a
# single pallas_call over a row-tiled grid.
# ----------------------------------------------------------------------------
def api_rnn_forward(params, cfg, inputs, hidden_state):
    bs, own_feats_t, enemy_feats_list, ally_feats_list, embedding_indices = inputs
    H = cfg["rnn_hidden_dim"]
    nh = cfg["n_heads"]
    n_agents = cfg["n_agents"]
    n_allies = n_agents - 1
    n_enemies = cfg["n_enemies"]
    n_actions = cfg["n_actions"]
    e_d = cfg["enemy_feats_dim"]
    a_d = cfg["ally_feats_dim"]
    hyper_d = cfg["api_hyper_dim"]
    own_d = cfg["own_feats_dim"]
    ne_list = [d[0] for d in cfg["enemy_divide"]]
    n_types = len(ne_list)
    N = bs * n_agents

    # row tiling: single tile at small sizes, 512-row parallel tiles otherwise
    # (512 keeps per-step VMEM well inside v7x's 64 MiB and shards across TCs)
    if N <= 512:
        row_tile = _round_up(max(N, 8), 8)
        n_pad = row_tile
    else:
        row_tile = 512
        n_pad = _round_up(N, row_tile)

    out_w = _round_up(6 + n_enemies + H, 128)

    # pad entity-feature dims so d_pad * hyper_d hits a 128-lane KR width
    def pad_feat_dim(d):
        if hyper_d <= 128 and 128 % hyper_d == 0:
            return _round_up(d, 128 // hyper_d)
        return d
    e_d_pad = pad_feat_dim(e_d)
    a_d_pad = pad_feat_dim(a_d)

    # ---- row-major data slab: [own | agent_idx | last_action_idx | h_in] ----
    agent_idx, last_action_idx = embedding_indices
    rowdata = jnp.concatenate(
        [own_feats_t,
         agent_idx.reshape(-1, 1).astype(jnp.float32),
         last_action_idx.reshape(-1, 1).astype(jnp.float32),
         hidden_state.reshape(-1, H).astype(jnp.float32)], axis=1)
    rowdata = jnp.pad(rowdata, ((0, n_pad - N), (0, 0)))
    rd_w = rowdata.shape[1]

    # ---- entity-major 3-D features [n_ent, n_pad, d_pad] (row-tileable) ----
    def entity_major(x, n_ent, d_pad):
        d = x.shape[-1]
        x = x.reshape(N, n_ent, d).transpose(1, 0, 2)
        return jnp.pad(x, ((0, 0), (0, n_pad - N), (0, d_pad - d)))

    ef_all = jnp.concatenate(
        [entity_major(enemy_feats_list[i], ne_list[i], e_d_pad)
         for i in range(n_types)], axis=0)              # [n_enemies, n_pad, e_d_pad]
    af_all = entity_major(ally_feats_list[0], n_allies, a_d_pad)

    # ---- fold Merger softmaxes into hypernet weights; build KR-layout W2 ----
    sm_in = jax.nn.softmax(params["merge_in_w"], axis=0)        # [nh, H]
    sm_out = jax.nn.softmax(params["merge_out_w"], axis=1)[0]   # [nh]
    fc1_cols_e = e_d * H * nh

    def fold_hyper(w1, w2_fc1, b2_fc1, d, d_pad):
        # w2_fc1: [hyper_d, d, nh, H]; b2_fc1: [d, nh, H]
        w2kr = jnp.einsum("pknj,nj->kpj", w2_fc1, sm_in)        # [d, hyper_d, H]
        w2kr = jnp.pad(w2kr, ((0, d_pad - d), (0, 0), (0, 0)))
        w2kr = w2kr.reshape(d_pad * hyper_d, H)
        b2m = jnp.einsum("knj,nj->kj", b2_fc1, sm_in)           # [d, H]
        w1p = jnp.pad(w1, ((0, d_pad - d), (0, 0)))             # [d_pad, hyper_d]
        b2p = jnp.pad(b2m, ((0, d_pad - d), (0, 0)))            # [d_pad, H]
        w1b = jnp.concatenate([w1p, b2p], axis=1)               # [d_pad, hyper_d + H]
        return w1b, w2kr

    entries = [
        ("fc1w", params["fc1_own_w"]),
        ("fc1b", params["fc1_own_b"]),
        ("emb_tbl", jnp.concatenate(
            [params["agent_id_emb"], params["action_id_emb"]], axis=0)),
    ]
    for i in range(n_types):
        hp = params["hyper_enemys"][i]
        w2 = hp["w2"]
        b2 = hp["b2"][0]
        w2_fc1 = w2[:, :fc1_cols_e].reshape(hyper_d, e_d, nh, H)
        b2_fc1 = b2[:fc1_cols_e].reshape(e_d, nh, H)
        w1b, w2kr = fold_hyper(hp["w1"], w2_fc1, b2_fc1, e_d, e_d_pad)
        w2_q = w2[:, fc1_cols_e:fc1_cols_e + nh * H].reshape(hyper_d, nh, H)
        b2_q = b2[fc1_cols_e:fc1_cols_e + nh * H].reshape(nh, H)
        w2_qb = w2[:, -nh:]
        b2_qb = b2[-nh:]
        wq = jnp.concatenate(
            [jnp.einsum("pnj,n->pj", w2_q, sm_out), (w2_qb @ sm_out)[:, None]],
            axis=1)                                             # [hyper_d, H+1]
        bq = jnp.concatenate(
            [jnp.einsum("nj,n->j", b2_q, sm_out), (b2_qb @ sm_out)[None]],
            axis=0)[None, :]                                    # [1, H+1]
        entries += [(f"e{i}_w1b", w1b), (f"e{i}_b1", hp["b1"]),
                    (f"e{i}_w2kr", w2kr), (f"e{i}_wq", wq), (f"e{i}_bq", bq)]

    a_w2_fc1 = params["hyper_ally_w2"].reshape(hyper_d, a_d, nh, H)
    a_b2_fc1 = params["hyper_ally_b2"][0].reshape(a_d, nh, H)
    a_w1b, a_w2kr = fold_hyper(params["hyper_ally_w1"], a_w2_fc1, a_b2_fc1,
                               a_d, a_d_pad)
    entries += [("a_w1b", a_w1b), ("a_b1", params["hyper_ally_b1"]),
                ("a_w2kr", a_w2kr)]

    entries += [("gru_wx", params["gru_wih"]), ("gru_wh", params["gru_whh"]),
                ("gru_bih", params["gru_bih"]), ("gru_bhh", params["gru_bhh"]),
                ("fc2nw", params["fc2_normal_w"]), ("fc2nb", params["fc2_normal_b"])]

    # ---- pack all parameters into one [R, slab_w] slab (one DMA) ----
    slab_w = _round_up(max(int(a.shape[1]) for _, a in entries), 128)
    rows, layout, r0 = [], {}, 0
    for name, a in entries:
        a = jnp.asarray(a, jnp.float32)
        nr, nc = int(a.shape[0]), int(a.shape[1])
        nr_pad = _round_up(nr, 8)                   # 8-aligned row offsets
        rows.append(jnp.pad(a, ((0, nr_pad - nr), (0, slab_w - nc))))
        layout[name] = (r0, nr, nc)
        r0 += nr_pad
    slab = jnp.concatenate(rows, axis=0)            # [R_slab, slab_w]

    kernel = functools.partial(
        _fused_kernel, layout=layout, ne_list=tuple(ne_list), hyper_d=hyper_d,
        H=H, own_d=own_d, n_agents=n_agents, n_actions=n_actions,
        n_enemies=n_enemies, e_d_pad=e_d_pad, a_d_pad=a_d_pad,
        n_allies=n_allies, out_w=out_w)

    grid = (n_pad // row_tile,)
    out = pl.pallas_call(
        kernel,
        out_shape=jax.ShapeDtypeStruct((n_pad, out_w), jnp.float32),
        grid=grid,
        in_specs=[
            pl.BlockSpec((row_tile, rd_w), lambda i: (i, 0)),
            pl.BlockSpec((n_enemies, row_tile, e_d_pad), lambda i: (0, i, 0)),
            pl.BlockSpec((n_allies, row_tile, a_d_pad), lambda i: (0, i, 0)),
            pl.BlockSpec(slab.shape, lambda i: (0, 0)),
        ],
        out_specs=pl.BlockSpec((row_tile, out_w), lambda i: (i, 0)),
        compiler_params=pltpu.CompilerParams(dimension_semantics=("parallel",)),
    )(rowdata, ef_all, af_all, slab)

    q = out[:N, :6 + n_enemies].reshape(bs, n_agents, 6 + n_enemies)
    hh = out[:N, out_w - H:].reshape(bs, n_agents, H)
    return q, hh


# ----------------------------------------------------------------------------
# Parameters (deterministic synthetic init; shapes follow the module __init__).
# Merger weights / hypernet biases are randomized (instead of the module's
# 1.0 / 0.0 init) purely so the test exercises the softmax-folding math.
# ----------------------------------------------------------------------------
def init_params(key, cfg):
    H = cfg["rnn_hidden_dim"]
    nh = cfg["n_heads"]
    own_d = cfg["own_feats_dim"]
    e_d = cfg["enemy_feats_dim"]
    a_d = cfg["ally_feats_dim"]
    hyper_d = cfg["api_hyper_dim"]
    n_agents = cfg["n_agents"]
    n_actions = cfg["n_actions"]
    n_enemy_types = len(cfg["enemy_divide"])

    keys = iter(jax.random.split(key, 64))

    def w(shape, scale=0.1):
        return (scale * jax.random.normal(next(keys), shape)).astype(jnp.float32)

    params = {
        "fc1_own_w": w((own_d, H)),
        "fc1_own_b": w((1, H)),
        "agent_id_emb": w((n_agents, H)),
        "action_id_emb": w((n_actions, H)),
        "hyper_enemys": [],
        "hyper_ally_w1": w((a_d, hyper_d)),
        "hyper_ally_b1": w((1, hyper_d), scale=0.05),
        "hyper_ally_w2": w((hyper_d, a_d * H * nh)),
        "hyper_ally_b2": w((1, a_d * H * nh), scale=0.05),
        "merge_in_w": w((nh, H), scale=0.5),
        "merge_out_w": w((1, nh), scale=0.5),
        "gru_wih": w((H, 3 * H)),
        "gru_whh": w((H, 3 * H)),
        "gru_bih": w((1, 3 * H)),
        "gru_bhh": w((1, 3 * H)),
        "fc2_normal_w": w((H, 6)),
        "fc2_normal_b": w((1, 6)),
    }
    e_out = ((e_d + 1) * H + 1) * nh
    for _ in range(n_enemy_types):
        params["hyper_enemys"].append({
            "w1": w((e_d, hyper_d)),
            "b1": w((1, hyper_d), scale=0.05),
            "w2": w((hyper_d, e_out)),
            "b2": w((1, e_out), scale=0.05),
        })
    return params


# ----------------------------------------------------------------------------
# Pure-JAX reference (mirrors the PyTorch forward) for a correctness check
# ----------------------------------------------------------------------------
def reference_forward(params, cfg, inputs, hidden_state):
    bs, own, enemy_list, ally_list, (agent_idx, act_idx) = inputs
    H = cfg["rnn_hidden_dim"]
    nh = cfg["n_heads"]
    n_agents = cfg["n_agents"]
    n_allies = n_agents - 1
    n_enemies = cfg["n_enemies"]
    e_d = cfg["enemy_feats_dim"]
    a_d = cfg["ally_feats_dim"]
    N = bs * n_agents

    emb_own = own @ params["fc1_own_w"] + params["fc1_own_b"]
    emb_own = emb_own + params["agent_id_emb"][agent_idx] + params["action_id_emb"][act_idx]

    emb_en = 0.0
    hyper_outs = []
    for i, ef in enumerate(enemy_list):
        hp = params["hyper_enemys"][i]
        h1 = jax.nn.relu(ef @ hp["w1"] + hp["b1"])
        ho = h1 @ hp["w2"] + hp["b2"]
        hyper_outs.append(ho)
        ne_i = cfg["enemy_divide"][i][0]
        w1e = ho[:, : e_d * H * nh].reshape(-1, e_d, H * nh)
        e_i = jnp.matmul(ef[:, None, :], w1e).reshape(N, ne_i, nh, H).sum(axis=1)
        emb_en = emb_en + e_i

    af = ally_list[0]
    h1 = jax.nn.relu(af @ params["hyper_ally_w1"] + params["hyper_ally_b1"])
    hao = h1 @ params["hyper_ally_w2"] + params["hyper_ally_b2"]
    w1a = hao.reshape(-1, a_d, H * nh)
    emb_al = jnp.matmul(af[:, None, :], w1a).reshape(N, n_allies, nh, H).sum(axis=1)

    mw = jax.nn.softmax(params["merge_in_w"], axis=0)
    emb = emb_own + jnp.sum(mw[None] * (emb_en + emb_al), axis=1)
    x = jax.nn.relu(emb)

    h_in = hidden_state.reshape(-1, H)
    gi = x @ params["gru_wih"] + params["gru_bih"]
    gh = h_in @ params["gru_whh"] + params["gru_bhh"]
    r = jax.nn.sigmoid(gi[:, :H] + gh[:, :H])
    z = jax.nn.sigmoid(gi[:, H:2 * H] + gh[:, H:2 * H])
    n = jnp.tanh(gi[:, 2 * H:] + r * gh[:, 2 * H:])
    hh = (1.0 - z) * n + z * h_in

    q_normal = (hh @ params["fc2_normal_w"] + params["fc2_normal_b"]).reshape(bs, n_agents, 6)

    q_list = []
    for (ne_i, _), ho in zip(cfg["enemy_divide"], hyper_outs):
        w2 = ho[:, -(H + 1) * nh:-nh].reshape(N, ne_i * nh, H).transpose(0, 2, 1)
        b2 = ho[:, -nh:].reshape(N, ne_i * nh)
        q_i = (jnp.matmul(hh[:, None, :], w2)[:, 0] + b2).reshape(N, ne_i, nh)
        q_list.append(q_i)
    qa = jnp.concatenate(q_list, axis=1).reshape(N * n_enemies, nh)
    ow = jax.nn.softmax(params["merge_out_w"], axis=1)
    q_attack = jnp.sum(qa * ow, axis=1).reshape(bs, n_agents, n_enemies)

    q = jnp.concatenate([q_normal, q_attack], axis=-1)
    return q, hh.reshape(bs, n_agents, -1)


# ----------------------------------------------------------------------------
if __name__ == "__main__":
    cfg = dict(
        n_agents=3,
        n_enemies=4,
        n_actions=10,               # 6 normal + n_enemies attack actions
        n_heads=2,                  # args.api_head_num
        rnn_hidden_dim=32,
        api_hyper_dim=16,
        own_feats_dim=10,
        enemy_feats_dim=8,
        ally_feats_dim=7,
        enemy_divide=[(2, 8), (2, 8)],   # two enemy unit types, 2 enemies each
    )
    bs = 2
    N = bs * cfg["n_agents"]

    key = jax.random.PRNGKey(0)
    kp, k1, k2, k3, k4, k5, k6 = jax.random.split(key, 7)
    params = init_params(kp, cfg)

    own_feats = jax.random.normal(k1, (N, cfg["own_feats_dim"]), jnp.float32)
    enemy_feats_list = [
        jax.random.normal(k2, (N * cfg["enemy_divide"][0][0], cfg["enemy_feats_dim"]), jnp.float32),
        jax.random.normal(k3, (N * cfg["enemy_divide"][1][0], cfg["enemy_feats_dim"]), jnp.float32),
    ]
    ally_feats_list = [
        jax.random.normal(k4, (N * (cfg["n_agents"] - 1), cfg["ally_feats_dim"]), jnp.float32)
    ]
    agent_idx = jnp.tile(jnp.arange(cfg["n_agents"], dtype=jnp.int32), bs)
    last_action_idx = jax.random.randint(k5, (N,), 0, cfg["n_actions"], dtype=jnp.int32)
    hidden_state = 0.1 * jax.random.normal(
        k6, (bs, cfg["n_agents"], cfg["rnn_hidden_dim"]), jnp.float32)

    inputs = (bs, own_feats, enemy_feats_list, ally_feats_list, (agent_idx, last_action_idx))

    # float32 matmul precision for the wrapper-side parameter folds and the
    # reference, so the f32 Pallas matmuls can be compared at tight tolerance.
    with jax.default_matmul_precision("float32"):
        q, hh = api_rnn_forward(params, cfg, inputs, hidden_state)
        q = jax.block_until_ready(q)
        hh = jax.block_until_ready(hh)
        q_ref, hh_ref = reference_forward(params, cfg, inputs, hidden_state)

    assert q.shape == (bs, cfg["n_agents"], 6 + cfg["n_enemies"])
    assert hh.shape == (bs, cfg["n_agents"], cfg["rnn_hidden_dim"])

    np.testing.assert_allclose(np.asarray(hh), np.asarray(hh_ref), rtol=2e-3, atol=2e-3)
    np.testing.assert_allclose(np.asarray(q), np.asarray(q_ref), rtol=2e-3, atol=2e-3)

    print("KERNEL_OK")
</pallas_src>

<mosaic_0001>
module attributes {stable_mosaic.version = 11 : i64} {
  func.func @_fused_kernel(%arg0: i32, %arg1: memref<8x44xf32, #tpu.memory_space<vmem>>, %arg2: memref<4x8x8xf32, #tpu.memory_space<vmem>>, %arg3: memref<2x8x8xf32, #tpu.memory_space<vmem>>, %arg4: memref<640x128xf32, #tpu.memory_space<vmem>>, %arg5: memref<8x128xf32, #tpu.memory_space<vmem>>) attributes {dimension_semantics = [#tpu.dimension_semantics<parallel>], iteration_bounds = array<i64: 1>, scalar_prefetch = 0 : i64, scratch_operands = 0 : i64, tpu.core_type = #tpu.core_type<tc>, window_params = [{transform_indices = @transform_0, window_bounds = array<i64: 8, 44>}, {transform_indices = @transform_1, window_bounds = array<i64: 4, 8, 8>}, {transform_indices = @transform_2, window_bounds = array<i64: 2, 8, 8>}, {pipeline_mode = #tpu.pipeline_mode<synchronous>, transform_indices = @transform_3, window_bounds = array<i64: 640, 128>}, {transform_indices = @transform_4, window_bounds = array<i64: 8, 128>}]} {
    %c0 = arith.constant 0 : index
    %c0_0 = arith.constant 0 : index
    %0 = vector.load %arg1[%c0, %c0_0] : memref<8x44xf32, #tpu.memory_space<vmem>>, vector<8x44xf32>
    %1 = vector.extract_strided_slice %0 {offsets = [0, 0], sizes = [8, 10], strides = [1, 1]} : vector<8x44xf32> to vector<8x10xf32>
    %2 = vector.extract_strided_slice %0 {offsets = [0, 10], sizes = [8, 1], strides = [1, 1]} : vector<8x44xf32> to vector<8x1xf32>
    %3 = arith.fptosi %2 : vector<8x1xf32> to vector<8x1xi32>
    %4 = vector.extract_strided_slice %0 {offsets = [0, 11], sizes = [8, 1], strides = [1, 1]} : vector<8x44xf32> to vector<8x1xf32>
    %5 = arith.fptosi %4 : vector<8x1xf32> to vector<8x1xi32>
    %6 = vector.extract_strided_slice %0 {offsets = [0, 12], sizes = [8, 32], strides = [1, 1]} : vector<8x44xf32> to vector<8x32xf32>
    %7 = tpu.iota {dimensions = array<i32: 1>} : vector<8x13xi32>
    %8 = vector.broadcast %3 : vector<8x1xi32> to vector<8x13xi32>
    %9 = arith.cmpi eq, %7, %8 : vector<8x13xi32>
    %10 = arith.extui %9 : vector<8x13xi1> to vector<8x13xi32>
    %11 = arith.sitofp %10 : vector<8x13xi32> to vector<8x13xf32>
    %c3_i32 = arith.constant 3 : i32
    %12 = vector.broadcast %c3_i32 : i32 to vector<8x1xi32>
    %13 = arith.addi %5, %12 : vector<8x1xi32>
    %14 = vector.broadcast %13 : vector<8x1xi32> to vector<8x13xi32>
    %15 = arith.cmpi eq, %7, %14 : vector<8x13xi32>
    %16 = arith.extui %15 : vector<8x13xi1> to vector<8x13xi32>
    %17 = arith.sitofp %16 : vector<8x13xi32> to vector<8x13xf32>
    %18 = arith.addf %11, %17 : vector<8x13xf32>
    %c0_1 = arith.constant 0 : index
    %c0_2 = arith.constant 0 : index
    %19 = vector.load %arg4[%c0_1, %c0_2] : memref<640x128xf32, #tpu.memory_space<vmem>>, vector<10x32xf32>
    %cst = arith.constant dense<0.000000e+00> : vector<8x32xf32>
    %20 = tpu.matmul %1, %19, %cst {dimension_numbers = #tpu.dot_dimension_numbers<[1], [0], [0], [1], [0, 0, 1, 1], [], []>, precision = #tpu.contract_precision<fp32>} : vector<8x10xf32>, vector<10x32xf32>, vector<8x32xf32> -> vector<8x32xf32>
    %c16 = arith.constant 16 : index
    %c0_3 = arith.constant 0 : index
    %21 = vector.load %arg4[%c16, %c0_3] : memref<640x128xf32, #tpu.memory_space<vmem>>, vector<1x32xf32>
    %22 = vector.broadcast %21 : vector<1x32xf32> to vector<8x32xf32>
    %23 = arith.addf %20, %22 : vector<8x32xf32>
    %c24 = arith.constant 24 : index
    %c0_4 = arith.constant 0 : index
    %24 = vector.load %arg4[%c24, %c0_4] : memref<640x128xf32, #tpu.memory_space<vmem>>, vector<13x32xf32>
    %cst_5 = arith.constant dense<0.000000e+00> : vector<8x32xf32>
    %25 = tpu.matmul %18, %24, %cst_5 {dimension_numbers = #tpu.dot_dimension_numbers<[1], [0], [0], [1], [0, 0, 1, 1], [], []>, precision = #tpu.contract_precision<fp32>} : vector<8x13xf32>, vector<13x32xf32>, vector<8x32xf32> -> vector<8x32xf32>
    %26 = arith.addf %23, %25 : vector<8x32xf32>
    %c0_6 = arith.constant 0 : index
    %c0_7 = arith.constant 0 : index
    %c0_8 = arith.constant 0 : index
    %27 = vector.load %arg2[%c0_6, %c0_7, %c0_8] : memref<4x8x8xf32, #tpu.memory_space<vmem>>, vector<4x8x8xf32>
    %c0_9 = arith.constant 0 : index
    %c0_10 = arith.constant 0 : index
    %c0_11 = arith.constant 0 : index
    %28 = vector.load %arg3[%c0_9, %c0_10, %c0_11] : memref<2x8x8xf32, #tpu.memory_space<vmem>>, vector<2x8x8xf32>
    %29 = vector.extract_strided_slice %27 {offsets = [0, 0, 0], sizes = [2, 8, 8], strides = [1, 1, 1]} : vector<4x8x8xf32> to vector<2x8x8xf32>
    %30 = vector.shape_cast %29 : vector<2x8x8xf32> to vector<16x8xf32>
    %c40 = arith.constant 40 : index
    %c0_12 = arith.constant 0 : index
    %31 = vector.load %arg4[%c40, %c0_12] : memref<640x128xf32, #tpu.memory_space<vmem>>, vector<8x48xf32>
    %cst_13 = arith.constant dense<0.000000e+00> : vector<16x48xf32>
    %32 = tpu.matmul %30, %31, %cst_13 {dimension_numbers = #tpu.dot_dimension_numbers<[1], [0], [0], [1], [0, 0, 1, 1], [], []>, precision = #tpu.contract_precision<fp32>} : vector<16x8xf32>, vector<8x48xf32>, vector<16x48xf32> -> vector<16x48xf32>
    %33 = vector.extract_strided_slice %32 {offsets = [0, 0], sizes = [16, 16], strides = [1, 1]} : vector<16x48xf32> to vector<16x16xf32>
    %c48 = arith.constant 48 : index
    %c0_14 = arith.constant 0 : index
    %34 = vector.load %arg4[%c48, %c0_14] : memref<640x128xf32, #tpu.memory_space<vmem>>, vector<1x16xf32>
    %35 = vector.broadcast %34 : vector<1x16xf32> to vector<16x16xf32>
    %36 = arith.addf %33, %35 : vector<16x16xf32>
    %cst_15 = arith.constant 0.000000e+00 : f32
    %37 = vector.broadcast %cst_15 : f32 to vector<16x16xf32>
    %38 = arith.maximumf %36, %37 : vector<16x16xf32>
    %39 = vector.extract_strided_slice %30 {offsets = [0, 0], sizes = [16, 1], strides = [1, 1]} : vector<16x8xf32> to vector<16x1xf32>
    %40 = vector.broadcast %39 : vector<16x1xf32> to vector<16x16xf32>
    %41 = arith.mulf %40, %38 : vector<16x16xf32>
    %42 = vector.extract_strided_slice %30 {offsets = [0, 1], sizes = [16, 1], strides = [1, 1]} : vector<16x8xf32> to vector<16x1xf32>
    %43 = vector.broadcast %42 : vector<16x1xf32> to vector<16x16xf32>
    %44 = arith.mulf %43, %38 : vector<16x16xf32>
    %45 = vector.extract_strided_slice %30 {offsets = [0, 2], sizes = [16, 1], strides = [1, 1]} : vector<16x8xf32> to vector<16x1xf32>
    %46 = vector.broadcast %45 : vector<16x1xf32> to vector<16x16xf32>
    %47 = arith.mulf %46, %38 : vector<16x16xf32>
    %48 = vector.extract_strided_slice %30 {offsets = [0, 3], sizes = [16, 1], strides = [1, 1]} : vector<16x8xf32> to vector<16x1xf32>
    %49 = vector.broadcast %48 : vector<16x1xf32> to vector<16x16xf32>
    %50 = arith.mulf %49, %38 : vector<16x16xf32>
    %51 = vector.extract_strided_slice %30 {offsets = [0, 4], sizes = [16, 1], strides = [1, 1]} : vector<16x8xf32> to vector<16x1xf32>
    %52 = vector.broadcast %51 : vector<16x1xf32> to vector<16x16xf32>
    %53 = arith.mulf %52, %38 : vector<16x16xf32>
    %54 = vector.extract_strided_slice %30 {offsets = [0, 5], sizes = [16, 1], strides = [1, 1]} : vector<16x8xf32> to vector<16x1xf32>
    %55 = vector.broadcast %54 : vector<16x1xf32> to vector<16x16xf32>
    %56 = arith.mulf %55, %38 : vector<16x16xf32>
    %57 = vector.extract_strided_slice %30 {offsets = [0, 6], sizes = [16, 1], strides = [1, 1]} : vector<16x8xf32> to vector<16x1xf32>
    %58 = vector.broadcast %57 : vector<16x1xf32> to vector<16x16xf32>
    %59 = arith.mulf %58, %38 : vector<16x16xf32>
    %60 = vector.extract_strided_slice %30 {offsets = [0, 7], sizes = [16, 1], strides = [1, 1]} : vector<16x8xf32> to vector<16x1xf32>
    %61 = vector.broadcast %60 : vector<16x1xf32> to vector<16x16xf32>
    %62 = arith.mulf %61, %38 : vector<16x16xf32>
    %63 = tpu.concatenate %41, %44, %47, %50, %53, %56, %59, %62 in 1 : vector<16x16xf32>, vector<16x16xf32>, vector<16x16xf32>, vector<16x16xf32>, vector<16x16xf32>, vector<16x16xf32>, vector<16x16xf32>, vector<16x16xf32> -> vector<16x128xf32>
    %c56 = arith.constant 56 : index
    %c0_16 = arith.constant 0 : index
    %64 = vector.load %arg4[%c56, %c0_16] : memref<640x128xf32, #tpu.memory_space<vmem>>, vector<128x32xf32>
    %cst_17 = arith.constant dense<0.000000e+00> : vector<16x32xf32>
    %65 = tpu.matmul %63, %64, %cst_17 {dimension_numbers = #tpu.dot_dimension_numbers<[1], [0], [0], [1], [0, 0, 1, 1], [], []>, precision = #tpu.contract_precision<fp32>} : vector<16x128xf32>, vector<128x32xf32>, vector<16x32xf32> -> vector<16x32xf32>
    %66 = vector.extract_strided_slice %32 {offsets = [0, 16], sizes = [16, 32], strides = [1, 1]} : vector<16x48xf32> to vector<16x32xf32>
    %67 = arith.addf %65, %66 : vector<16x32xf32>
    %68 = vector.shape_cast %67 : vector<16x32xf32> to vector<2x8x32xf32>
    %cst_18 = arith.constant dense<0.000000e+00> : vector<8x32xf32>
    %69 = vector.multi_reduction <add>, %68, %cst_18 [0] : vector<2x8x32xf32> to vector<8x32xf32>
    %70 = arith.addf %26, %69 : vector<8x32xf32>
    %c184 = arith.constant 184 : index
    %c0_19 = arith.constant 0 : index
    %71 = vector.load %arg4[%c184, %c0_19] : memref<640x128xf32, #tpu.memory_space<vmem>>, vector<16x33xf32>
    %cst_20 = arith.constant dense<0.000000e+00> : vector<16x33xf32>
    %72 = tpu.matmul %38, %71, %cst_20 {dimension_numbers = #tpu.dot_dimension_numbers<[1], [0], [0], [1], [0, 0, 1, 1], [], []>, precision = #tpu.contract_precision<fp32>} : vector<16x16xf32>, vector<16x33xf32>, vector<16x33xf32> -> vector<16x33xf32>
    %c200 = arith.constant 200 : index
    %c0_21 = arith.constant 0 : index
    %73 = vector.load %arg4[%c200, %c0_21] : memref<640x128xf32, #tpu.memory_space<vmem>>, vector<1x33xf32>
    %74 = vector.broadcast %73 : vector<1x33xf32> to vector<16x33xf32>
    %75 = arith.addf %72, %74 : vector<16x33xf32>
    %76 = vector.extract_strided_slice %27 {offsets = [2, 0, 0], sizes = [2, 8, 8], strides = [1, 1, 1]} : vector<4x8x8xf32> to vector<2x8x8xf32>
    %77 = vector.shape_cast %76 : vector<2x8x8xf32> to vector<16x8xf32>
    %c208 = arith.constant 208 : index
    %c0_22 = arith.constant 0 : index
    %78 = vector.load %arg4[%c208, %c0_22] : memref<640x128xf32, #tpu.memory_space<vmem>>, vector<8x48xf32>
    %cst_23 = arith.constant dense<0.000000e+00> : vector<16x48xf32>
    %79 = tpu.matmul %77, %78, %cst_23 {dimension_numbers = #tpu.dot_dimension_numbers<[1], [0], [0], [1], [0, 0, 1, 1], [], []>, precision = #tpu.contract_precision<fp32>} : vector<16x8xf32>, vector<8x48xf32>, vector<16x48xf32> -> vector<16x48xf32>
    %80 = vector.extract_strided_slice %79 {offsets = [0, 0], sizes = [16, 16], strides = [1, 1]} : vector<16x48xf32> to vector<16x16xf32>
    %c216 = arith.constant 216 : index
    %c0_24 = arith.constant 0 : index
    %81 = vector.load %arg4[%c216, %c0_24] : memref<640x128xf32, #tpu.memory_space<vmem>>, vector<1x16xf32>
    %82 = vector.broadcast %81 : vector<1x16xf32> to vector<16x16xf32>
    %83 = arith.addf %80, %82 : vector<16x16xf32>
    %cst_25 = arith.constant 0.000000e+00 : f32
    %84 = vector.broadcast %cst_25 : f32 to vector<16x16xf32>
    %85 = arith.maximumf %83, %84 : vector<16x16xf32>
    %86 = vector.extract_strided_slice %77 {offsets = [0, 0], sizes = [16, 1], strides = [1, 1]} : vector<16x8xf32> to vector<16x1xf32>
    %87 = vector.broadcast %86 : vector<16x1xf32> to vector<16x16xf32>
    %88 = arith.mulf %87, %85 : vector<16x16xf32>
    %89 = vector.extract_strided_slice %77 {offsets = [0, 1], sizes = [16, 1], strides = [1, 1]} : vector<16x8xf32> to vector<16x1xf32>
    %90 = vector.broadcast %89 : vector<16x1xf32> to vector<16x16xf32>
    %91 = arith.mulf %90, %85 : vector<16x16xf32>
    %92 = vector.extract_strided_slice %77 {offsets = [0, 2], sizes = [16, 1], strides = [1, 1]} : vector<16x8xf32> to vector<16x1xf32>
    %93 = vector.broadcast %92 : vector<16x1xf32> to vector<16x16xf32>
    %94 = arith.mulf %93, %85 : vector<16x16xf32>
    %95 = vector.extract_strided_slice %77 {offsets = [0, 3], sizes = [16, 1], strides = [1, 1]} : vector<16x8xf32> to vector<16x1xf32>
    %96 = vector.broadcast %95 : vector<16x1xf32> to vector<16x16xf32>
    %97 = arith.mulf %96, %85 : vector<16x16xf32>
    %98 = vector.extract_strided_slice %77 {offsets = [0, 4], sizes = [16, 1], strides = [1, 1]} : vector<16x8xf32> to vector<16x1xf32>
    %99 = vector.broadcast %98 : vector<16x1xf32> to vector<16x16xf32>
    %100 = arith.mulf %99, %85 : vector<16x16xf32>
    %101 = vector.extract_strided_slice %77 {offsets = [0, 5], sizes = [16, 1], strides = [1, 1]} : vector<16x8xf32> to vector<16x1xf32>
    %102 = vector.broadcast %101 : vector<16x1xf32> to vector<16x16xf32>
    %103 = arith.mulf %102, %85 : vector<16x16xf32>
    %104 = vector.extract_strided_slice %77 {offsets = [0, 6], sizes = [16, 1], strides = [1, 1]} : vector<16x8xf32> to vector<16x1xf32>
    %105 = vector.broadcast %104 : vector<16x1xf32> to vector<16x16xf32>
    %106 = arith.mulf %105, %85 : vector<16x16xf32>
    %107 = vector.extract_strided_slice %77 {offsets = [0, 7], sizes = [16, 1], strides = [1, 1]} : vector<16x8xf32> to vector<16x1xf32>
    %108 = vector.broadcast %107 : vector<16x1xf32> to vector<16x16xf32>
    %109 = arith.mulf %108, %85 : vector<16x16xf32>
    %110 = tpu.concatenate %88, %91, %94, %97, %100, %103, %106, %109 in 1 : vector<16x16xf32>, vector<16x16xf32>, vector<16x16xf32>, vector<16x16xf32>, vector<16x16xf32>, vector<16x16xf32>, vector<16x16xf32>, vector<16x16xf32> -> vector<16x128xf32>
    %c224 = arith.constant 224 : index
    %c0_26 = arith.constant 0 : index
    %111 = vector.load %arg4[%c224, %c0_26] : memref<640x128xf32, #tpu.memory_space<vmem>>, vector<128x32xf32>
    %cst_27 = arith.constant dense<0.000000e+00> : vector<16x32xf32>
    %112 = tpu.matmul %110, %111, %cst_27 {dimension_numbers = #tpu.dot_dimension_numbers<[1], [0], [0], [1], [0, 0, 1, 1], [], []>, precision = #tpu.contract_precision<fp32>} : vector<16x128xf32>, vector<128x32xf32>, vector<16x32xf32> -> vector<16x32xf32>
    %113 = vector.extract_strided_slice %79 {offsets = [0, 16], sizes = [16, 32], strides = [1, 1]} : vector<16x48xf32> to vector<16x32xf32>
    %114 = arith.addf %112, %113 : vector<16x32xf32>
    %115 = vector.shape_cast %114 : vector<16x32xf32> to vector<2x8x32xf32>
    %cst_28 = arith.constant dense<0.000000e+00> : vector<8x32xf32>
    %116 = vector.multi_reduction <add>, %115, %cst_28 [0] : vector<2x8x32xf32> to vector<8x32xf32>
    %117 = arith.addf %70, %116 : vector<8x32xf32>
    %c352 = arith.constant 352 : index
    %c0_29 = arith.constant 0 : index
    %118 = vector.load %arg4[%c352, %c0_29] : memref<640x128xf32, #tpu.memory_space<vmem>>, vector<16x33xf32>
    %cst_30 = arith.constant dense<0.000000e+00> : vector<16x33xf32>
    %119 = tpu.matmul %85, %118, %cst_30 {dimension_numbers = #tpu.dot_dimension_numbers<[1], [0], [0], [1], [0, 0, 1, 1], [], []>, precision = #tpu.contract_precision<fp32>} : vector<16x16xf32>, vector<16x33xf32>, vector<16x33xf32> -> vector<16x33xf32>
    %c368 = arith.constant 368 : index
    %c0_31 = arith.constant 0 : index
    %120 = vector.load %arg4[%c368, %c0_31] : memref<640x128xf32, #tpu.memory_space<vmem>>, vector<1x33xf32>
    %121 = vector.broadcast %120 : vector<1x33xf32> to vector<16x33xf32>
    %122 = arith.addf %119, %121 : vector<16x33xf32>
    %123 = vector.shape_cast %28 : vector<2x8x8xf32> to vector<16x8xf32>
    %c376 = arith.constant 376 : index
    %c0_32 = arith.constant 0 : index
    %124 = vector.load %arg4[%c376, %c0_32] : memref<640x128xf32, #tpu.memory_space<vmem>>, vector<8x48xf32>
    %cst_33 = arith.constant dense<0.000000e+00> : vector<16x48xf32>
    %125 = tpu.matmul %123, %124, %cst_33 {dimension_numbers = #tpu.dot_dimension_numbers<[1], [0], [0], [1], [0, 0, 1, 1], [], []>, precision = #tpu.contract_precision<fp32>} : vector<16x8xf32>, vector<8x48xf32>, vector<16x48xf32> -> vector<16x48xf32>
    %126 = vector.extract_strided_slice %125 {offsets = [0, 0], sizes = [16, 16], strides = [1, 1]} : vector<16x48xf32> to vector<16x16xf32>
    %c384 = arith.constant 384 : index
    %c0_34 = arith.constant 0 : index
    %127 = vector.load %arg4[%c384, %c0_34] : memref<640x128xf32, #tpu.memory_space<vmem>>, vector<1x16xf32>
    %128 = vector.broadcast %127 : vector<1x16xf32> to vector<16x16xf32>
    %129 = arith.addf %126, %128 : vector<16x16xf32>
    %cst_35 = arith.constant 0.000000e+00 : f32
    %130 = vector.broadcast %cst_35 : f32 to vector<16x16xf32>
    %131 = arith.maximumf %129, %130 : vector<16x16xf32>
    %132 = vector.extract_strided_slice %123 {offsets = [0, 0], sizes = [16, 1], strides = [1, 1]} : vector<16x8xf32> to vector<16x1xf32>
    %133 = vector.broadcast %132 : vector<16x1xf32> to vector<16x16xf32>
    %134 = arith.mulf %133, %131 : vector<16x16xf32>
    %135 = vector.extract_strided_slice %123 {offsets = [0, 1], sizes = [16, 1], strides = [1, 1]} : vector<16x8xf32> to vector<16x1xf32>
    %136 = vector.broadcast %135 : vector<16x1xf32> to vector<16x16xf32>
    %137 = arith.mulf %136, %131 : vector<16x16xf32>
    %138 = vector.extract_strided_slice %123 {offsets = [0, 2], sizes = [16, 1], strides = [1, 1]} : vector<16x8xf32> to vector<16x1xf32>
    %139 = vector.broadcast %138 : vector<16x1xf32> to vector<16x16xf32>
    %140 = arith.mulf %139, %131 : vector<16x16xf32>
    %141 = vector.extract_strided_slice %123 {offsets = [0, 3], sizes = [16, 1], strides = [1, 1]} : vector<16x8xf32> to vector<16x1xf32>
    %142 = vector.broadcast %141 : vector<16x1xf32> to vector<16x16xf32>
    %143 = arith.mulf %142, %131 : vector<16x16xf32>
    %144 = vector.extract_strided_slice %123 {offsets = [0, 4], sizes = [16, 1], strides = [1, 1]} : vector<16x8xf32> to vector<16x1xf32>
    %145 = vector.broadcast %144 : vector<16x1xf32> to vector<16x16xf32>
    %146 = arith.mulf %145, %131 : vector<16x16xf32>
    %147 = vector.extract_strided_slice %123 {offsets = [0, 5], sizes = [16, 1], strides = [1, 1]} : vector<16x8xf32> to vector<16x1xf32>
    %148 = vector.broadcast %147 : vector<16x1xf32> to vector<16x16xf32>
    %149 = arith.mulf %148, %131 : vector<16x16xf32>
    %150 = vector.extract_strided_slice %123 {offsets = [0, 6], sizes = [16, 1], strides = [1, 1]} : vector<16x8xf32> to vector<16x1xf32>
    %151 = vector.broadcast %150 : vector<16x1xf32> to vector<16x16xf32>
    %152 = arith.mulf %151, %131 : vector<16x16xf32>
    %153 = vector.extract_strided_slice %123 {offsets = [0, 7], sizes = [16, 1], strides = [1, 1]} : vector<16x8xf32> to vector<16x1xf32>
    %154 = vector.broadcast %153 : vector<16x1xf32> to vector<16x16xf32>
    %155 = arith.mulf %154, %131 : vector<16x16xf32>
    %156 = tpu.concatenate %134, %137, %140, %143, %146, %149, %152, %155 in 1 : vector<16x16xf32>, vector<16x16xf32>, vector<16x16xf32>, vector<16x16xf32>, vector<16x16xf32>, vector<16x16xf32>, vector<16x16xf32>, vector<16x16xf32> -> vector<16x128xf32>
    %c392 = arith.constant 392 : index
    %c0_36 = arith.constant 0 : index
    %157 = vector.load %arg4[%c392, %c0_36] : memref<640x128xf32, #tpu.memory_space<vmem>>, vector<128x32xf32>
    %cst_37 = arith.constant dense<0.000000e+00> : vector<16x32xf32>
    %158 = tpu.matmul %156, %157, %cst_37 {dimension_numbers = #tpu.dot_dimension_numbers<[1], [0], [0], [1], [0, 0, 1, 1], [], []>, precision = #tpu.contract_precision<fp32>} : vector<16x128xf32>, vector<128x32xf32>, vector<16x32xf32> -> vector<16x32xf32>
    %159 = vector.extract_strided_slice %125 {offsets = [0, 16], sizes = [16, 32], strides = [1, 1]} : vector<16x48xf32> to vector<16x32xf32>
    %160 = arith.addf %158, %159 : vector<16x32xf32>
    %161 = vector.shape_cast %160 : vector<16x32xf32> to vector<2x8x32xf32>
    %cst_38 = arith.constant dense<0.000000e+00> : vector<8x32xf32>
    %162 = vector.multi_reduction <add>, %161, %cst_38 [0] : vector<2x8x32xf32> to vector<8x32xf32>
    %163 = arith.addf %117, %162 : vector<8x32xf32>
    %cst_39 = arith.constant 0.000000e+00 : f32
    %164 = vector.broadcast %cst_39 : f32 to vector<8x32xf32>
    %165 = arith.maximumf %163, %164 : vector<8x32xf32>
    %c520 = arith.constant 520 : index
    %c0_40 = arith.constant 0 : index
    %166 = vector.load %arg4[%c520, %c0_40] : memref<640x128xf32, #tpu.memory_space<vmem>>, vector<32x96xf32>
    %cst_41 = arith.constant dense<0.000000e+00> : vector<8x96xf32>
    %167 = tpu.matmul %165, %166, %cst_41 {dimension_numbers = #tpu.dot_dimension_numbers<[1], [0], [0], [1], [0, 0, 1, 1], [], []>, precision = #tpu.contract_precision<fp32>} : vector<8x32xf32>, vector<32x96xf32>, vector<8x96xf32> -> vector<8x96xf32>
    %c584 = arith.constant 584 : index
    %c0_42 = arith.constant 0 : index
    %168 = vector.load %arg4[%c584, %c0_42] : memref<640x128xf32, #tpu.memory_space<vmem>>, vector<1x96xf32>
    %169 = vector.broadcast %168 : vector<1x96xf32> to vector<8x96xf32>
    %170 = arith.addf %167, %169 : vector<8x96xf32>
    %c552 = arith.constant 552 : index
    %c0_43 = arith.constant 0 : index
    %171 = vector.load %arg4[%c552, %c0_43] : memref<640x128xf32, #tpu.memory_space<vmem>>, vector<32x96xf32>
    %cst_44 = arith.constant dense<0.000000e+00> : vector<8x96xf32>
    %172 = tpu.matmul %6, %171, %cst_44 {dimension_numbers = #tpu.dot_dimension_numbers<[1], [0], [0], [1], [0, 0, 1, 1], [], []>, precision = #tpu.contract_precision<fp32>} : vector<8x32xf32>, vector<32x96xf32>, vector<8x96xf32> -> vector<8x96xf32>
    %c592 = arith.constant 592 : index
    %c0_45 = arith.constant 0 : index
    %173 = vector.load %arg4[%c592, %c0_45] : memref<640x128xf32, #tpu.memory_space<vmem>>, vector<1x96xf32>
    %174 = vector.broadcast %173 : vector<1x96xf32> to vector<8x96xf32>
    %175 = arith.addf %172, %174 : vector<8x96xf32>
    %176 = vector.extract_strided_slice %170 {offsets = [0, 0], sizes = [8, 32], strides = [1, 1]} : vector<8x96xf32> to vector<8x32xf32>
    %177 = vector.extract_strided_slice %175 {offsets = [0, 0], sizes = [8, 32], strides = [1, 1]} : vector<8x96xf32> to vector<8x32xf32>
    %178 = arith.addf %176, %177 : vector<8x32xf32>
    %179 = arith.negf %178 : vector<8x32xf32>
    %180 = math.exp %179 : vector<8x32xf32>
    %cst_46 = arith.constant 1.000000e+00 : f32
    %181 = vector.broadcast %cst_46 : f32 to vector<8x32xf32>
    %182 = arith.addf %181, %180 : vector<8x32xf32>
    %183 = arith.divf %181, %182 : vector<8x32xf32>
    %184 = vector.extract_strided_slice %170 {offsets = [0, 32], sizes = [8, 32], strides = [1, 1]} : vector<8x96xf32> to vector<8x32xf32>
    %185 = vector.extract_strided_slice %175 {offsets = [0, 32], sizes = [8, 32], strides = [1, 1]} : vector<8x96xf32> to vector<8x32xf32>
    %186 = arith.addf %184, %185 : vector<8x32xf32>
    %187 = arith.negf %186 : vector<8x32xf32>
    %188 = math.exp %187 : vector<8x32xf32>
    %cst_47 = arith.constant 1.000000e+00 : f32
    %189 = vector.broadcast %cst_47 : f32 to vector<8x32xf32>
    %190 = arith.addf %189, %188 : vector<8x32xf32>
    %191 = arith.divf %189, %190 : vector<8x32xf32>
    %192 = vector.extract_strided_slice %170 {offsets = [0, 64], sizes = [8, 32], strides = [1, 1]} : vector<8x96xf32> to vector<8x32xf32>
    %193 = vector.extract_strided_slice %175 {offsets = [0, 64], sizes = [8, 32], strides = [1, 1]} : vector<8x96xf32> to vector<8x32xf32>
    %194 = arith.mulf %183, %193 : vector<8x32xf32>
    %195 = arith.addf %192, %194 : vector<8x32xf32>
    %196 = math.tanh %195 : vector<8x32xf32>
    %cst_48 = arith.constant 1.000000e+00 : f32
    %197 = vector.broadcast %cst_48 : f32 to vector<8x32xf32>
    %198 = arith.subf %197, %191 : vector<8x32xf32>
    %199 = arith.mulf %198, %196 : vector<8x32xf32>
    %200 = arith.mulf %191, %6 : vector<8x32xf32>
    %201 = arith.addf %199, %200 : vector<8x32xf32>
    %c600 = arith.constant 600 : index
    %c0_49 = arith.constant 0 : index
    %202 = vector.load %arg4[%c600, %c0_49] : memref<640x128xf32, #tpu.memory_space<vmem>>, vector<32x6xf32>
    %cst_50 = arith.constant dense<0.000000e+00> : vector<8x6xf32>
    %203 = tpu.matmul %201, %202, %cst_50 {dimension_numbers = #tpu.dot_dimension_numbers<[1], [0], [0], [1], [0, 0, 1, 1], [], []>, precision = #tpu.contract_precision<fp32>} : vector<8x32xf32>, vector<32x6xf32>, vector<8x6xf32> -> vector<8x6xf32>
    %c632 = arith.constant 632 : index
    %c0_51 = arith.constant 0 : index
    %204 = vector.load %arg4[%c632, %c0_51] : memref<640x128xf32, #tpu.memory_space<vmem>>, vector<1x6xf32>
    %205 = vector.broadcast %204 : vector<1x6xf32> to vector<8x6xf32>
    %206 = arith.addf %203, %205 : vector<8x6xf32>
    %207 = tpu.concatenate %75, %122 in 0 : vector<16x33xf32>, vector<16x33xf32> -> vector<32x33xf32>
    %208 = vector.shape_cast %207 : vector<32x33xf32> to vector<4x8x33xf32>
    %209 = vector.shape_cast %201 : vector<8x32xf32> to vector<1x8x32xf32>
    %210 = vector.extract_strided_slice %208 {offsets = [0, 0, 0], sizes = [4, 8, 32], strides = [1, 1, 1]} : vector<4x8x33xf32> to vector<4x8x32xf32>
    %211 = vector.broadcast %209 : vector<1x8x32xf32> to vector<4x8x32xf32>
    %212 = arith.mulf %211, %210 : vector<4x8x32xf32>
    %cst_52 = arith.constant dense<0.000000e+00> : vector<4x8xf32>
    %213 = vector.multi_reduction <add>, %212, %cst_52 [2] : vector<4x8x32xf32> to vector<4x8xf32>
    %214 = vector.extract_strided_slice %208 {offsets = [0, 0, 32], sizes = [4, 8, 1], strides = [1, 1, 1]} : vector<4x8x33xf32> to vector<4x8x1xf32>
    %215 = vector.shape_cast %214 : vector<4x8x1xf32> to vector<4x8xf32>
    %216 = arith.addf %213, %215 : vector<4x8xf32>
    %217 = tpu.transpose %216, [1, 0] : vector<4x8xf32> -> vector<8x4xf32>
    %cst_53 = arith.constant 0.000000e+00 : f32
    %218 = vector.broadcast %cst_53 : f32 to vector<8x86xf32>
    %219 = tpu.concatenate %206, %217, %218, %201 in 1 : vector<8x6xf32>, vector<8x4xf32>, vector<8x86xf32>, vector<8x32xf32> -> vector<8x128xf32>
    %c0_54 = arith.constant 0 : index
    %c0_55 = arith.constant 0 : index
    %220 = vector.load %arg5[%c0_54, %c0_55] : memref<8x128xf32, #tpu.memory_space<vmem>>, vector<8x128xf32>
    tpu.vector_store %arg5[%c0_54, %c0_55], %219 {strides = array<i32>} : memref<8x128xf32, #tpu.memory_space<vmem>>, vector<8x128xf32>,
    return
  }
  func.func @transform_0(%arg0: i32) -> (i32, i32) {
    %c0_i32 = arith.constant 0 : i32
    %c0_i32_0 = arith.constant 0 : i32
    return %arg0, %c0_i32 : i32, i32
  }
  func.func @transform_1(%arg0: i32) -> (i32, i32, i32) {
    %c0_i32 = arith.constant 0 : i32
    %c0_i32_0 = arith.constant 0 : i32
    %c0_i32_1 = arith.constant 0 : i32
    return %c0_i32, %arg0, %c0_i32_0 : i32, i32, i32
  }
  func.func @transform_2(%arg0: i32) -> (i32, i32, i32) {
    %c0_i32 = arith.constant 0 : i32
    %c0_i32_0 = arith.constant 0 : i32
    %c0_i32_1 = arith.constant 0 : i32
    return %c0_i32, %arg0, %c0_i32_0 : i32, i32, i32
  }
  func.func @transform_3(%arg0: i32) -> (i32, i32) {
    %c0_i32 = arith.constant 0 : i32
    %c0_i32_0 = arith.constant 0 : i32
    %c0_i32_1 = arith.constant 0 : i32
    return %c0_i32, %c0_i32_0 : i32, i32
  }
  func.func @transform_4(%arg0: i32) -> (i32, i32) {
    %c0_i32 = arith.constant 0 : i32
    %c0_i32_0 = arith.constant 0 : i32
    return %arg0, %c0_i32 : i32, i32
  }
}

</mosaic_0001>

<bundles_post_ra>
// kernel: tpu_custom_call.1
= control target key start
LH: loop header
LB: loop body
LE: loop exit
PB: predicated region body
PF: predicated region fallthrough
CT: control target
= control target key end

     0   :  { %9 = vsyncpa [#allocation3], 0  ;;  %s5486_s0 = inlined_call_operand.hbm [shape: f32[8,44], index: 0, kind: input, shape index: {}]   ;;  %s5487_s1 = inlined_call_operand.hbm [shape: f32[4,8,8], index: 1, kind: input, shape index: {}]   ;;  %s5488_s2 = inlined_call_operand.hbm [shape: f32[2,8,8], index: 2, kind: input, shape index: {}]   ;;  %s5489_s3 = inlined_call_operand.hbm [shape: f32[640,128], index: 3, kind: input, shape index: {}]   ;;  %s5490_s4 = inlined_call_operand.hbm [shape: f32[8,128], index: 4, kind: output, shape index: {}]  }
   0x1   :  { %10 = vsyncpa [#allocation6], 0 }
   0x2   :  { %11 = vsyncpa [#allocation9], 0  ;;  %s28_s17 = sshll.u32 %s5487_s1, 4  ;;  %s29_s17 = int_to_ptr.hbm [resolvable:$true] %s28_s17 }
   0x3   :  { %12 = vsyncpa [#allocation4], 0  ;;  %s4076_s18 = smov [#allocation5]   ;;  %s18_s22 = sshll.u32 %s5486_s0, 4  ;;  %s19_s22 = int_to_ptr.hbm [resolvable:$true] %s18_s22 }
   0x4   :  { %s30_s19 = sshll.u32 %s4076_s18, 4  ;;  %s4077_s23 = smov 128   ;;  %s31_s19 = int_to_ptr.vmem [resolvable:$true] %s30_s19 }
   0x5   :  { %s4078_s24 = smov 8   ;;  %s4079_s25 = smov [#allocation2]  }
   0x6   :  { %36 = dma.hbm_to_vmem [thread:$0]  %s29_s17, 512, %s31_s19, [#allocation6], %s4077_s23, %s4077_s23, %s4078_s24  }
   0x7   :  { %s20_s26 = sshll.u32 %s4079_s25, 4  ;;  %s41_s29 = sshll.u32 %s5488_s2, 4  ;;  %s21_s26 = int_to_ptr.vmem [resolvable:$true] %s20_s26  ;;  %s42_s29 = int_to_ptr.hbm [resolvable:$true] %s41_s29 }
   0x8   :  { %23 = dma.hbm_to_vmem [thread:$0]  %s19_s22, 128, %s21_s26, [#allocation3]  }
   0x9   :  { %s54_s5 = sshll.u32 %s5489_s3, 4  ;;  %s4080_s6 = smov [#allocation7]   ;;  %s55_s5 = int_to_ptr.hbm [resolvable:$true] %s54_s5 }
   0xa   :  { %s43_s7 = sshll.u32 %s4080_s6, 4  ;;  %s4081_s0 = smov [#allocation8]   ;;  %s44_s7 = int_to_ptr.vmem [resolvable:$true] %s43_s7 }
   0xb   :  { %49 = dma.hbm_to_vmem [thread:$0]  %s42_s29, 256, %s44_s7, [#allocation6], %s4077_s23, %s4077_s23, %s4078_s24  }
   0xc   :  { %s56_s8 = sshll.u32 %s4081_s0, 4  ;;  %s57_s8 = int_to_ptr.vmem [resolvable:$true] %s56_s8 }
   0xd   :  { %62 = dma.hbm_to_vmem [thread:$0]  %s55_s5, 10240, %s57_s8, [#allocation9], %s4077_s23, %s4077_s23, %s4078_s24  }
   0xe   :  { %4068 = dma.done.wait [#allocation3], 128  }
   0xf   :  { %4069 = vsyncadd [#allocation3], 4294967168 }
  0x10   :  { %4070 = dma.done.wait [#allocation6], 768  }
  0x11   :  { %4071 = vsyncadd [#allocation6], 4294966528 }
  0x12   :  { %4072 = dma.done.wait [#allocation9], 10240  }
  0x13   :  { %4073 = vsyncadd [#allocation9], 4294957056  ;;  %v4082_v0 = vmov 10   ;;  %vm105_vm0 = vcmask 1041408   ;;  %v79_v1 = vld [vmem:[#allocation2] sm:$0xff]  ;;  %v4083_v10 = vmov 11   ;;  %v81_v48 = vlaneseq }
  0x14   :  { %3879 = vset.pattern.permute.xlu0 %v4082_v0  ;;  %v98_v2 = vld [vmem:[#allocation8 + $0x8] sm:$0x3]  ;;  %vm3845_vm1 = vcmp.lt.s32.totalorder %v79_v1, 0  ;;  %v3846_v3 = vceil.f32 %v79_v1  ;;  %v3847_v4 = vfloor.f32 %v79_v1  ;;  %vm101_vm2 = vcmask 80896   ;;  %v97_v12 = vld [vmem:[#allocation8] sm:$0xff]  ;;  %v268_v30 = vld [vmem:[#allocation8 + $0x18] sm:$0xff] }
  0x15   :  { %v107_v5 = vsel %vm105_vm0, %v98_v2, 0  ;;  %v103_v11 = vsel %vm101_vm2, %v79_v1, 0  ;;  %v125_v14 = vand.u32 4294901760, %v97_v12  ;;  %v269_v27 = vld [vmem:[#allocation8 + $0x20] sm:$0x1f]  ;;  %vm274_vm3 = vcmask 1044480  }
  0x16   :  { %v123_v6 = vand.u32 4294901760, %v107_v5  ;;  %v3848_v7 = vsel %vm3845_vm1, %v3846_v3, %v3847_v4  ;;  %v127_v13 = vand.u32 4294901760, %v103_v11  ;;  %v276_v28 = vsel %vm274_vm3, %v269_v27, 0  ;;  %v4144_v41 = vld [vmem:[#allocation5] sm:$0xff]  ;;  %v444_v42 = vld [vmem:[#allocation8 + $0x28] sm:$0xff]  ;;  %v4158_v56 = vld [vmem:[#allocation5 + $0x8] sm:$0xff] }
  0x17   :  { %v3849_v8 = vcvt.f32.s32 %v3848_v7  ;;  %v157_v18 = vsub.f32 %v97_v12, %v125_v14  ;;  %v292_v29 = vand.u32 4294901760, %v276_v28  ;;  %v294_v32 = vand.u32 4294901760, %v268_v30  ;;  %s4093_s2 = smov 48   ;;  %s4094_s3 = smov 32  }
  0x18   :  { %124 = vmatpush.msra.mxu0 %v123_v6  ;;  %208 = vmatpush.msra.mxu3 %v123_v6  ;;  %v151_v15 = vsub.f32 %v107_v5, %v123_v6  ;;  %v128_v16 = vsub.f32 %v103_v11, %v127_v13  ;;  %v5499_v40 = vmov 1   ;;  %v5493_v43 = vmov 2   ;;  %s4095_s9 = smov 16   ;;  %s4096_s10 = smov 96  }
  0x19   :  { %84 = vperm.xlu0 %3879, %v3849_v8   ;;  %v89_v9 = vadd.s32 3, %v3849_v8  ;;  %v158_v21 = vand.u32 4294901760, %v157_v18  ;;  %v320_v31 = vsub.f32 %v276_v28, %v292_v29  ;;  %v326_v34 = vsub.f32 %v268_v30, %v294_v32  ;;  %3881 = vset.pattern.permute.xlu1 %v5499_v40  ;;  %s4097_s11 = smov 80   ;;  %s4098_s12 = smov 64  }
  0x1a   :  { %126 = vmatpush.msra.mxu0 %v125_v14  ;;  %v152_v17 = vand.u32 4294901760, %v151_v15  ;;  %183 = vmatpush.msra.mxu2 %v151_v15  ;;  %v129_v19 = vand.u32 4294901760, %v128_v16  ;;  %v467_v44 = vand.u32 4294901760, %v444_v42  ;;  %v5505_v51 = vmov 5   ;;  %s4099_s13 = smov 112   ;;  %s4100_s14 = smov 116  }
  0x1b   :  { %210 = vmatpush.msra.mxu3 %v125_v14  ;;  %v159_v24 = vsub.f32 %v157_v18, %v158_v21  ;;  %v321_v33 = vand.u32 4294901760, %v320_v31  ;;  %v327_v36 = vand.u32 4294901760, %v326_v34  ;;  %646 = vperm.xlu1 %3881, %v4144_v41   ;;  %vm445_vm4 = vcmask 64512   ;;  %s4101_s15 = smov 20   ;;  %s4103_s16 = smov 6  }
  0x1c   :  { %v153_v20 = vsub.f32 %v151_v15, %v152_v17  ;;  %186 = vmatpush.msra.mxu2 %v157_v18  ;;  %235 = vmatpush.msrb.mxu0 %v152_v17  ;;  %v130_v22 = vsub.f32 %v128_v16, %v129_v19  ;;  %v502_v45 = vsub.f32 %v444_v42, %v467_v44  ;;  %v4151_v52 = vand.u32 127, %v81_v48  ;;  %v3933_v48 = vld [vmem:[#allocation8 + $0x30] ss:$0 sm:$0xff]  ;;  %s4104_s17 = smov [#allocation10]   ;;  %s3830_s21 = sshll.u32 %s5490_s4, 4  ;;  %s3831_s21 = int_to_ptr.hbm [resolvable:$true] %s3830_s21 }
  0x1d   :  { %189 = vmatmul.f32.vlgmr.msra.gmra.mxu2 %v128_v16  ;;  %214 = vmatmul.f32.vlgmr.msra.gmra.mxu3 %v129_v19  ;;  %v160_v26 = vand.u32 4294901760, %v159_v24  ;;  %v322_v35 = vsub.f32 %v320_v31, %v321_v33  ;;  %v328_v38 = vsub.f32 %v326_v34, %v327_v36  ;;  %v447_v53 = vsel %vm445_vm4, %v4144_v41, 0  ;;  %s3828_s18 = sshll.u32 %s4104_s17, 4  ;;  %s3829_s18 = int_to_ptr.vmem [resolvable:$true] %s3828_s18 }
  0x1e   :  { %v154_v23 = vand.u32 4294901760, %v153_v20  ;;  %239 = vmatpush.msrb.mxu0 %v158_v21  ;;  %v131_v25 = vand.u32 4294901760, %v130_v22  ;;  %293 = vmatpush.msrb.mxu2 %v292_v29  ;;  %v503_v46 = vand.u32 4294901760, %v502_v45  ;;  %5547 = vst [vmem:[#allocation15_spill] sm:$0xff] %v4151_v52  ;;  %v4155_v54 = vand.u32 4294901760, %v447_v53 }
  0x1f   :  { %v323_v37 = vand.u32 4294901760, %v322_v35  ;;  %v329_v39 = vand.u32 4294901760, %v328_v38  ;;  %v5495_v57 = vmov 3   ;;  %v4088_v58 = vmov 0.0  }
  0x20   :  { %155 = vmatpush.msra.mxu1 %v154_v23  ;;  %132 = vmatmul.f32.vlgmr.msra.gmra.mxu0 %v131_v25  ;;  %v504_v47 = vsub.f32 %v502_v45, %v503_v46  ;;  %vm270_vm7 = vcmask 105472   ;;  %v470_v61 = vsub.f32 %v447_v53, %v4155_v54  ;;  %v450_v63 = vsel %vm445_vm4, %v4158_v56, 0 }
  0x21   :  { %3880 = vset.pattern.permute.xlu0 %v4083_v10  ;;  %352 = vmatpush.msra.mxu0 %v320_v31  ;;  %v477_v3 = vand.u32 4294901760, %v450_v63  ;;  %v5497_v15 = vmov 6   ;;  %v5491_v17 = vmov 0   ;;  %vm774_vm8 = vcmask 261120  }
  0x22   :  { %91 = vperm.xlu0 %3880, %v89_v9   ;;  %161 = vmatpush.msra.mxu1 %v160_v26  ;;  %v505_v50 = vand.u32 4294901760, %v504_v47  ;;  %v471_v2 = vand.u32 4294901760, %v470_v61  ;;  %v5503_v9 = vmov 4   ;;  %vm771_vm9 = vcmask 130048  }
  0x23   :  { %163 = vmatmul.f32.vlgmr.msra.gmra.mxu1 %v127_v13  ;;  %295 = vmatpush.msrb.mxu2 %v294_v32  ;;  %v478_v7 = vsub.f32 %v450_v63, %v477_v3  ;;  %vm777_vm10 = vcmask 392192   ;;  %vm780_vm11 = vcmask 523264   ;;  %vm783_vm12 = vcmask 654336  }
  0x24   :  { %260 = vmatpush.msrb.mxu1 %v123_v6  ;;  %355 = vmatpush.msra.mxu0 %v326_v34  ;;  %v472_v6 = vsub.f32 %v470_v61, %v471_v2  ;;  %vm786_vm13 = vcmask 785408   ;;  %vm789_vm14 = vcmask 916480  }
  0x25   :  { %404 = vmatpush.msra.mxu2 %v321_v33  ;;  %324 = vmatpush.msrb.mxu3 %v323_v37  ;;  %v479_v12 = vand.u32 4294901760, %v478_v7 }
  0x26   :  { %262 = vmatpush.msrb.mxu1 %v125_v14  ;;  %3882 = vset.pattern.permute.xlu1 %v5493_v43  ;;  %v473_v11 = vand.u32 4294901760, %v472_v6 }
  0x27   :  { %408 = vmatpush.msra.mxu2 %v327_v36  ;;  %330 = vmatpush.msrb.mxu3 %v329_v39  ;;  %v480_v14 = vsub.f32 %v478_v7, %v479_v12 }
  0x28   :  { %377 = vmatpush.msra.mxu1 %v292_v29  ;;  %241 = vmatmul.f32.vlgmr.msrb.gmra.mxu0 %v127_v13 }
  0x29   :  { %429 = vmatpush.msra.mxu3 %v292_v29  ;;  %656 = vperm.xlu1 %3882, %v4144_v41   ;;  %v481_v16 = vand.u32 4294901760, %v480_v14 }
  0x2a   :  { %379 = vmatpush.msra.mxu1 %v294_v32  ;;  %468 = vmatpush.msrb.mxu0 %v467_v44 }
  0x2b   :  { %264 = vmatmul.f32.vlgmr.msrb.gmra.mxu1 %v127_v13  ;;  %431 = vmatpush.msra.mxu3 %v294_v32  ;;  %v5501_v13 = vmov 7  }
  0x2c   :  { %506 = vmatpush.msrb.mxu1 %v505_v50  ;;  %3883 = vset.pattern.permute.xlu2 %v5495_v57 }
  0x2d   :  { %666 = vperm.xlu2 %3883, %v4144_v41   ;;  %3887 = vset.pattern.permute.xlu0 %v5501_v13 }
  0x2e   :  { %706 = vperm.xlu0 %3887, %v4144_v41  }
  0x31   :  { %3885 = vset.pattern.permute.xlu1 %v5505_v51 }
  0x32   :  { %686 = vperm.xlu1 %3885, %v4144_v41  }
  0x35   :  { %3884 = vset.pattern.permute.xlu2 %v5503_v9 }
  0x36   :  { %676 = vperm.xlu2 %3884, %v4144_v41   ;;  %3892 = vset.pattern.permute.xlu0 %v5505_v51 }
  0x37   :  { %690 = vperm.xlu0 %3892, %v4158_v56  }
  0x3a   :  { %3888 = vset.pattern.permute.xlu1 %v5499_v40 }
  0x3b   :  { %650 = vperm.xlu1 %3888, %v4158_v56  }
  0x3e   :  { %3886 = vset.pattern.permute.xlu2 %v5497_v15 }
  0x3f   :  { %696 = vperm.xlu2 %3886, %v4144_v41   ;;  %3898 = vset.pattern.permute.xlu0 %v5493_v43 }
  0x43   :  { %3890 = vset.pattern.permute.xlu1 %v5495_v57 }
  0x44   :  { %670 = vperm.xlu1 %3890, %v4158_v56  }
  0x47   :  { %3889 = vset.pattern.permute.xlu2 %v5493_v43 }
  0x48   :  { %660 = vperm.xlu2 %3889, %v4158_v56  }
  0x4c   :  { %3893 = vset.pattern.permute.xlu1 %v5497_v15  ;;  %v794_v15 = vld [vmem:[#allocation8 + $0x48] sm:$0xff] }
  0x4d   :  { %700 = vperm.xlu1 %3893, %v4158_v56  }
  0x50   :  { %3891 = vset.pattern.permute.xlu2 %v5503_v9  ;;  %v793_v9 = vld [vmem:[#allocation8 + $0x40] sm:$0xff] }
  0x51   :  { %680 = vperm.xlu2 %3891, %v4158_v56  }
  0x55   :  { %3895 = vset.pattern.permute.xlu1 %v5491_v17 }
  0x56   :  { %636 = vperm.xlu1 %3895, %v4144_v41  }
  0x59   :  { %3894 = vset.pattern.permute.xlu2 %v5501_v13  ;;  %v4403_v13 = vand.u32 4294901760, %v794_v15 }
  0x5a   :  { %710 = vperm.xlu2 %3894, %v4158_v56  }
  0x5e   :  { %3899 = vset.pattern.permute.xlu1 %v5495_v57 }
  0x62   :  { %3896 = vset.pattern.permute.xlu2 %v5491_v17 }
  0x63   :  { %640 = vperm.xlu2 %3896, %v4158_v56  }
  0x6b   :  { %3897 = vset.pattern.permute.xlu2 %v5499_v40 }
  0x87   :  { %v667_v33 = vpop.permute.xlu2 %666 }
  0x8b   :  { %v85_v49 = vpop.permute.xlu0 %84 }
  0x8c   :  { %vm86_vm5 = vcmp.eq.s32.totalorder %v4151_v52, %v85_v49 }
  0x8d   :  { %v3842_v59 = vsel %vm86_vm5, 1.0, %v4088_v58  ;;  %v647_v34 = vpop.permute.xlu1 %646  ;;  %vm3774_vm5 = vcmask 1042434  }
  0x94   :  { %v92_v55 = vpop.permute.xlu0 %91 }
  0x95   :  { %vm93_vm6 = vcmp.eq.s32.totalorder %v4151_v52, %v92_v55  ;;  %v1739_v52 = vld [vmem:[#allocation8 + $0x118] sm:$0xff] }
  0x96   :  { %v3843_v60 = vsel %vm93_vm6, 1.0, %v4088_v58  ;;  %vm3776_vm6 = vcmask 1043459  }
  0x97   :  { %v96_v62 = vadd.f32 %v3843_v60, %v3842_v59 }
  0x99   :  { %v272_v0 = vsel %vm270_vm7, %v96_v62, 0  ;;  %vm3818_vm7 = vcmask 48128  }
  0x9a   :  { %v296_v1 = vand.u32 4294901760, %v272_v0 }
  0x9c   :  { %v297_v4 = vsub.f32 %v272_v0, %v296_v1  ;;  %332 = vmatmul.f32.vlgmr.msrb.gmra.mxu3 %v296_v1 }
  0x9d   :  { %561 = vmatpush.msrb.mxu3 %v467_v44  ;;  %v4196_v18 = vpop.f32.mrf.mxu0 }
  0x9e   :  { %358 = vmatmul.f32.vlgmr.msra.gmra.mxu0 %v297_v4  ;;  %v298_v5 = vand.u32 4294901760, %v297_v4 }
  0x9f   :  { %593 = vmatpush.msra.mxu0 %v503_v46  ;;  %v657_v46 = vpop.permute.xlu1 %656 }
  0xa0   :  { %383 = vmatmul.f32.vlgmr.msra.gmra.mxu1 %v298_v5  ;;  %v299_v8 = vsub.f32 %v297_v4, %v298_v5  ;;  %v4198_v19 = vpop.f32.mrf.mxu1  ;;  %v4204_v22 = vpop.f32.mrf.mxu3 }
  0xa1   :  { %619 = vmatpush.msra.mxu1 %v467_v44  ;;  %5550 = vst [vmem:[#allocation18_spill] sm:$0xff] %v4204_v22  ;;  %v4208_v24 = vpop.f32.mrf.mxu2  ;;  %v677_v44 = vpop.permute.xlu2 %676  ;;  %v1734_v22 = vld [vmem:[#allocation8 + $0xf0] sm:$0xff] }
  0xa2   :  { %v300_v10 = vand.u32 4294901760, %v299_v8  ;;  %5552 = vst [vmem:[#allocation20_spill] sm:$0xff] %v4208_v24 }
  0xa4   :  { %301 = vmatmul.f32.vlgmr.msrb.gmra.mxu2 %v300_v10  ;;  %433 = vmatmul.f32.vlgmr.msra.gmra.mxu3 %v296_v1 }
  0xa5   :  { %533 = vmatpush.msrb.mxu2 %v502_v45  ;;  %v4200_v20 = vpop.f32.mrf.mxu0 }
  0xa6   :  { %474 = vmatmul.f32.vlgmr.msrb.gmra.mxu0 %v473_v11  ;;  %5548 = vst [vmem:[#allocation16_spill] sm:$0xff] %v4200_v20 }
  0xa8   :  { %508 = vmatmul.f32.vlgmr.msrb.gmra.mxu1 %v4155_v54  ;;  %v4202_v21 = vpop.f32.mrf.mxu1 }
  0xa9   :  { %5549 = vst [vmem:[#allocation17_spill] sm:$0xff] %v4202_v21  ;;  %v697_v63 = vpop.permute.xlu2 %696 }
  0xac   :  { %410 = vmatmul.f32.vlgmr.msra.gmra.mxu2 %v296_v1  ;;  %565 = vmatmul.f32.vlgmr.msrb.gmra.mxu3 %v471_v2 }
  0xae   :  { %482 = vmatmul.f32.gmra.mxu0 %v481_v16 }
  0xb0   :  { %512 = vmatmul.f32.gmra.mxu1 %v477_v3 }
  0xb1   :  { %v661_v10 = vpop.permute.xlu2 %660 }
  0xb4   :  { %536 = vmatmul.f32.vlgmr.msrb.gmra.mxu2 %v470_v61  ;;  %571 = vmatmul.f32.gmra.mxu3 %v479_v12  ;;  %v707_v12 = vpop.permute.xlu0 %706 }
  0xb6   :  { %595 = vmatmul.f32.vlgmr.msra.gmra.mxu0 %v4155_v54 }
  0xb8   :  { %621 = vmatmul.f32.vlgmr.msra.gmra.mxu1 %v4155_v54 }
  0xbc   :  { %541 = vmatmul.f32.gmra.mxu2 %v478_v7 }
  0xbe   :  { %599 = vmatmul.f32.gmra.mxu0 %v477_v3 }
  0xc0   :  { %625 = vmatmul.f32.gmra.mxu1 %v477_v3  ;;  %v687_v3 = vpop.permute.xlu1 %686 }
  0xc8   :  { %v651_v11 = vpop.permute.xlu1 %650 }
 0x11b   :  { %v4206_v23 = vpop.f32.mrf.mxu0 }
 0x11c   :  { %5551 = vst [vmem:[#allocation19_spill] sm:$0xff] %v4206_v23 }
 0x11d   :  { %v4210_v25 = vpop.f32.mrf.mxu1 }
 0x11e   :  { %5553 = vst [vmem:[#allocation21_spill] sm:$0xff] %v4210_v25 }
 0x11f   :  { %v4212_v26 = vpop.f32.mrf.mxu3 }
 0x123   :  { %v475_v27 = vpop.f32.mrf.mxu0 }
 0x125   :  { %v509_v29 = vpop.f32.mrf.mxu1 }
 0x126   :  { %v510_v37 = vadd.f32 %v509_v29, %v475_v27 }
 0x127   :  { %v4214_v28 = vpop.f32.mrf.mxu2  ;;  %v4216_v30 = vpop.f32.mrf.mxu3 }
 0x128   :  { %5554 = vst [vmem:[#allocation22_spill] sm:$0xff] %v4216_v30 }
 0x12b   :  { %v483_v31 = vpop.f32.mrf.mxu0 }
 0x12d   :  { %v513_v35 = vpop.f32.mrf.mxu1 }
 0x12e   :  { %v514_v49 = vadd.f32 %v513_v35, %v483_v31  ;;  %v681_v31 = vpop.permute.xlu2 %680 }
 0x12f   :  { %v4218_v32 = vpop.f32.mrf.mxu2  ;;  %v566_v36 = vpop.f32.mrf.mxu3 }
 0x130   :  { %5555 = vst [vmem:[#allocation23_spill] sm:$0xff] %v4218_v32 }
 0x133   :  { %v596_v39 = vpop.f32.mrf.mxu0 }
 0x135   :  { %v622_v45 = vpop.f32.mrf.mxu1 }
 0x137   :  { %v537_v38 = vpop.f32.mrf.mxu2  ;;  %v572_v54 = vpop.f32.mrf.mxu3 }
 0x138   :  { %v538_v41 = vadd.f32 %v537_v38, %v510_v37  ;;  %v711_v38 = vpop.permute.xlu2 %710 }
 0x13a   :  { %v567_v42 = vadd.f32 %v566_v36, %v538_v41 }
 0x13b   :  { %v600_v58 = vpop.f32.mrf.mxu0 }
 0x13c   :  { %v597_v47 = vadd.f32 %v596_v39, %v567_v42 }
 0x13d   :  { %v626_v0 = vpop.f32.mrf.mxu1 }
 0x13e   :  { %v4220_v50 = vadd.f32 %v622_v45, %v597_v47 }
 0x13f   :  { %v542_v53 = vpop.f32.mrf.mxu2 }
 0x140   :  { %v631_v55 = vadd.f32 %v3933_v48, %v4220_v50  ;;  %v543_v56 = vadd.f32 %v542_v53, %v514_v49  ;;  %v805_v49 = vld [vmem:[#allocation8 + $0xa0] sm:$0xff] }
 0x142   :  { %v4223_v59 = vmax.f32 %v631_v55, 0.0  ;;  %v573_v60 = vadd.f32 %v572_v54, %v543_v56  ;;  %v4271_v55 = vand.u32 4294901760, %v805_v49  ;;  %v804_v56 = vld [vmem:[#allocation8 + $0x98] sm:$0xff] }
 0x144   :  { %v601_v61 = vadd.f32 %v600_v58, %v573_v60  ;;  %v673_v62 = vmul.f32 %v667_v33, %v4223_v59  ;;  %v663_v1 = vmul.f32 %v657_v46, %v4223_v59  ;;  %v653_v2 = vmul.f32 %v647_v34, %v4223_v59  ;;  %v671_v33 = vpop.permute.xlu1 %670  ;;  %v691_v34 = vpop.permute.xlu0 %690  ;;  %v806_v46 = vld [vmem:[#allocation8 + $0xa8] sm:$0xff] }
 0x145   :  { %v703_v6 = vmul.f32 %v697_v63, %v4223_v59  ;;  %v693_v7 = vmul.f32 %v687_v3, %v4223_v59  ;;  %v683_v8 = vmul.f32 %v677_v44, %v4223_v59  ;;  %v713_v27 = vmul.f32 %v707_v12, %v4223_v59  ;;  %v807_v44 = vld [vmem:[#allocation8 + $0xb0] sm:$0xff] }
 0x146   :  { %733 = vrot.lane.b32.xlu1 %v673_v62, %s4093_s2  ;;  %725 = vrot.lane.b32.xlu0 %v663_v1, %s4094_s3  ;;  %v4231_v4 = vadd.f32 %v626_v0, %v601_v61  ;;  %v4258_v45 = vand.u32 4294901760, %v807_v44  ;;  %v4281_v61 = vsub.f32 %v805_v49, %v4271_v55  ;;  %v4283_v62 = vand.u32 4294901760, %v804_v56  ;;  %v803_v63 = vld [vmem:[#allocation8 + $0x90] sm:$0xff] }
 0x147   :  { %717 = vrot.lane.b32.xlu2 %v653_v2, %s4095_s9 }
 0x148   :  { %v632_v5 = vadd.f32 %v3933_v48, %v4231_v4  ;;  %v4261_v47 = vsub.f32 %v807_v44, %v4258_v45  ;;  %v4263_v48 = vand.u32 4294901760, %v806_v46  ;;  %817 = vmatpush.msra.mxu2 %v4258_v45  ;;  %1030 = vmatpush.msrb.mxu1 %v4258_v45  ;;  %v879_v2 = vand.u32 4294901760, %v4281_v61 }
 0x149   :  { %v4293_v3 = vsub.f32 %v804_v56, %v4283_v62 }
 0x14a   :  { %v4240_v14 = vmax.f32 %v632_v5, 0.0  ;;  %v867_v53 = vand.u32 4294901760, %v4261_v47  ;;  %v4269_v54 = vsub.f32 %v806_v46, %v4263_v48  ;;  %972 = vmatpush.msrb.mxu0 %v4261_v47  ;;  %819 = vmatpush.msra.mxu2 %v4263_v48  ;;  %v4297_v5 = vand.u32 4294901760, %v803_v63 }
 0x14b   :  { %1032 = vmatpush.msrb.mxu1 %v4263_v48 }
 0x14c   :  { %v654_v16 = vmul.f32 %v651_v11, %v4240_v14  ;;  %v664_v29 = vmul.f32 %v661_v10, %v4240_v14  ;;  %v684_v35 = vmul.f32 %v681_v31, %v4240_v14  ;;  %v694_v36 = vmul.f32 %v691_v34, %v4240_v14  ;;  %v701_v39 = vpop.permute.xlu1 %700  ;;  %975 = vmatpush.msrb.mxu0 %v4269_v54 }
 0x14d   :  { %v674_v37 = vmul.f32 %v671_v33, %v4240_v14  ;;  %v714_v41 = vmul.f32 %v711_v38, %v4240_v14  ;;  %v704_v42 = vmul.f32 %v701_v39, %v4240_v14  ;;  %v868_v58 = vsub.f32 %v4261_v47, %v867_v53  ;;  %821 = vmatpush.msra.mxu2 %v4271_v55 }
 0x14e   :  { %757 = vrot.lane.b32.xlu1 %v703_v6, %s4096_s10  ;;  %749 = vrot.lane.b32.xlu0 %v693_v7, %s4097_s11  ;;  %v873_v60 = vand.u32 4294901760, %v4269_v54  ;;  %v802_v6 = vld [vmem:[#allocation8 + $0x88] sm:$0xff]  ;;  %v885_v10 = vand.u32 4294901760, %v4293_v3  ;;  %v4308_v12 = vsub.f32 %v803_v63, %v4297_v5 }
 0x14f   :  { %741 = vrot.lane.b32.xlu2 %v683_v8, %s4098_s12  ;;  %1034 = vmatpush.msrb.mxu1 %v4271_v55  ;;  %v869_v0 = vand.u32 4294901760, %v868_v58  ;;  %v880_v8 = vsub.f32 %v4281_v61, %v879_v2  ;;  %v4304_v11 = vand.u32 4294901760, %v802_v6  ;;  %v798_v63 = vld [vmem:[#allocation8 + $0x68] sm:$0xff] }
 0x150   :  { %v874_v1 = vsub.f32 %v4269_v54, %v873_v60  ;;  %978 = vmatpush.msrb.mxu0 %v4281_v61  ;;  %823 = vmatpush.msra.mxu2 %v4283_v62  ;;  %v891_v34 = vand.u32 4294901760, %v4308_v12 }
 0x151   :  { %1036 = vmatpush.msrb.mxu1 %v4283_v62  ;;  %870 = vmatpush.msra.mxu3 %v869_v0  ;;  %v4316_v31 = vsub.f32 %v802_v6, %v4304_v11 }
 0x152   :  { %v875_v7 = vand.u32 4294901760, %v874_v1  ;;  %981 = vmatpush.msrb.mxu0 %v4293_v3  ;;  %825 = vmatpush.msra.mxu2 %v4297_v5 }
 0x153   :  { %1038 = vmatpush.msrb.mxu1 %v4297_v5 }
 0x154   :  { %876 = vmatpush.msra.mxu3 %v875_v7  ;;  %984 = vmatpush.msrb.mxu0 %v4308_v12 }
 0x155   :  { %827 = vmatpush.msra.mxu2 %v4304_v11  ;;  %1040 = vmatpush.msrb.mxu1 %v4304_v11 }
 0x156   :  { %719 = vrot.lane.b32.xlu1 %v654_v16, %s4095_s9  ;;  %765 = vrot.lane.b32.xlu0 %v713_v27, %s4099_s13  ;;  %v801_v16 = vld [vmem:[#allocation8 + $0x80] sm:$0xff]  ;;  %v881_v27 = vand.u32 4294901760, %v880_v8  ;;  %v4355_v8 = vand.u32 4294901760, %v798_v63 }
 0x157   :  { %727 = vrot.lane.b32.xlu2 %v664_v29, %s4094_s3  ;;  %v886_v29 = vsub.f32 %v4293_v3, %v885_v10  ;;  %v4318_v33 = vand.u32 4294901760, %v801_v16  ;;  %987 = vmatpush.msrb.mxu0 %v4316_v31 }
 0x158   :  { %882 = vmatpush.msra.mxu3 %v881_v27 }
 0x159   :  { %v4325_v38 = vsub.f32 %v801_v16, %v4318_v33  ;;  %829 = vmatpush.msra.mxu2 %v4318_v33  ;;  %1042 = vmatpush.msrb.mxu1 %v4318_v33  ;;  %v797_v16 = vld [vmem:[#allocation8 + $0x60] sm:$0xff] }
 0x15b   :  { %v5513_v46 = vand.u32 4294901760, %v4325_v38  ;;  %990 = vmatpush.msrb.mxu0 %v4325_v38  ;;  %v5556_v47 = vand.u32 4294901760, %v4325_v38 }
 0x15d   :  { %v904_v1 = vsub.f32 %v4325_v38, %v5513_v46  ;;  %v1192_v38 = vld [vmem:[#allocation8 + $0xb8] sm:$0xff] }
 0x15e   :  { %743 = vrot.lane.b32.xlu1 %v684_v35, %s4098_s12  ;;  %735 = vrot.lane.b32.xlu0 %v674_v37, %s4093_s2  ;;  %v800_v35 = vld [vmem:[#allocation8 + $0x78] sm:$0xff]  ;;  %v897_v37 = vand.u32 4294901760, %v4316_v31 }
 0x15f   :  { %751 = vrot.lane.b32.xlu2 %v694_v36, %s4097_s11  ;;  %v887_v36 = vand.u32 4294901760, %v886_v29  ;;  %v4327_v39 = vand.u32 4294901760, %v800_v35  ;;  %v905_v27 = vand.u32 4294901760, %v904_v1 }
 0x160   :  { %v898_v44 = vsub.f32 %v4316_v31, %v897_v37 }
 0x161   :  { %888 = vmatpush.msra.mxu3 %v887_v36  ;;  %v4340_v49 = vsub.f32 %v800_v35, %v4327_v39  ;;  %831 = vmatpush.msra.mxu2 %v4327_v39  ;;  %v4362_v36 = vand.u32 4294901760, %v797_v16 }
 0x162   :  { %v899_v0 = vand.u32 4294901760, %v898_v44  ;;  %1044 = vmatpush.msrb.mxu1 %v4327_v39 }
 0x163   :  { %v5511_v6 = vand.u32 4294901760, %v4340_v49  ;;  %993 = vmatpush.msrb.mxu0 %v4340_v49  ;;  %v4374_v1 = vsub.f32 %v797_v16, %v4362_v36 }
 0x165   :  { %v910_v29 = vsub.f32 %v4340_v49, %v5511_v6  ;;  %v5507_v43 = vand.u32 4294901760, %v4374_v1 }
 0x166   :  { %767 = vrot.lane.b32.xlu1 %v714_v41, %s4099_s13  ;;  %759 = vrot.lane.b32.xlu0 %v704_v42, %s4096_s10  ;;  %v892_v41 = vsub.f32 %v4308_v12, %v891_v34  ;;  %v799_v42 = vld [vmem:[#allocation8 + $0x70] sm:$0xff] }
 0x167   :  { %v4342_v56 = vand.u32 4294901760, %v799_v42  ;;  %v911_v44 = vand.u32 4294901760, %v910_v29 }
 0x168   :  { %v893_v58 = vand.u32 4294901760, %v892_v41  ;;  %v4367_v41 = vsub.f32 %v798_v63, %v4355_v8 }
 0x169   :  { %v4352_v7 = vsub.f32 %v799_v42, %v4342_v56  ;;  %833 = vmatpush.msra.mxu2 %v4342_v56  ;;  %1046 = vmatpush.msrb.mxu1 %v4342_v56  ;;  %v796_v42 = vld [vmem:[#allocation8 + $0x58] sm:$0xff] }
 0x16a   :  { %894 = vmatpush.msra.mxu3 %v893_v58  ;;  %v4376_v17 = vand.u32 4294901760, %v796_v42  ;;  %v5508_v63 = vand.u32 4294901760, %v4367_v41 }
 0x16b   :  { %v5509_v35 = vand.u32 4294901760, %v4352_v7  ;;  %996 = vmatpush.msrb.mxu0 %v4352_v7  ;;  %835 = vmatpush.msra.mxu2 %v4355_v8  ;;  %v5558_v54 = vand.u32 4294901760, %v4352_v7 }
 0x16c   :  { %900 = vmatpush.msra.mxu3 %v899_v0  ;;  %1048 = vmatpush.msrb.mxu1 %v4355_v8  ;;  %v795_v0 = vld [vmem:[#allocation8 + $0x50] sm:$0xff]  ;;  %v4384_v57 = vsub.f32 %v796_v42, %v4376_v17 }
 0x16d   :  { %v916_v58 = vsub.f32 %v4352_v7, %v5509_v35  ;;  %999 = vmatpush.msrb.mxu0 %v4367_v41  ;;  %v4386_v16 = vand.u32 4294901760, %v795_v0  ;;  %837 = vmatpush.msra.mxu2 %v4362_v36 }
 0x16e   :  { %906 = vmatpush.msra.mxu3 %v905_v27  ;;  %1050 = vmatpush.msrb.mxu1 %v4362_v36  ;;  %v922_v27 = vsub.f32 %v4367_v41, %v5508_v63  ;;  %v5510_v42 = vand.u32 4294901760, %v4384_v57  ;;  %v4409_v63 = vand.u32 4294901760, %v793_v9 }
 0x16f   :  { %v917_v29 = vand.u32 4294901760, %v916_v58  ;;  %1002 = vmatpush.msrb.mxu0 %v4374_v1  ;;  %v928_v58 = vsub.f32 %v4374_v1, %v5507_v43  ;;  %839 = vmatpush.msra.mxu2 %v4376_v17 }
 0x170   :  { %912 = vmatpush.msra.mxu3 %v911_v44  ;;  %1052 = vmatpush.msrb.mxu1 %v4376_v17  ;;  %v923_v40 = vand.u32 4294901760, %v922_v27  ;;  %v4401_v44 = vsub.f32 %v795_v0, %v4386_v16  ;;  %v934_v43 = vsub.f32 %v4384_v57, %v5510_v42  ;;  %v792_v27 = vld [vmem:[#allocation8 + $0x38] sm:$0xff]  ;;  %v4419_v35 = vsub.f32 %v793_v9, %v4409_v63 }
 0x171   :  { %1005 = vmatpush.msrb.mxu0 %v4384_v57  ;;  %v929_v51 = vand.u32 4294901760, %v928_v58  ;;  %841 = vmatpush.msra.mxu2 %v4386_v16  ;;  %v4421_v42 = vand.u32 4294901760, %v792_v27 }
 0x172   :  { %918 = vmatpush.msra.mxu3 %v917_v29  ;;  %1054 = vmatpush.msrb.mxu1 %v4386_v16  ;;  %v5512_v0 = vand.u32 4294901760, %v4401_v44  ;;  %v4415_v29 = vsub.f32 %v794_v15, %v4403_v13  ;;  %v935_v58 = vand.u32 4294901760, %v934_v43  ;;  %v951_v43 = vand.u32 4294901760, %v4419_v35 }
 0x173   :  { %1008 = vmatpush.msrb.mxu0 %v4401_v44  ;;  %843 = vmatpush.msra.mxu2 %v4403_v13  ;;  %v4432_v9 = vsub.f32 %v792_v27, %v4421_v42  ;;  %v5562_v12 = vand.u32 4294901760, %v4401_v44 }
 0x174   :  { %924 = vmatpush.msra.mxu3 %v923_v40  ;;  %1056 = vmatpush.msrb.mxu1 %v4403_v13  ;;  %v940_v40 = vsub.f32 %v4401_v44, %v5512_v0  ;;  %v945_v15 = vand.u32 4294901760, %v4415_v29  ;;  %v952_v0 = vsub.f32 %v4419_v35, %v951_v43 }
 0x175   :  { %1011 = vmatpush.msrb.mxu0 %v4415_v29  ;;  %845 = vmatpush.msra.mxu2 %v4409_v63  ;;  %v957_v46 = vand.u32 4294901760, %v4432_v9 }
 0x176   :  { %930 = vmatpush.msra.mxu3 %v929_v51  ;;  %1058 = vmatpush.msrb.mxu1 %v4409_v63  ;;  %v941_v6 = vand.u32 4294901760, %v940_v40  ;;  %v946_v51 = vsub.f32 %v4415_v29, %v945_v15 }
 0x177   :  { %1014 = vmatpush.msrb.mxu0 %v4419_v35  ;;  %847 = vmatpush.msra.mxu2 %v4421_v42  ;;  %v958_v40 = vsub.f32 %v4432_v9, %v957_v46 }
 0x178   :  { %936 = vmatpush.msra.mxu3 %v935_v58  ;;  %1060 = vmatpush.msrb.mxu1 %v4421_v42  ;;  %v947_v27 = vand.u32 4294901760, %v946_v51  ;;  %v953_v58 = vand.u32 4294901760, %v952_v0 }
 0x179   :  { %1017 = vmatpush.msrb.mxu0 %v4432_v9  ;;  %1077 = vmatpush.msrb.mxu2 %v867_v53  ;;  %v959_v29 = vand.u32 4294901760, %v958_v40  ;;  %v637_v53 = vpop.permute.xlu1 %636 }
 0x17a   :  { %942 = vmatpush.msra.mxu3 %v941_v6  ;;  %v643_v31 = vmul.f32 %v637_v53, %v4223_v59 }
 0x17b   :  { %1081 = vmatpush.msrb.mxu2 %v873_v60  ;;  %v5559_v60 = vand.u32 4294901760, %v4367_v41 }
 0x17c   :  { %948 = vmatpush.msra.mxu3 %v947_v27 }
 0x17d   :  { %1085 = vmatpush.msrb.mxu2 %v879_v2 }
 0x17e   :  { %954 = vmatpush.msra.mxu3 %v953_v58 }
 0x17f   :  { %1089 = vmatpush.msrb.mxu2 %v885_v10  ;;  %v5561_v10 = vand.u32 4294901760, %v4384_v57 }
 0x180   :  { %960 = vmatpush.msra.mxu3 %v959_v29 }
 0x181   :  { %1093 = vmatpush.msrb.mxu2 %v891_v34 }
 0x182   :  { %1148 = vmatpush.msrb.mxu3 %v4258_v45  ;;  %v5557_v45 = vand.u32 4294901760, %v4340_v49 }
 0x183   :  { %1097 = vmatpush.msrb.mxu2 %v897_v37 }
 0x184   :  { %1150 = vmatpush.msrb.mxu3 %v4263_v48  ;;  %v641_v48 = vpop.permute.xlu2 %640 }
 0x185   :  { %1101 = vmatpush.msrb.mxu2 %v5556_v47 }
 0x186   :  { %1152 = vmatpush.msrb.mxu3 %v4271_v55  ;;  %v1193_v55 = vld [vmem:[#allocation8 + $0xc0] sm:$0xff] }
 0x187   :  { %1105 = vmatpush.msrb.mxu2 %v5557_v45  ;;  %v4473_v61 = vand.u32 4294901760, %v1193_v55  ;;  %v1197_v45 = vsel %vm771_vm9, %v4223_v59, 0 }
 0x188   :  { %1154 = vmatpush.msrb.mxu3 %v4283_v62  ;;  %v5560_v62 = vand.u32 4294901760, %v4374_v1 }
 0x189   :  { %1109 = vmatpush.msrb.mxu2 %v5558_v54  ;;  %1217 = vmatpush.msra.mxu0 %v4473_v61  ;;  %v4480_v3 = vsub.f32 %v1193_v55, %v4473_v61  ;;  %v4522_v54 = vand.u32 4294901760, %v1197_v45 }
 0x18a   :  { %1156 = vmatpush.msrb.mxu3 %v4297_v5 }
 0x18b   :  { %1113 = vmatpush.msrb.mxu2 %v5559_v60 }
 0x18c   :  { %1158 = vmatpush.msrb.mxu3 %v4304_v11 }
 0x18d   :  { %1117 = vmatpush.msrb.mxu2 %v5560_v62 }
 0x18e   :  { %1160 = vmatpush.msrb.mxu3 %v4318_v33  ;;  %v1253_v33 = vand.u32 4294901760, %v4480_v3 }
 0x18f   :  { %1121 = vmatpush.msrb.mxu2 %v5561_v10  ;;  %v4531_v10 = vsub.f32 %v1197_v45, %v4522_v54 }
 0x190   :  { %1162 = vmatpush.msrb.mxu3 %v4327_v39  ;;  %v1254_v57 = vsub.f32 %v4480_v3, %v1253_v33 }
 0x191   :  { %1125 = vmatpush.msrb.mxu2 %v5562_v12 }
 0x192   :  { %1164 = vmatpush.msrb.mxu3 %v4342_v56  ;;  %v1255_v49 = vand.u32 4294901760, %v1254_v57  ;;  %v1218_v56 = vand.u32 4294901760, %v1192_v38  ;;  %v1222_v57 = vand.u32 4294901760, %v4531_v10 }
 0x193   :  { %1129 = vmatpush.msrb.mxu2 %v945_v15 }
 0x194   :  { %1166 = vmatpush.msrb.mxu3 %v4355_v8  ;;  %1256 = vmatpush.msra.mxu1 %v1255_v49  ;;  %v1258_v8 = vsub.f32 %v1192_v38, %v1218_v56  ;;  %v1223_v49 = vsub.f32 %v4531_v10, %v1222_v57 }
 0x195   :  { %1133 = vmatpush.msrb.mxu2 %v951_v43  ;;  %1219 = vmatpush.msra.mxu0 %v1218_v56  ;;  %v644_v43 = vmul.f32 %v641_v48, %v4240_v14 }
 0x196   :  { %1168 = vmatpush.msrb.mxu3 %v4362_v36  ;;  %v1259_v36 = vand.u32 4294901760, %v1258_v8 }
 0x197   :  { %1137 = vmatpush.msrb.mxu2 %v957_v46 }
 0x198   :  { %1170 = vmatpush.msrb.mxu3 %v4376_v17  ;;  %v1260_v1 = vsub.f32 %v1258_v8, %v1259_v36 }
 0x19a   :  { %1172 = vmatpush.msrb.mxu3 %v4386_v16  ;;  %v1261_v16 = vand.u32 4294901760, %v1260_v1 }
 0x19c   :  { %1174 = vmatpush.msrb.mxu3 %v4403_v13  ;;  %1262 = vmatpush.msra.mxu1 %v1261_v16  ;;  %v5566_v16 = vmov 1  }
 0x19e   :  { %1176 = vmatpush.msrb.mxu3 %v4409_v63 }
 0x1a0   :  { %1178 = vmatpush.msrb.mxu3 %v4421_v42 }
 0x1a1   :  { %v718_v11 = vpop.permute.xlu2 %717 }
 0x1a2   :  { %v772_v34 = vsel %vm771_vm9, %v643_v31, %v718_v11  ;;  %v4533_v11 = vld [vmem:[#allocation5 + $0x10] sm:$0xff] }
 0x1a3   :  { %1613 = vperm.xlu1 %3899, %v4533_v11   ;;  %1593 = vperm.xlu2 %3897, %v4533_v11  }
 0x1a4   :  { %1603 = vperm.xlu0 %3898, %v4533_v11  }
 0x1a9   :  { %v742_v17 = vpop.permute.xlu2 %741 }
 0x1b1   :  { %v728_v9 = vpop.permute.xlu2 %727 }
 0x1b8   :  { %v734_v2 = vpop.permute.xlu1 %733  ;;  %v726_v5 = vpop.permute.xlu0 %725 }
 0x1b9   :  { %v775_v37 = vsel %vm774_vm8, %v772_v34, %v726_v5  ;;  %v752_v55 = vpop.permute.xlu2 %751 }
 0x1ba   :  { %v778_v7 = vsel %vm777_vm10, %v775_v37, %v734_v2 }
 0x1bb   :  { %v781_v35 = vsel %vm780_vm11, %v778_v7, %v742_v17  ;;  %v5563_v7 = vmov 5  }
 0x1bc   :  { %3901 = vset.pattern.permute.xlu1 %v5563_v7 }
 0x1bd   :  { %1633 = vperm.xlu1 %3901, %v4533_v11  }
 0x1c0   :  { %v758_v39 = vpop.permute.xlu1 %757  ;;  %v750_v6 = vpop.permute.xlu0 %749 }
 0x1c1   :  { %v784_v41 = vsel %vm783_vm12, %v781_v35, %v750_v6  ;;  %v1224_v35 = vand.u32 4294901760, %v1223_v49 }
 0x1c2   :  { %v787_v44 = vsel %vm786_vm13, %v784_v41, %v758_v39 }
 0x1c5   :  { %3904 = vset.pattern.permute.xlu1 %v5566_v16 }
 0x1c8   :  { %v720_v46 = vpop.permute.xlu1 %719  ;;  %v766_v0 = vpop.permute.xlu0 %765 }
 0x1c9   :  { %v790_v13 = vsel %vm789_vm14, %v787_v44, %v766_v0  ;;  %v773_v42 = vsel %vm771_vm9, %v644_v43, %v720_v46  ;;  %v441_v44 = vld [vmem:[#allocation5 + $0x18] sm:$0xff]  ;;  %v5567_v0 = vmov 6   ;;  %v1394_v43 = vsel %vm445_vm4, %v4533_v11, 0 }
 0x1ca   :  { %v4508_v15 = vand.u32 4294901760, %v790_v13  ;;  %v776_v29 = vsel %vm774_vm8, %v773_v42, %v728_v9  ;;  %1597 = vperm.xlu1 %3904, %v441_v44   ;;  %v5568_v9 = vmov 3   ;;  %v5569_v42 = vmov 2  }
 0x1cc   :  { %v849_v63 = vsub.f32 %v790_v13, %v4508_v15  ;;  %962 = vmatmul.f32.vlgmr.msra.gmra.mxu3 %v4508_v15 }
 0x1cd   :  { %1380 = vmatpush.msra.mxu3 %v4473_v61 }
 0x1ce   :  { %v850_v51 = vand.u32 4294901760, %v849_v63  ;;  %1020 = vmatmul.f32.vlgmr.msrb.gmra.mxu0 %v849_v63 }
 0x1cf   :  { %1288 = vmatpush.msrb.mxu0 %v4480_v3  ;;  %1382 = vmatpush.msra.mxu3 %v1218_v56  ;;  %v1200_v3 = vsel %vm771_vm9, %v4240_v14, 0 }
 0x1d0   :  { %v744_v27 = vpop.permute.xlu1 %743  ;;  %v851_v58 = vsub.f32 %v849_v63, %v850_v51  ;;  %1064 = vmatmul.f32.vlgmr.msrb.gmra.mxu1 %v850_v51  ;;  %v736_v40 = vpop.permute.xlu0 %735  ;;  %v4543_v37 = vand.u32 4294901760, %v1200_v3  ;;  %v1416_v63 = vand.u32 4294901760, %v1394_v43  ;;  %v1397_v51 = vsel %vm445_vm4, %v441_v44, 0 }
 0x1d1   :  { %1318 = vmatpush.msrb.mxu1 %v4473_v61  ;;  %1291 = vmatpush.msrb.mxu0 %v1258_v8  ;;  %v779_v47 = vsel %vm777_vm10, %v776_v29, %v736_v40  ;;  %v1392_v61 = vld [vmem:[#allocation8 + $0xd0] sm:$0xff]  ;;  %v5564_v8 = vmov 4  }
 0x1d2   :  { %v852_v53 = vand.u32 4294901760, %v851_v58  ;;  %v782_v48 = vsel %vm780_vm11, %v779_v47, %v744_v27  ;;  %v4527_v5 = vand.u32 4294901760, %v1392_v61  ;;  %3900 = vset.pattern.permute.xlu2 %v5564_v8  ;;  %3906 = vset.pattern.permute.xlu1 %v5568_v9  ;;  %v1424_v58 = vand.u32 4294901760, %v1397_v51 }
 0x1d3   :  { %1320 = vmatpush.msrb.mxu1 %v1218_v56  ;;  %v785_v62 = vsel %vm783_vm12, %v782_v48, %v752_v55  ;;  %v1229_v56 = vsub.f32 %v1200_v3, %v4543_v37  ;;  %1623 = vperm.xlu2 %3900, %v4533_v11   ;;  %v5570_v48 = vmov 0  }
 0x1d4   :  { %853 = vmatmul.f32.vlgmr.msra.gmra.mxu2 %v852_v53  ;;  %v1449_v31 = vsub.f32 %v1392_v61, %v4527_v5  ;;  %1617 = vperm.xlu1 %3906, %v441_v44   ;;  %v1425_v29 = vsub.f32 %v1397_v51, %v1424_v58 }
 0x1d5   :  { %1351 = vmatpush.msra.mxu2 %v1253_v33  ;;  %v1230_v41 = vand.u32 4294901760, %v1229_v56 }
 0x1d6   :  { %v1450_v38 = vand.u32 4294901760, %v1449_v31  ;;  %v1426_v53 = vand.u32 4294901760, %v1425_v29 }
 0x1d7   :  { %1355 = vmatpush.msra.mxu2 %v1259_v36  ;;  %v5565_v36 = vmov 7   ;;  %v1231_v46 = vsub.f32 %v1229_v56, %v1230_v41 }
 0x1d8   :  { %v768_v60 = vpop.permute.xlu1 %767  ;;  %v760_v2 = vpop.permute.xlu0 %759  ;;  %v1451_v6 = vsub.f32 %v1449_v31, %v1450_v38  ;;  %3903 = vset.pattern.permute.xlu0 %v5565_v36  ;;  %v1427_v45 = vsub.f32 %v1425_v29, %v1426_v53 }
 0x1d9   :  { %v788_v59 = vsel %vm786_vm13, %v785_v62, %v760_v2  ;;  %1653 = vperm.xlu0 %3903, %v4533_v11   ;;  %v1232_v13 = vand.u32 4294901760, %v1231_v46 }
 0x1da   :  { %v791_v12 = vsel %vm789_vm14, %v788_v59, %v768_v60  ;;  %v1452_v1 = vand.u32 4294901760, %v1451_v6 }
 0x1db   :  { %v856_v33 = vand.u32 4294901760, %v791_v12  ;;  %3902 = vset.pattern.permute.xlu2 %v5567_v0 }
 0x1dc   :  { %1643 = vperm.xlu2 %3902, %v4533_v11   ;;  %3909 = vset.pattern.permute.xlu1 %v5567_v0 }
 0x1dd   :  { %966 = vmatmul.f32.gmra.mxu3 %v856_v33  ;;  %v857_v34 = vsub.f32 %v791_v12, %v856_v33  ;;  %1647 = vperm.xlu1 %3909, %v441_v44  }
 0x1df   :  { %1025 = vmatmul.f32.gmra.mxu0 %v857_v34  ;;  %v858_v39 = vand.u32 4294901760, %v857_v34 }
 0x1e1   :  { %1070 = vmatmul.f32.gmra.mxu1 %v858_v39  ;;  %v859_v14 = vsub.f32 %v857_v34, %v858_v39  ;;  %3908 = vset.pattern.permute.xlu0 %v5563_v7 }
 0x1e2   :  { %1637 = vperm.xlu0 %3908, %v441_v44  }
 0x1e3   :  { %v860_v17 = vand.u32 4294901760, %v859_v14 }
 0x1e4   :  { %3905 = vset.pattern.permute.xlu2 %v5569_v42 }
 0x1e5   :  { %861 = vmatmul.f32.gmra.mxu2 %v860_v17  ;;  %1180 = vmatmul.f32.vlgmr.msrb.gmra.mxu3 %v4508_v15 }
 0x1e6   :  { %1508 = vmatpush.msrb.mxu3 %v4527_v5  ;;  %1607 = vperm.xlu2 %3905, %v441_v44  }
 0x1e7   :  { %1225 = vmatmul.f32.vlgmr.msra.gmra.mxu0 %v1224_v35  ;;  %3911 = vset.pattern.permute.xlu1 %v5570_v48 }
 0x1e8   :  { %1415 = vmatpush.msra.mxu0 %v4527_v5  ;;  %1583 = vperm.xlu1 %3911, %v4533_v11  }
 0x1e9   :  { %1264 = vmatmul.f32.vlgmr.msra.gmra.mxu1 %v4522_v54 }
 0x1ea   :  { %1453 = vmatpush.msra.mxu1 %v1452_v1  ;;  %3914 = vset.pattern.permute.xlu0 %v5569_v42 }
 0x1ed   :  { %1139 = vmatmul.f32.vlgmr.msrb.gmra.mxu2 %v4508_v15  ;;  %1184 = vmatmul.f32.gmra.mxu3 %v856_v33  ;;  %v1417_v15 = vsub.f32 %v1394_v43, %v1416_v63 }
 0x1ee   :  { %1480 = vmatpush.msrb.mxu2 %v1449_v31  ;;  %3907 = vset.pattern.permute.xlu2 %v5564_v8  ;;  %v3934_v31 = vld [vmem:[#allocation8 + $0xc8] ss:$0 sm:$0xff] }
 0x1ef   :  { %1233 = vmatmul.f32.gmra.mxu0 %v1232_v13  ;;  %v1418_v27 = vand.u32 4294901760, %v1417_v15  ;;  %1627 = vperm.xlu2 %3907, %v441_v44  }
 0x1f0   :  { %3915 = vset.pattern.permute.xlu1 %v5568_v9 }
 0x1f1   :  { %1268 = vmatmul.f32.gmra.mxu1 %v4543_v37  ;;  %v1419_v40 = vsub.f32 %v1417_v15, %v1418_v27 }
 0x1f3   :  { %v1420_v47 = vand.u32 4294901760, %v1419_v40 }
 0x1f5   :  { %1143 = vmatmul.f32.gmra.mxu2 %v856_v33  ;;  %1384 = vmatmul.f32.vlgmr.msra.gmra.mxu3 %v4522_v54 }
 0x1f7   :  { %1294 = vmatmul.f32.vlgmr.msrb.gmra.mxu0 %v4531_v10  ;;  %3910 = vset.pattern.permute.xlu2 %v5565_v36 }
 0x1f8   :  { %1540 = vmatpush.msrb.mxu0 %v1450_v38  ;;  %1657 = vperm.xlu2 %3910, %v441_v44  }
 0x1f9   :  { %1324 = vmatmul.f32.vlgmr.msrb.gmra.mxu1 %v1222_v57 }
 0x1fa   :  { %1566 = vmatpush.msrb.mxu1 %v4527_v5 }
 0x1fd   :  { %1357 = vmatmul.f32.vlgmr.msra.gmra.mxu2 %v4522_v54  ;;  %1388 = vmatmul.f32.gmra.mxu3 %v4543_v37  ;;  %v1428_v54 = vand.u32 4294901760, %v1427_v45 }
 0x1ff   :  { %1299 = vmatmul.f32.gmra.mxu0 %v1229_v56 }
 0x200   :  { %3912 = vset.pattern.permute.xlu2 %v5570_v48 }
 0x201   :  { %1330 = vmatmul.f32.gmra.mxu1 %v1230_v41  ;;  %1587 = vperm.xlu2 %3912, %v441_v44  }
 0x205   :  { %1361 = vmatmul.f32.gmra.mxu2 %v4543_v37  ;;  %1512 = vmatmul.f32.vlgmr.msrb.gmra.mxu3 %v1418_v27 }
 0x207   :  { %1421 = vmatmul.f32.vlgmr.msra.gmra.mxu0 %v1420_v47 }
 0x209   :  { %1455 = vmatmul.f32.vlgmr.msra.gmra.mxu1 %v1416_v63  ;;  %3913 = vset.pattern.permute.xlu2 %v5566_v16 }
 0x20d   :  { %1483 = vmatmul.f32.vlgmr.msrb.gmra.mxu2 %v1417_v15  ;;  %1518 = vmatmul.f32.gmra.mxu3 %v1426_v53  ;;  %v1594_v53 = vpop.permute.xlu2 %1593 }
 0x20f   :  { %1429 = vmatmul.f32.gmra.mxu0 %v1428_v54 }
 0x211   :  { %1459 = vmatmul.f32.gmra.mxu1 %v1424_v58 }
 0x215   :  { %1488 = vmatmul.f32.gmra.mxu2 %v1425_v29 }
 0x217   :  { %1542 = vmatmul.f32.vlgmr.msrb.gmra.mxu0 %v1416_v63 }
 0x219   :  { %1568 = vmatmul.f32.vlgmr.msrb.gmra.mxu1 %v1416_v63 }
 0x21f   :  { %1546 = vmatmul.f32.gmra.mxu0 %v1424_v58 }
 0x221   :  { %1572 = vmatmul.f32.gmra.mxu1 %v1424_v58 }
 0x24b   :  { %v4583_v55 = vpop.f32.mrf.mxu0 }
 0x24c   :  { %5571 = vst [vmem:[#allocation24_spill] sm:$0xff] %v4583_v55 }
 0x24d   :  { %v4585_v60 = vpop.f32.mrf.mxu1 }
 0x24e   :  { %5572 = vst [vmem:[#allocation25_spill] sm:$0xff] %v4585_v60 }
 0x24f   :  { %v4587_v61 = vpop.f32.mrf.mxu3 }
 0x257   :  { %v4593_v5 = vpop.f32.mrf.mxu2 }
 0x25c   :  { %v4589_v62 = vpop.f32.mrf.mxu0 }
 0x25d   :  { %5573 = vst [vmem:[#allocation26_spill] sm:$0xff] %v4589_v62 }
 0x25e   :  { %v4591_v2 = vpop.f32.mrf.mxu1 }
 0x25f   :  { %5574 = vst [vmem:[#allocation27_spill] sm:$0xff] %v4591_v2 }
 0x260   :  { %v4595_v59 = vpop.f32.mrf.mxu3 }
 0x261   :  { %5575 = vst [vmem:[#allocation28_spill] sm:$0xff] %v4595_v59 }
 0x264   :  { %v1226_v10 = vpop.f32.mrf.mxu0 }
 0x265   :  { %v1227_v57 = vadd.f32 %v3934_v31, %v1226_v10 }
 0x266   :  { %v1265_v11 = vpop.f32.mrf.mxu1 }
 0x267   :  { %v1266_v39 = vadd.f32 %v1265_v11, %v1227_v57 }
 0x268   :  { %v4597_v12 = vpop.f32.mrf.mxu2  ;;  %v4599_v3 = vpop.f32.mrf.mxu3 }
 0x269   :  { %5576 = vst [vmem:[#allocation29_spill] sm:$0xff] %v4599_v3 }
 0x26c   :  { %v1234_v33 = vpop.f32.mrf.mxu0 }
 0x26d   :  { %v1235_v6 = vadd.f32 %v3934_v31, %v1234_v33 }
 0x26e   :  { %v1269_v34 = vpop.f32.mrf.mxu1 }
 0x26f   :  { %v1270_v41 = vadd.f32 %v1269_v34, %v1235_v6  ;;  %v3935_v6 = vld [vmem:[#allocation8 + $0xd8] ss:$0 sm:$0xff] }
 0x270   :  { %v4601_v37 = vpop.f32.mrf.mxu2  ;;  %v4603_v38 = vpop.f32.mrf.mxu3 }
 0x271   :  { %5577 = vst [vmem:[#allocation30_spill] sm:$0xff] %v4601_v37 }
 0x272   :  { %5578 = vst [vmem:[#allocation31_spill] sm:$0xff] %v4603_v38 }
 0x274   :  { %v1295_v14 = vpop.f32.mrf.mxu0 }
 0x275   :  { %v1296_v49 = vadd.f32 %v1295_v14, %v1266_v39  ;;  %v1624_v39 = vpop.permute.xlu2 %1623 }
 0x276   :  { %v1325_v56 = vpop.f32.mrf.mxu1 }
 0x277   :  { %v1326_v17 = vadd.f32 %v1325_v56, %v1296_v49  ;;  %v1614_v49 = vpop.permute.xlu1 %1613 }
 0x278   :  { %v4605_v35 = vpop.f32.mrf.mxu2  ;;  %v1385_v1 = vpop.f32.mrf.mxu3 }
 0x279   :  { %5579 = vst [vmem:[#allocation32_spill] sm:$0xff] %v4605_v35  ;;  %v4792_v35 = vand.u32 4294901760, %v1734_v22 }
 0x27c   :  { %v1300_v46 = vpop.f32.mrf.mxu0 }
 0x27d   :  { %v1301_v44 = vadd.f32 %v1300_v46, %v1270_v41 }
 0x27e   :  { %v1331_v13 = vpop.f32.mrf.mxu1 }
 0x27f   :  { %v1332_v43 = vadd.f32 %v1331_v13, %v1301_v44 }
 0x280   :  { %v1358_v63 = vpop.f32.mrf.mxu2  ;;  %v1389_v58 = vpop.f32.mrf.mxu3 }
 0x281   :  { %v1359_v15 = vadd.f32 %v1358_v63, %v1326_v17 }
 0x283   :  { %v4607_v51 = vadd.f32 %v1385_v1, %v1359_v15 }
 0x284   :  { %v1422_v27 = vpop.f32.mrf.mxu0 }
 0x285   :  { %5580 = vst [vmem:[#allocation33_spill] sm:$0xff] %v4607_v51  ;;  %v1738_v51 = vld [vmem:[#allocation8 + $0x110] sm:$0xff] }
 0x286   :  { %v1456_v40 = vpop.f32.mrf.mxu1  ;;  %v4746_v30 = vand.u32 4294901760, %v1738_v51 }
 0x287   :  { %v1457_v31 = vadd.f32 %v1456_v40, %v1422_v27 }
 0x288   :  { %v1362_v29 = vpop.f32.mrf.mxu2  ;;  %v1513_v11 = vpop.f32.mrf.mxu3 }
 0x289   :  { %v1363_v47 = vadd.f32 %v1362_v29, %v1332_v43 }
 0x28b   :  { %v4609_v45 = vadd.f32 %v1389_v58, %v1363_v47  ;;  %v1604_v58 = vpop.permute.xlu0 %1603  ;;  %v1644_v47 = vpop.permute.xlu2 %1643 }
 0x28c   :  { %v1430_v54 = vpop.f32.mrf.mxu0 }
 0x28d   :  { %5581 = vst [vmem:[#allocation34_spill] sm:$0xff] %v4609_v45  ;;  %v4733_v45 = vand.u32 4294901760, %v1739_v52 }
 0x28e   :  { %v1460_v10 = vpop.f32.mrf.mxu1 }
 0x28f   :  { %v1461_v41 = vadd.f32 %v1460_v10, %v1430_v54  ;;  %v1634_v10 = vpop.permute.xlu1 %1633 }
 0x290   :  { %v1484_v33 = vpop.f32.mrf.mxu2  ;;  %v1519_v44 = vpop.f32.mrf.mxu3 }
 0x291   :  { %v1485_v34 = vadd.f32 %v1484_v33, %v1457_v31 }
 0x293   :  { %v1514_v57 = vadd.f32 %v1513_v11, %v1485_v34 }
 0x294   :  { %v1543_v14 = vpop.f32.mrf.mxu0 }
 0x295   :  { %v1544_v56 = vadd.f32 %v1543_v14, %v1514_v57 }
 0x296   :  { %v1569_v17 = vpop.f32.mrf.mxu1 }
 0x297   :  { %v4611_v1 = vadd.f32 %v1569_v17, %v1544_v56  ;;  %v1598_v56 = vpop.permute.xlu1 %1597  ;;  %v1654_v17 = vpop.permute.xlu0 %1653 }
 0x298   :  { %v1489_v46 = vpop.f32.mrf.mxu2 }
 0x299   :  { %v1578_v13 = vadd.f32 %v3935_v6, %v4611_v1  ;;  %v1490_v43 = vadd.f32 %v1489_v46, %v1461_v41 }
 0x29b   :  { %v4614_v63 = vmax.f32 %v1578_v13, 0.0  ;;  %v1520_v15 = vadd.f32 %v1519_v44, %v1490_v43 }
 0x29c   :  { %v1547_v27 = vpop.f32.mrf.mxu0 }
 0x29d   :  { %v1548_v40 = vadd.f32 %v1547_v27, %v1520_v15  ;;  %v1620_v29 = vmul.f32 %v1614_v49, %v4614_v63  ;;  %v1600_v31 = vmul.f32 %v1594_v53, %v4614_v63  ;;  %v1610_v54 = vmul.f32 %v1604_v58, %v4614_v63  ;;  %v1608_v53 = vpop.permute.xlu2 %1607 }
 0x29e   :  { %v1573_v11 = vpop.f32.mrf.mxu1  ;;  %v1650_v57 = vmul.f32 %v1644_v47, %v4614_v63  ;;  %v1630_v14 = vmul.f32 %v1624_v39, %v4614_v63  ;;  %v1640_v49 = vmul.f32 %v1634_v10, %v4614_v63  ;;  %v1746_v10 = vld [vmem:[#allocation8 + $0x150] sm:$0xff] }
 0x29f   :  { %1680 = vrot.lane.b32.xlu1 %v1620_v29, %s4093_s2  ;;  %1664 = vrot.lane.b32.xlu2 %v1600_v31, %s4095_s9  ;;  %v4622_v33 = vadd.f32 %v1573_v11, %v1548_v40  ;;  %v1618_v13 = vpop.permute.xlu1 %1617  ;;  %v1638_v43 = vpop.permute.xlu0 %1637  ;;  %v1747_v31 = vld [vmem:[#allocation8 + $0x158] sm:$0xff] }
 0x2a0   :  { %1672 = vrot.lane.b32.xlu0 %v1610_v54, %s4094_s3  ;;  %v4649_v54 = vand.u32 4294901760, %v1747_v31 }
 0x2a1   :  { %v1579_v34 = vadd.f32 %v3935_v6, %v4622_v33  ;;  %v1660_v6 = vmul.f32 %v1654_v17, %v4614_v63  ;;  %v1744_v17 = vld [vmem:[#allocation8 + $0x140] sm:$0xff] }
 0x2a2   :  { %1757 = vmatpush.msra.mxu2 %v4649_v54  ;;  %1970 = vmatpush.msra.mxu1 %v4649_v54 }
 0x2a3   :  { %v4631_v41 = vmax.f32 %v1579_v34, 0.0  ;;  %v4652_v34 = vsub.f32 %v1747_v31, %v4649_v54 }
 0x2a5   :  { %v1601_v46 = vmul.f32 %v1598_v56, %v4631_v41  ;;  %v1611_v44 = vmul.f32 %v1608_v53, %v4631_v41  ;;  %v1628_v39 = vpop.permute.xlu2 %1627  ;;  %v1641_v27 = vmul.f32 %v1638_v43, %v4631_v41  ;;  %v1621_v58 = vmul.f32 %v1618_v13, %v4631_v41  ;;  %1912 = vmatpush.msra.mxu0 %v4652_v34  ;;  %v1743_v13 = vld [vmem:[#allocation8 + $0x138] sm:$0xff] }
 0x2a6   :  { %v1631_v15 = vmul.f32 %v1628_v39, %v4631_v41  ;;  %v4674_v39 = vand.u32 4294901760, %v1744_v17 }
 0x2a7   :  { %1704 = vrot.lane.b32.xlu1 %v1650_v57, %s4096_s10  ;;  %1688 = vrot.lane.b32.xlu2 %v1630_v14, %s4098_s12  ;;  %v1648_v29 = vpop.permute.xlu1 %1647  ;;  %v4654_v57 = vand.u32 4294901760, %v1746_v10  ;;  %v1745_v14 = vld [vmem:[#allocation8 + $0x148] sm:$0xff] }
 0x2a8   :  { %1696 = vrot.lane.b32.xlu0 %v1640_v49, %s4097_s11  ;;  %v1651_v11 = vmul.f32 %v1648_v29, %v4631_v41  ;;  %v5516_v49 = vand.u32 4294901760, %v4652_v34  ;;  %v4662_v56 = vand.u32 4294901760, %v1745_v14  ;;  %v1742_v29 = vld [vmem:[#allocation8 + $0x130] sm:$0xff] }
 0x2a9   :  { %v4660_v53 = vsub.f32 %v1746_v10, %v4654_v57  ;;  %1759 = vmatpush.msra.mxu2 %v4654_v57  ;;  %1972 = vmatpush.msra.mxu1 %v4654_v57  ;;  %v4695_v10 = vand.u32 4294901760, %v1742_v29 }
 0x2ab   :  { %1915 = vmatpush.msra.mxu0 %v4660_v53  ;;  %1761 = vmatpush.msra.mxu2 %v4662_v56 }
 0x2ac   :  { %1974 = vmatpush.msra.mxu1 %v4662_v56 }
 0x2ad   :  { %v1658_v40 = vpop.permute.xlu2 %1657  ;;  %1763 = vmatpush.msra.mxu2 %v4674_v39 }
 0x2ae   :  { %v1661_v47 = vmul.f32 %v1658_v40, %v4631_v41  ;;  %v4688_v40 = vand.u32 4294901760, %v1743_v13  ;;  %1976 = vmatpush.msra.mxu1 %v4674_v39 }
 0x2af   :  { %1666 = vrot.lane.b32.xlu1 %v1601_v46, %s4095_s9  ;;  %1674 = vrot.lane.b32.xlu2 %v1611_v44, %s4094_s3  ;;  %v1808_v46 = vsub.f32 %v4652_v34, %v5516_v49  ;;  %v4672_v44 = vsub.f32 %v1745_v14, %v4662_v56 }
 0x2b0   :  { %1712 = vrot.lane.b32.xlu0 %v1660_v6, %s4099_s13  ;;  %v5515_v6 = vand.u32 4294901760, %v4660_v53  ;;  %v4699_v14 = vsub.f32 %v1743_v13, %v4688_v40  ;;  %1765 = vmatpush.msra.mxu2 %v4688_v40  ;;  %v1740_v13 = vld [vmem:[#allocation8 + $0x120] sm:$0xff] }
 0x2b1   :  { %v1809_v43 = vand.u32 4294901760, %v1808_v46  ;;  %1918 = vmatpush.msra.mxu0 %v4672_v44  ;;  %1978 = vmatpush.msra.mxu1 %v4688_v40  ;;  %v5584_v59 = vand.u32 4294901760, %v4672_v44 }
 0x2b2   :  { %1767 = vmatpush.msra.mxu2 %v4695_v10 }
 0x2b3   :  { %1810 = vmatpush.msra.mxu3 %v1809_v43  ;;  %1980 = vmatpush.msra.mxu1 %v4695_v10 }
 0x2b7   :  { %1690 = vrot.lane.b32.xlu1 %v1631_v15, %s4098_s12  ;;  %1698 = vrot.lane.b32.xlu2 %v1641_v27, %s4097_s11  ;;  %v1814_v15 = vsub.f32 %v4660_v53, %v5515_v6  ;;  %v5514_v27 = vand.u32 4294901760, %v4672_v44  ;;  %v5521_v6 = vand.u32 4294901760, %v4699_v14 }
 0x2b8   :  { %1682 = vrot.lane.b32.xlu0 %v1621_v58, %s4093_s2  ;;  %v4684_v58 = vsub.f32 %v1744_v17, %v4674_v39  ;;  %v1741_v17 = vld [vmem:[#allocation8 + $0x128] sm:$0xff] }
 0x2ba   :  { %v5517_v31 = vand.u32 4294901760, %v4684_v58  ;;  %1921 = vmatpush.msra.mxu0 %v4684_v58 }
 0x2bc   :  { %v1826_v43 = vsub.f32 %v4684_v58, %v5517_v31  ;;  %1924 = vmatpush.msra.mxu0 %v4699_v14  ;;  %v4718_v31 = vand.u32 4294901760, %v1740_v13 }
 0x2be   :  { %v1827_v49 = vand.u32 4294901760, %v1826_v43  ;;  %v4731_v43 = vsub.f32 %v1740_v13, %v4718_v31  ;;  %v4743_v13 = vsub.f32 %v1739_v52, %v4733_v45  ;;  %v4758_v52 = vsub.f32 %v1738_v51, %v4746_v30 }
 0x2bf   :  { %1714 = vrot.lane.b32.xlu1 %v1661_v47, %s4099_s13  ;;  %v1815_v47 = vand.u32 4294901760, %v1814_v15  ;;  %v4707_v15 = vsub.f32 %v1742_v29, %v4695_v10  ;;  %v1832_v29 = vsub.f32 %v4699_v14, %v5521_v6 }
 0x2c0   :  { %1706 = vrot.lane.b32.xlu0 %v1651_v11, %s4096_s10  ;;  %v1820_v11 = vsub.f32 %v4672_v44, %v5514_v27  ;;  %v4709_v27 = vand.u32 4294901760, %v1741_v17  ;;  %v5525_v21 = vand.u32 4294901760, %v4731_v43  ;;  %v5527_v51 = vand.u32 4294901760, %v4758_v52 }
 0x2c1   :  { %1816 = vmatpush.msra.mxu3 %v1815_v47  ;;  %v5523_v47 = vand.u32 4294901760, %v4707_v15  ;;  %1927 = vmatpush.msra.mxu0 %v4707_v15  ;;  %v1833_v6 = vand.u32 4294901760, %v1832_v29  ;;  %v1737_v29 = vld [vmem:[#allocation8 + $0x108] sm:$0xff]  ;;  %v5591_v44 = vand.u32 4294901760, %v4758_v52 }
 0x2c2   :  { %v1821_v46 = vand.u32 4294901760, %v1820_v11  ;;  %v4716_v11 = vsub.f32 %v1741_v17, %v4709_v27  ;;  %1769 = vmatpush.msra.mxu2 %v4709_v27  ;;  %1982 = vmatpush.msra.mxu1 %v4709_v27  ;;  %v4753_v3 = vand.u32 4294901760, %v1737_v29 }
 0x2c4   :  { %1822 = vmatpush.msra.mxu3 %v1821_v46  ;;  %v1838_v46 = vsub.f32 %v4707_v15, %v5523_v47  ;;  %v5524_v17 = vand.u32 4294901760, %v4716_v11  ;;  %1930 = vmatpush.msra.mxu0 %v4716_v11  ;;  %v4765_v32 = vsub.f32 %v1737_v29, %v4753_v3 }
 0x2c5   :  { %1771 = vmatpush.msra.mxu2 %v4718_v31  ;;  %1984 = vmatpush.msra.mxu1 %v4718_v31 }
 0x2c6   :  { %1828 = vmatpush.msra.mxu3 %v1827_v49  ;;  %v1839_v49 = vand.u32 4294901760, %v1838_v46  ;;  %v1844_v47 = vsub.f32 %v4716_v11, %v5524_v17  ;;  %1933 = vmatpush.msra.mxu0 %v4731_v43  ;;  %v1850_v46 = vsub.f32 %v4731_v43, %v5525_v21  ;;  %v5526_v17 = vand.u32 4294901760, %v4743_v13 }
 0x2c7   :  { %1773 = vmatpush.msra.mxu2 %v4733_v45  ;;  %1986 = vmatpush.msra.mxu1 %v4733_v45  ;;  %v5528_v25 = vand.u32 4294901760, %v4765_v32 }
 0x2c8   :  { %1834 = vmatpush.msra.mxu3 %v1833_v6  ;;  %v1845_v20 = vand.u32 4294901760, %v1844_v47  ;;  %v1736_v6 = vld [vmem:[#allocation8 + $0x100] sm:$0xff]  ;;  %1936 = vmatpush.msra.mxu0 %v4743_v13  ;;  %v1851_v47 = vand.u32 4294901760, %v1850_v46  ;;  %v1856_v21 = vsub.f32 %v4743_v13, %v5526_v17 }
 0x2c9   :  { %v4767_v38 = vand.u32 4294901760, %v1736_v6  ;;  %1775 = vmatpush.msra.mxu2 %v4746_v30  ;;  %1988 = vmatpush.msra.mxu1 %v4746_v30 }
 0x2ca   :  { %1840 = vmatpush.msra.mxu3 %v1839_v49  ;;  %v1735_v49 = vld [vmem:[#allocation8 + $0xf8] sm:$0xff]  ;;  %1939 = vmatpush.msra.mxu0 %v4758_v52  ;;  %v1857_v46 = vand.u32 4294901760, %v1856_v21  ;;  %v1868_v21 = vsub.f32 %v4765_v32, %v5528_v25 }
 0x2cb   :  { %v4775_v17 = vsub.f32 %v1736_v6, %v4767_v38  ;;  %v4777_v29 = vand.u32 4294901760, %v1735_v49  ;;  %1777 = vmatpush.msra.mxu2 %v4753_v3  ;;  %1990 = vmatpush.msra.mxu1 %v4753_v3 }
 0x2cc   :  { %1846 = vmatpush.msra.mxu3 %v1845_v20  ;;  %v1862_v20 = vsub.f32 %v4758_v52, %v5527_v51  ;;  %1942 = vmatpush.msra.mxu0 %v4765_v32  ;;  %v1733_v51 = vld [vmem:[#allocation8 + $0xe8] sm:$0xff]  ;;  %v1869_v60 = vand.u32 4294901760, %v1868_v21 }
 0x2cd   :  { %v5529_v6 = vand.u32 4294901760, %v4775_v17  ;;  %v4790_v37 = vsub.f32 %v1735_v49, %v4777_v29  ;;  %1779 = vmatpush.msra.mxu2 %v4767_v38  ;;  %1992 = vmatpush.msra.mxu1 %v4767_v38  ;;  %v4802_v49 = vsub.f32 %v1734_v22, %v4792_v35 }
 0x2ce   :  { %1852 = vmatpush.msra.mxu3 %v1851_v47  ;;  %v1863_v47 = vand.u32 4294901760, %v1862_v20  ;;  %1945 = vmatpush.msra.mxu0 %v4775_v17  ;;  %v1732_v20 = vld [vmem:[#allocation8 + $0xe0] sm:$0xff] }
 0x2cf   :  { %v1874_v25 = vsub.f32 %v4775_v17, %v5529_v6  ;;  %v5530_v23 = vand.u32 4294901760, %v4790_v37  ;;  %1781 = vmatpush.msra.mxu2 %v4777_v29  ;;  %1994 = vmatpush.msra.mxu1 %v4777_v29  ;;  %v1885_v24 = vand.u32 4294901760, %v4802_v49  ;;  %v4813_v2 = vand.u32 4294901760, %v1732_v20 }
 0x2d0   :  { %1858 = vmatpush.msra.mxu3 %v1857_v46  ;;  %v4806_v46 = vand.u32 4294901760, %v1733_v51  ;;  %1948 = vmatpush.msra.mxu0 %v4790_v37 }
 0x2d1   :  { %v1875_v21 = vand.u32 4294901760, %v1874_v25  ;;  %v1880_v6 = vsub.f32 %v4790_v37, %v5530_v23  ;;  %1783 = vmatpush.msra.mxu2 %v4792_v35  ;;  %1996 = vmatpush.msra.mxu1 %v4792_v35  ;;  %v1886_v25 = vsub.f32 %v4802_v49, %v1885_v24  ;;  %v4823_v62 = vsub.f32 %v1732_v20, %v4813_v2 }
 0x2d2   :  { %1864 = vmatpush.msra.mxu3 %v1863_v47  ;;  %v4818_v22 = vsub.f32 %v1733_v51, %v4806_v46  ;;  %1951 = vmatpush.msra.mxu0 %v4802_v49  ;;  %v5582_v20 = vand.u32 4294901760, %v4652_v34  ;;  %v5587_v34 = vand.u32 4294901760, %v4707_v15 }
 0x2d3   :  { %v1881_v47 = vand.u32 4294901760, %v1880_v6  ;;  %1785 = vmatpush.msra.mxu2 %v4806_v46  ;;  %1998 = vmatpush.msra.mxu1 %v4806_v46  ;;  %v1897_v51 = vand.u32 4294901760, %v4823_v62 }
 0x2d4   :  { %1870 = vmatpush.msra.mxu3 %v1869_v60  ;;  %v1891_v23 = vand.u32 4294901760, %v4818_v22  ;;  %1954 = vmatpush.msra.mxu0 %v4818_v22  ;;  %v1887_v60 = vand.u32 4294901760, %v1886_v25  ;;  %v5583_v25 = vand.u32 4294901760, %v4660_v53  ;;  %v5590_v53 = vand.u32 4294901760, %v4743_v13  ;;  %v2132_v13 = vld [vmem:[#allocation8 + $0x160] sm:$0xff] }
 0x2d5   :  { %1787 = vmatpush.msra.mxu2 %v4813_v2  ;;  %2000 = vmatpush.msra.mxu1 %v4813_v2  ;;  %v1898_v49 = vsub.f32 %v4823_v62, %v1897_v51  ;;  %v2158_v52 = vand.u32 4294901760, %v2132_v13 }
 0x2d6   :  { %1876 = vmatpush.msra.mxu3 %v1875_v21  ;;  %v1892_v6 = vsub.f32 %v4818_v22, %v1891_v23  ;;  %1957 = vmatpush.msra.mxu0 %v4823_v62  ;;  %v5585_v22 = vand.u32 4294901760, %v4684_v58  ;;  %v5586_v62 = vand.u32 4294901760, %v4699_v14  ;;  %v5592_v58 = vand.u32 4294901760, %v4765_v32 }
 0x2d7   :  { %2017 = vmatpush.msrb.mxu2 %v5582_v20  ;;  %v1899_v55 = vand.u32 4294901760, %v1898_v49 }
 0x2d8   :  { %1882 = vmatpush.msra.mxu3 %v1881_v47  ;;  %v1893_v21 = vand.u32 4294901760, %v1892_v6 }
 0x2d9   :  { %2021 = vmatpush.msrb.mxu2 %v5583_v25 }
 0x2da   :  { %1888 = vmatpush.msra.mxu3 %v1887_v60 }
 0x2db   :  { %2025 = vmatpush.msrb.mxu2 %v5584_v59  ;;  %v5588_v59 = vand.u32 4294901760, %v4716_v11 }
 0x2dc   :  { %1894 = vmatpush.msra.mxu3 %v1893_v21 }
 0x2dd   :  { %2029 = vmatpush.msrb.mxu2 %v5585_v22 }
 0x2de   :  { %1900 = vmatpush.msra.mxu3 %v1899_v55  ;;  %v1584_v55 = vpop.permute.xlu1 %1583 }
 0x2df   :  { %2033 = vmatpush.msrb.mxu2 %v5586_v62  ;;  %v1590_v32 = vmul.f32 %v1584_v55, %v4614_v63 }
 0x2e0   :  { %2088 = vmatpush.msrb.mxu3 %v4649_v54  ;;  %v5589_v54 = vand.u32 4294901760, %v4731_v43 }
 0x2e1   :  { %2037 = vmatpush.msrb.mxu2 %v5587_v34 }
 0x2e2   :  { %2090 = vmatpush.msrb.mxu3 %v4654_v57  ;;  %v1588_v57 = vpop.permute.xlu2 %1587 }
 0x2e3   :  { %2041 = vmatpush.msrb.mxu2 %v5588_v59  ;;  %v1591_v22 = vmul.f32 %v1588_v57, %v4631_v41 }
 0x2e4   :  { %2092 = vmatpush.msrb.mxu3 %v4662_v56  ;;  %v2133_v56 = vld [vmem:[#allocation8 + $0x168] sm:$0xff] }
 0x2e5   :  { %2045 = vmatpush.msrb.mxu2 %v5589_v54 }
 0x2e6   :  { %2094 = vmatpush.msrb.mxu3 %v4674_v39  ;;  %v4862_v39 = vand.u32 4294901760, %v2133_v56 }
 0x2e7   :  { %2049 = vmatpush.msrb.mxu2 %v5590_v53 }
 0x2e8   :  { %2096 = vmatpush.msrb.mxu3 %v4688_v40  ;;  %2157 = vmatpush.msrb.mxu0 %v4862_v39 }
 0x2e9   :  { %2053 = vmatpush.msrb.mxu2 %v5591_v44  ;;  %v2137_v44 = vsel %vm771_vm9, %v4614_v63, 0 }
 0x2ea   :  { %2098 = vmatpush.msrb.mxu3 %v4695_v10  ;;  %v4869_v10 = vsub.f32 %v2133_v56, %v4862_v39  ;;  %2159 = vmatpush.msrb.mxu0 %v2158_v52 }
 0x2eb   :  { %2057 = vmatpush.msrb.mxu2 %v5592_v58 }
 0x2ec   :  { %2100 = vmatpush.msrb.mxu3 %v4709_v27  ;;  %v5593_v27 = vand.u32 4294901760, %v4775_v17  ;;  %v2193_v11 = vand.u32 4294901760, %v4869_v10 }
 0x2ee   :  { %2102 = vmatpush.msrb.mxu3 %v4718_v31  ;;  %2061 = vmatpush.msrb.mxu2 %v5593_v27  ;;  %v5594_v31 = vand.u32 4294901760, %v4790_v37  ;;  %v2332_v27 = vld [vmem:[#allocation8 + $0x178] sm:$0xff] }
 0x2f0   :  { %2104 = vmatpush.msrb.mxu3 %v4733_v45  ;;  %2065 = vmatpush.msrb.mxu2 %v5594_v31  ;;  %v2194_v45 = vsub.f32 %v4869_v10, %v2193_v11  ;;  %v4910_v31 = vand.u32 4294901760, %v2332_v27 }
 0x2f2   :  { %2106 = vmatpush.msrb.mxu3 %v4746_v30  ;;  %2069 = vmatpush.msrb.mxu2 %v1885_v24  ;;  %v2195_v37 = vand.u32 4294901760, %v2194_v45  ;;  %v2198_v24 = vsub.f32 %v2132_v13, %v2158_v52 }
 0x2f4   :  { %2108 = vmatpush.msrb.mxu3 %v4753_v3  ;;  %2073 = vmatpush.msrb.mxu2 %v1891_v23  ;;  %v2199_v6 = vand.u32 4294901760, %v2198_v24 }
 0x2f5   :  { %2196 = vmatpush.msrb.mxu1 %v2195_v37 }
 0x2f6   :  { %2110 = vmatpush.msrb.mxu3 %v4767_v38  ;;  %2077 = vmatpush.msrb.mxu2 %v1897_v51  ;;  %v2200_v49 = vsub.f32 %v2198_v24, %v2199_v6 }
 0x2f8   :  { %2112 = vmatpush.msrb.mxu3 %v4777_v29  ;;  %v2201_v51 = vand.u32 4294901760, %v2200_v49 }
 0x2f9   :  { %v1665_v15 = vpop.permute.xlu2 %1664 }
 0x2fa   :  { %v1718_v43 = vsel %vm771_vm9, %v1590_v32, %v1665_v15  ;;  %2114 = vmatpush.msrb.mxu3 %v4792_v35  ;;  %2202 = vmatpush.msrb.mxu1 %v2201_v51 }
 0x2fc   :  { %2116 = vmatpush.msrb.mxu3 %v4806_v46 }
 0x2fe   :  { %2118 = vmatpush.msrb.mxu3 %v4813_v2 }
 0x301   :  { %v1689_v60 = vpop.permute.xlu2 %1688 }
 0x309   :  { %v1675_v46 = vpop.permute.xlu2 %1674 }
 0x311   :  { %v1681_v40 = vpop.permute.xlu1 %1680 }
 0x312   :  { %v1673_v14 = vpop.permute.xlu0 %1672 }
 0x313   :  { %v1720_v17 = vsel %vm774_vm8, %v1718_v43, %v1673_v14  ;;  %v4916_v43 = vld [vmem:[#allocation7] sm:$0xff] }
 0x314   :  { %v1722_v3 = vsel %vm777_vm10, %v1720_v17, %v1681_v40  ;;  %v4907_v40 = vand.u32 4294901760, %v2137_v44  ;;  %v2389_v17 = vsub.f32 %v2332_v27, %v4910_v31  ;;  %2553 = vperm.xlu1 %3915, %v4916_v43   ;;  %2533 = vperm.xlu2 %3913, %v4916_v43  }
 0x315   :  { %v1724_v38 = vsel %vm780_vm11, %v1722_v3, %v1689_v60  ;;  %2543 = vperm.xlu0 %3914, %v4916_v43  }
 0x316   :  { %v4914_v63 = vsub.f32 %v2137_v44, %v4907_v40 }
 0x318   :  { %v2162_v37 = vand.u32 4294901760, %v4914_v63 }
 0x319   :  { %v1705_v30 = vpop.permute.xlu1 %1704 }
 0x31a   :  { %v1697_v47 = vpop.permute.xlu0 %1696 }
 0x31b   :  { %v1726_v23 = vsel %vm783_vm12, %v1724_v38, %v1697_v47  ;;  %v2390_v47 = vand.u32 4294901760, %v2389_v17 }
 0x31c   :  { %v1728_v20 = vsel %vm786_vm13, %v1726_v23, %v1705_v30  ;;  %3917 = vset.pattern.permute.xlu1 %v5563_v7  ;;  %3916 = vset.pattern.permute.xlu2 %v5564_v8 }
 0x31d   :  { %2573 = vperm.xlu1 %3917, %v4916_v43   ;;  %2563 = vperm.xlu2 %3916, %v4916_v43  }
 0x31e   :  { %3919 = vset.pattern.permute.xlu0 %v5565_v36 }
 0x31f   :  { %2593 = vperm.xlu0 %3919, %v4916_v43  }
 0x321   :  { %v1667_v29 = vpop.permute.xlu1 %1666 }
 0x322   :  { %v1713_v21 = vpop.permute.xlu0 %1712  ;;  %v1719_v2 = vsel %vm771_vm9, %v1591_v22, %v1667_v29 }
 0x323   :  { %v1730_v25 = vsel %vm789_vm14, %v1728_v20, %v1713_v21  ;;  %v1721_v57 = vsel %vm774_vm8, %v1719_v2, %v1675_v46  ;;  %v443_v20 = vld [vmem:[#allocation7 + $0x8] sm:$0xff] }
 0x324   :  { %v4893_v35 = vand.u32 4294901760, %v1730_v25 }
 0x325   :  { %3920 = vset.pattern.permute.xlu1 %v5566_v16  ;;  %3918 = vset.pattern.permute.xlu2 %v5567_v0 }
 0x326   :  { %v1789_v62 = vsub.f32 %v1730_v25, %v4893_v35  ;;  %1902 = vmatmul.f32.vlgmr.msra.gmra.mxu3 %v4893_v35  ;;  %2537 = vperm.xlu1 %3920, %v443_v20   ;;  %v2334_v25 = vsel %vm445_vm4, %v4916_v43, 0 }
 0x327   :  { %2320 = vmatpush.msra.mxu3 %v4862_v39  ;;  %2583 = vperm.xlu2 %3918, %v4916_v43   ;;  %v2356_v16 = vand.u32 4294901760, %v2334_v25 }
 0x328   :  { %v1790_v34 = vand.u32 4294901760, %v1789_v62  ;;  %1960 = vmatmul.f32.vlgmr.msra.gmra.mxu0 %v1789_v62  ;;  %3924 = vset.pattern.permute.xlu0 %v5563_v7 }
 0x329   :  { %v1691_v59 = vpop.permute.xlu1 %1690  ;;  %2228 = vmatpush.msra.mxu0 %v4869_v10  ;;  %2322 = vmatpush.msra.mxu3 %v2158_v52  ;;  %v1699_v10 = vpop.permute.xlu2 %1698  ;;  %v2357_v7 = vsub.f32 %v2334_v25, %v2356_v16 }
 0x32a   :  { %v1791_v55 = vsub.f32 %v1789_v62, %v1790_v34  ;;  %2004 = vmatmul.f32.vlgmr.msra.gmra.mxu1 %v1790_v34  ;;  %v1683_v54 = vpop.permute.xlu0 %1682  ;;  %2577 = vperm.xlu0 %3924, %v443_v20  }
 0x32b   :  { %2258 = vmatpush.msra.mxu1 %v4862_v39  ;;  %2231 = vmatpush.msra.mxu0 %v2198_v24  ;;  %v1723_v53 = vsel %vm777_vm10, %v1721_v57, %v1683_v54  ;;  %v2163_v24 = vsub.f32 %v4914_v63, %v2162_v37  ;;  %v2358_v22 = vand.u32 4294901760, %v2357_v7 }
 0x32c   :  { %v1792_v56 = vand.u32 4294901760, %v1791_v55  ;;  %v1725_v58 = vsel %vm780_vm11, %v1723_v53, %v1691_v59 }
 0x32d   :  { %2260 = vmatpush.msra.mxu1 %v2158_v52  ;;  %v1727_v39 = vsel %vm783_vm12, %v1725_v58, %v1699_v10  ;;  %v2164_v23 = vand.u32 4294901760, %v2163_v24 }
 0x32e   :  { %1793 = vmatmul.f32.vlgmr.msra.gmra.mxu2 %v1792_v56  ;;  %3922 = vset.pattern.permute.xlu1 %v5568_v9  ;;  %v2359_v9 = vsub.f32 %v2357_v7, %v2358_v22 }
 0x32f   :  { %2291 = vmatpush.msra.mxu2 %v2193_v11  ;;  %v2140_v11 = vsel %vm771_vm9, %v4631_v41, 0  ;;  %3921 = vset.pattern.permute.xlu2 %v5569_v42 }
 0x330   :  { %v4926_v52 = vand.u32 4294901760, %v2140_v11  ;;  %2557 = vperm.xlu1 %3922, %v443_v20   ;;  %2547 = vperm.xlu2 %3921, %v443_v20   ;;  %v2360_v46 = vand.u32 4294901760, %v2359_v9 }
 0x331   :  { %v1715_v14 = vpop.permute.xlu1 %1714  ;;  %2295 = vmatpush.msra.mxu2 %v2199_v6  ;;  %v2391_v6 = vsub.f32 %v2389_v17, %v2390_v47 }
 0x332   :  { %v1707_v15 = vpop.permute.xlu0 %1706  ;;  %v2169_v60 = vsub.f32 %v2140_v11, %v4926_v52 }
 0x333   :  { %v1729_v32 = vsel %vm786_vm13, %v1727_v39, %v1707_v15  ;;  %v2392_v29 = vand.u32 4294901760, %v2391_v6 }
 0x334   :  { %v1731_v45 = vsel %vm789_vm14, %v1729_v32, %v1715_v14  ;;  %v2170_v49 = vand.u32 4294901760, %v2169_v60 }
 0x335   :  { %v1796_v13 = vand.u32 4294901760, %v1731_v45 }
 0x336   :  { %v2171_v51 = vsub.f32 %v2169_v60, %v2170_v49 }
 0x337   :  { %1906 = vmatmul.f32.gmra.mxu3 %v1796_v13  ;;  %v1797_v30 = vsub.f32 %v1731_v45, %v1796_v13 }
 0x338   :  { %v2172_v21 = vand.u32 4294901760, %v2171_v51  ;;  %3925 = vset.pattern.permute.xlu1 %v5567_v0  ;;  %3923 = vset.pattern.permute.xlu2 %v5564_v8 }
 0x339   :  { %1965 = vmatmul.f32.gmra.mxu0 %v1797_v30  ;;  %v1798_v3 = vand.u32 4294901760, %v1797_v30  ;;  %2587 = vperm.xlu1 %3925, %v443_v20  }
 0x33a   :  { %2567 = vperm.xlu2 %3923, %v443_v20  }
 0x33b   :  { %2010 = vmatmul.f32.gmra.mxu1 %v1798_v3  ;;  %v1799_v41 = vsub.f32 %v1797_v30, %v1798_v3 }
 0x33d   :  { %v1800_v38 = vand.u32 4294901760, %v1799_v41 }
 0x33f   :  { %1801 = vmatmul.f32.gmra.mxu2 %v1800_v38  ;;  %2120 = vmatmul.f32.vlgmr.msrb.gmra.mxu3 %v4893_v35 }
 0x340   :  { %2448 = vmatpush.msrb.mxu3 %v4910_v31 }
 0x341   :  { %2165 = vmatmul.f32.vlgmr.msrb.gmra.mxu0 %v2164_v23  ;;  %3927 = vset.pattern.permute.xlu1 %v5570_v48 }
 0x342   :  { %2355 = vmatpush.msrb.mxu0 %v4910_v31  ;;  %2523 = vperm.xlu1 %3927, %v4916_v43  }
 0x343   :  { %2204 = vmatmul.f32.vlgmr.msrb.gmra.mxu1 %v4907_v40  ;;  %3926 = vset.pattern.permute.xlu2 %v5565_v36 }
 0x344   :  { %2393 = vmatpush.msrb.mxu1 %v2392_v29  ;;  %2597 = vperm.xlu2 %3926, %v443_v20  }
 0x347   :  { %2079 = vmatmul.f32.vlgmr.msrb.gmra.mxu2 %v4893_v35  ;;  %2124 = vmatmul.f32.gmra.mxu3 %v1796_v13  ;;  %v2337_v35 = vsel %vm445_vm4, %v443_v20, 0  ;;  %vm3772_vm4 = vcmask 1041409  }
 0x348   :  { %2420 = vmatpush.msrb.mxu2 %v2389_v17  ;;  %v2364_v62 = vand.u32 4294901760, %v2337_v35 }
 0x349   :  { %2173 = vmatmul.f32.gmra.mxu0 %v2172_v21 }
 0x34a   :  { %v2365_v42 = vsub.f32 %v2337_v35, %v2364_v62 }
 0x34b   :  { %2208 = vmatmul.f32.gmra.mxu1 %v4926_v52 }
 0x34c   :  { %v2366_v2 = vand.u32 4294901760, %v2365_v42  ;;  %3928 = vset.pattern.permute.xlu2 %v5570_v48  ;;  %v3936_v48 = vld [vmem:[#allocation8 + $0x170] ss:$0 sm:$0xff] }
 0x34d   :  { %2527 = vperm.xlu2 %3928, %v443_v20  }
 0x34e   :  { %v2367_v34 = vsub.f32 %v2365_v42, %v2366_v2 }
 0x34f   :  { %2083 = vmatmul.f32.gmra.mxu2 %v1796_v13  ;;  %2324 = vmatmul.f32.vlgmr.msra.gmra.mxu3 %v4907_v40 }
 0x350   :  { %v2368_v8 = vand.u32 4294901760, %v2367_v34  ;;  %v3937_v34 = vld [vmem:[#allocation8 + $0x180] ss:$0 sm:$0xff] }
 0x351   :  { %2234 = vmatmul.f32.vlgmr.msra.gmra.mxu0 %v4914_v63 }
 0x352   :  { %2480 = vmatpush.msra.mxu0 %v2390_v47 }
 0x353   :  { %2264 = vmatmul.f32.vlgmr.msra.gmra.mxu1 %v2162_v37 }
 0x354   :  { %2506 = vmatpush.msra.mxu1 %v4910_v31 }
 0x357   :  { %2297 = vmatmul.f32.vlgmr.msra.gmra.mxu2 %v4907_v40  ;;  %2328 = vmatmul.f32.gmra.mxu3 %v4926_v52 }
 0x359   :  { %2239 = vmatmul.f32.gmra.mxu0 %v2169_v60 }
 0x35b   :  { %2270 = vmatmul.f32.gmra.mxu1 %v2170_v49 }
 0x35f   :  { %2301 = vmatmul.f32.gmra.mxu2 %v4926_v52  ;;  %2452 = vmatmul.f32.vlgmr.msrb.gmra.mxu3 %v2358_v22 }
 0x361   :  { %2361 = vmatmul.f32.vlgmr.msrb.gmra.mxu0 %v2360_v46 }
 0x363   :  { %2395 = vmatmul.f32.vlgmr.msrb.gmra.mxu1 %v2356_v16 }
 0x367   :  { %2423 = vmatmul.f32.vlgmr.msrb.gmra.mxu2 %v2357_v7  ;;  %2458 = vmatmul.f32.gmra.mxu3 %v2366_v2 }
 0x369   :  { %2369 = vmatmul.f32.gmra.mxu0 %v2368_v8 }
 0x36b   :  { %2399 = vmatmul.f32.gmra.mxu1 %v2364_v62 }
 0x36e   :  { %v2534_v51 = vpop.permute.xlu2 %2533 }
 0x36f   :  { %2428 = vmatmul.f32.gmra.mxu2 %v2365_v42 }
 0x371   :  { %2482 = vmatmul.f32.vlgmr.msra.gmra.mxu0 %v2356_v16 }
 0x373   :  { %2508 = vmatmul.f32.vlgmr.msra.gmra.mxu1 %v2356_v16 }
 0x377   :  { %v2564_v9 = vpop.permute.xlu2 %2563 }
 0x379   :  { %2486 = vmatmul.f32.gmra.mxu0 %v2364_v62 }
 0x37b   :  { %2512 = vmatmul.f32.gmra.mxu1 %v2364_v62 }
 0x386   :  { %v2554_v46 = vpop.permute.xlu1 %2553 }
 0x3a5   :  { %v4963_v0 = vpop.f32.mrf.mxu0 }
 0x3a7   :  { %v4965_v59 = vpop.f32.mrf.mxu1 }
 0x3a9   :  { %v4967_v36 = vpop.f32.mrf.mxu3 }
 0x3b1   :  { %v4973_v57 = vpop.f32.mrf.mxu2 }
 0x3b6   :  { %v4969_v55 = vpop.f32.mrf.mxu0 }
 0x3b8   :  { %v4971_v54 = vpop.f32.mrf.mxu1 }
 0x3ba   :  { %v4975_v53 = vpop.f32.mrf.mxu3 }
 0x3be   :  { %v2166_v56 = vpop.f32.mrf.mxu0 }
 0x3bf   :  { %v2167_v44 = vadd.f32 %v3936_v48, %v2166_v56 }
 0x3c0   :  { %v2205_v58 = vpop.f32.mrf.mxu1 }
 0x3c1   :  { %v2206_v40 = vadd.f32 %v2205_v58, %v2167_v44 }
 0x3c2   :  { %v4977_v10 = vpop.f32.mrf.mxu2  ;;  %v4979_v14 = vpop.f32.mrf.mxu3 }
 0x3c6   :  { %v2174_v27 = vpop.f32.mrf.mxu0 }
 0x3c7   :  { %v2175_v39 = vadd.f32 %v3936_v48, %v2174_v27 }
 0x3c8   :  { %v2209_v15 = vpop.f32.mrf.mxu1 }
 0x3c9   :  { %v2210_v31 = vadd.f32 %v2209_v15, %v2175_v39 }
 0x3ca   :  { %v4981_v32 = vpop.f32.mrf.mxu2  ;;  %v4983_v63 = vpop.f32.mrf.mxu3 }
 0x3ce   :  { %v2235_v43 = vpop.f32.mrf.mxu0 }
 0x3cf   :  { %v2236_v45 = vadd.f32 %v2235_v43, %v2206_v40  ;;  %v2544_v43 = vpop.permute.xlu0 %2543 }
 0x3d0   :  { %v2265_v11 = vpop.f32.mrf.mxu1 }
 0x3d1   :  { %v2266_v17 = vadd.f32 %v2265_v11, %v2236_v45 }
 0x3d2   :  { %v4985_v13 = vpop.f32.mrf.mxu2  ;;  %v2325_v30 = vpop.f32.mrf.mxu3 }
 0x3d6   :  { %v2240_v37 = vpop.f32.mrf.mxu0 }
 0x3d7   :  { %v2241_v52 = vadd.f32 %v2240_v37, %v2210_v31 }
 0x3d8   :  { %v2271_v47 = vpop.f32.mrf.mxu1 }
 0x3d9   :  { %v2272_v3 = vadd.f32 %v2271_v47, %v2241_v52  ;;  %v2574_v47 = vpop.permute.xlu1 %2573 }
 0x3da   :  { %v2298_v41 = vpop.f32.mrf.mxu2  ;;  %v2329_v38 = vpop.f32.mrf.mxu3 }
 0x3db   :  { %v2299_v24 = vadd.f32 %v2298_v41, %v2266_v17  ;;  %v2584_v17 = vpop.permute.xlu2 %2583 }
 0x3dd   :  { %v4987_v60 = vadd.f32 %v2325_v30, %v2299_v24 }
 0x3de   :  { %v2362_v6 = vpop.f32.mrf.mxu0 }
 0x3df   :  { %5595 = vst [vmem:[#allocation35_spill] sm:$0xff] %v4987_v60 }
 0x3e0   :  { %v2396_v23 = vpop.f32.mrf.mxu1 }
 0x3e1   :  { %v2397_v7 = vadd.f32 %v2396_v23, %v2362_v6 }
 0x3e2   :  { %v2302_v49 = vpop.f32.mrf.mxu2  ;;  %v2453_v16 = vpop.f32.mrf.mxu3 }
 0x3e3   :  { %v2303_v29 = vadd.f32 %v2302_v49, %v2272_v3  ;;  %v2548_v23 = vpop.permute.xlu2 %2547  ;;  %v2538_v49 = vpop.permute.xlu1 %2537 }
 0x3e5   :  { %v4989_v20 = vadd.f32 %v2329_v38, %v2303_v29  ;;  %v2594_v29 = vpop.permute.xlu0 %2593 }
 0x3e6   :  { %v2370_v21 = vpop.f32.mrf.mxu0 }
 0x3e7   :  { %5596 = vst [vmem:[#allocation36_spill] sm:$0xff] %v4989_v20 }
 0x3e8   :  { %v2400_v25 = vpop.f32.mrf.mxu1 }
 0x3e9   :  { %v2401_v48 = vadd.f32 %v2400_v25, %v2370_v21 }
 0x3ea   :  { %v2424_v35 = vpop.f32.mrf.mxu2  ;;  %v2459_v58 = vpop.f32.mrf.mxu3 }
 0x3eb   :  { %v2425_v22 = vadd.f32 %v2424_v35, %v2397_v7  ;;  %v2568_v7 = vpop.permute.xlu2 %2567  ;;  %v2558_v35 = vpop.permute.xlu1 %2557 }
 0x3ed   :  { %v2454_v62 = vadd.f32 %v2453_v16, %v2425_v22  ;;  %v2578_v22 = vpop.permute.xlu0 %2577 }
 0x3ee   :  { %v2483_v42 = vpop.f32.mrf.mxu0 }
 0x3ef   :  { %v2484_v2 = vadd.f32 %v2483_v42, %v2454_v62 }
 0x3f0   :  { %v2509_v8 = vpop.f32.mrf.mxu1 }
 0x3f1   :  { %v2510_v56 = vadd.f32 %v2509_v8, %v2484_v2 }
 0x3f2   :  { %v2429_v44 = vpop.f32.mrf.mxu2 }
 0x3f3   :  { %v2518_v40 = vadd.f32 %v3937_v34, %v2510_v56  ;;  %v2430_v27 = vadd.f32 %v2429_v44, %v2401_v48  ;;  %v2588_v2 = vpop.permute.xlu1 %2587  ;;  %v5033_v48 = vld [vmem:[#allocation2] sm:$0xff]  ;;  %v2687_v44 = vld [vmem:[#allocation8 + $0x200] sm:$0xff] }
 0x3f4   :  { %5597 = vst [vmem:[#allocation37_spill] sm:$0xff] %v5033_v48 }
 0x3f5   :  { %v4991_v39 = vmax.f32 %v2518_v40, 0.0  ;;  %v2460_v15 = vadd.f32 %v2459_v58, %v2430_v27  ;;  %v2686_v58 = vld [vmem:[#allocation8 + $0x1f8] sm:$0xff] }
 0x3f6   :  { %v2487_v31 = vpop.f32.mrf.mxu0 }
 0x3f7   :  { %v2488_v45 = vadd.f32 %v2487_v31, %v2460_v15  ;;  %v2560_v11 = vmul.f32 %v2554_v46, %v4991_v39  ;;  %v2540_v37 = vmul.f32 %v2534_v51, %v4991_v39  ;;  %v2550_v52 = vmul.f32 %v2544_v43, %v4991_v39  ;;  %v2598_v46 = vpop.permute.xlu2 %2597  ;;  %v2684_v15 = vld [vmem:[#allocation8 + $0x1e8] sm:$0xff] }
 0x3f8   :  { %v2513_v30 = vpop.f32.mrf.mxu1  ;;  %v2590_v24 = vmul.f32 %v2584_v17, %v4991_v39  ;;  %v2570_v6 = vmul.f32 %v2564_v9, %v4991_v39  ;;  %v2580_v38 = vmul.f32 %v2574_v47, %v4991_v39  ;;  %v2600_v25 = vmul.f32 %v2594_v29, %v4991_v39  ;;  %v2683_v17 = vld [vmem:[#allocation8 + $0x1e0] sm:$0xff]  ;;  %v2681_v29 = vld [vmem:[#allocation8 + $0x1d0] sm:$0xff] }
 0x3f9   :  { %2620 = vrot.lane.b32.xlu1 %v2560_v11, %s4093_s2  ;;  %2604 = vrot.lane.b32.xlu2 %v2540_v37, %s4095_s9  ;;  %v2514_v3 = vadd.f32 %v2513_v30, %v2488_v45  ;;  %v5061_v11 = vand.u32 4294901760, %v2684_v15 }
 0x3fa   :  { %2612 = vrot.lane.b32.xlu0 %v2550_v52, %s4094_s3 }
 0x3fb   :  { %v2519_v41 = vadd.f32 %v3937_v34, %v2514_v3  ;;  %v5071_v47 = vsub.f32 %v2684_v15, %v5061_v11 }
 0x3fd   :  { %v5005_v51 = vmax.f32 %v2519_v41, 0.0  ;;  %v2682_v41 = vld [vmem:[#allocation8 + $0x1d8] sm:$0xff] }
 0x3ff   :  { %v2541_v21 = vmul.f32 %v2538_v49, %v5005_v51  ;;  %v2551_v16 = vmul.f32 %v2548_v23, %v5005_v51  ;;  %v2571_v62 = vmul.f32 %v2568_v7, %v5005_v51  ;;  %v2581_v9 = vmul.f32 %v2578_v22, %v5005_v51  ;;  %v2680_v22 = vld [vmem:[#allocation8 + $0x1c8] sm:$0xff] }
 0x400   :  { %v2561_v42 = vmul.f32 %v2558_v35, %v5005_v51  ;;  %v2601_v34 = vmul.f32 %v2598_v46, %v5005_v51  ;;  %v2591_v8 = vmul.f32 %v2588_v2, %v5005_v51  ;;  %v5082_v23 = vand.u32 4294901760, %v2682_v41 }
 0x401   :  { %2644 = vrot.lane.b32.xlu1 %v2590_v24, %s4096_s10  ;;  %2628 = vrot.lane.b32.xlu2 %v2570_v6, %s4098_s12  ;;  %v5096_v7 = vand.u32 4294901760, %v2681_v29  ;;  %v5105_v46 = vand.u32 4294901760, %v2680_v22 }
 0x402   :  { %2636 = vrot.lane.b32.xlu0 %v2580_v38, %s4097_s11  ;;  %v5537_v38 = vand.u32 4294901760, %v5071_v47 }
 0x409   :  { %2606 = vrot.lane.b32.xlu1 %v2541_v21, %s4095_s9  ;;  %2614 = vrot.lane.b32.xlu2 %v2551_v16, %s4094_s3  ;;  %v5094_v16 = vsub.f32 %v2682_v41, %v5082_v23 }
 0x40a   :  { %2652 = vrot.lane.b32.xlu0 %v2600_v25, %s4099_s13  ;;  %v2766_v25 = vsub.f32 %v5071_v47, %v5537_v38 }
 0x411   :  { %2630 = vrot.lane.b32.xlu1 %v2571_v62, %s4098_s12  ;;  %2638 = vrot.lane.b32.xlu2 %v2581_v9, %s4097_s11  ;;  %v2767_v62 = vand.u32 4294901760, %v2766_v25  ;;  %v5534_v9 = vand.u32 4294901760, %v5094_v16 }
 0x412   :  { %2622 = vrot.lane.b32.xlu0 %v2561_v42, %s4093_s2  ;;  %v5103_v42 = vsub.f32 %v2681_v29, %v5096_v7 }
 0x419   :  { %2654 = vrot.lane.b32.xlu1 %v2601_v34, %s4099_s13  ;;  %810 = vrot.lane.b32.xlu2 %v4220_v50, %s4099_s13  ;;  %v5036_v50 = vand.u32 4294901760, %v2687_v44  ;;  %v2679_v34 = vld [vmem:[#allocation8 + $0x1c0] sm:$0xff] }
 0x41a   :  { %2646 = vrot.lane.b32.xlu0 %v2591_v8, %s4096_s10  ;;  %v2778_v8 = vsub.f32 %v5094_v16, %v5534_v9 }
 0x41b   :  { %2697 = vmatpush.msra.mxu2 %v5036_v50  ;;  %2910 = vmatpush.msrb.mxu1 %v5036_v50 }
 0x421   :  { %1750 = vrot.lane.b32.xlu1 %v4611_v1, %s4099_s13  ;;  %1752 = vrot.lane.b32.xlu2 %v4622_v33, %s4099_s13  ;;  %v5039_v1 = vsub.f32 %v2687_v44, %v5036_v50  ;;  %v2685_v33 = vld [vmem:[#allocation8 + $0x1f0] sm:$0xff]  ;;  %v5533_v44 = vand.u32 4294901760, %v5103_v42 }
 0x422   :  { %812 = vrot.lane.b32.xlu0 %v4231_v4, %s4099_s13  ;;  %v5041_v4 = vand.u32 4294901760, %v2686_v58  ;;  %v5049_v27 = vand.u32 4294901760, %v2685_v33 }
 0x423   :  { %2852 = vmatpush.msrb.mxu0 %v5039_v1 }
 0x424   :  { %v5047_v40 = vsub.f32 %v2686_v58, %v5041_v4  ;;  %2699 = vmatpush.msra.mxu2 %v5041_v4  ;;  %2912 = vmatpush.msrb.mxu1 %v5041_v4  ;;  %v5059_v45 = vsub.f32 %v2685_v33, %v5049_v27  ;;  %v5118_v58 = vsub.f32 %v2680_v22, %v5105_v46  ;;  %v5120_v33 = vand.u32 4294901760, %v2679_v34 }
 0x426   :  { %v5541_v43 = vand.u32 4294901760, %v5047_v40  ;;  %2855 = vmatpush.msrb.mxu0 %v5047_v40  ;;  %2701 = vmatpush.msra.mxu2 %v5049_v27  ;;  %v5539_v52 = vand.u32 4294901760, %v5059_v45  ;;  %v5130_v41 = vsub.f32 %v2679_v34, %v5120_v33 }
 0x427   :  { %2914 = vmatpush.msrb.mxu1 %v5049_v27 }
 0x428   :  { %v2754_v37 = vsub.f32 %v5047_v40, %v5541_v43  ;;  %2858 = vmatpush.msrb.mxu0 %v5059_v45  ;;  %2703 = vmatpush.msra.mxu2 %v5061_v11  ;;  %v2760_v6 = vsub.f32 %v5059_v45, %v5539_v52  ;;  %v5532_v25 = vand.u32 4294901760, %v5130_v41 }
 0x429   :  { %2692 = vrot.lane.b32.xlu1 %v2514_v3, %s4099_s13  ;;  %3273 = vrot.lane.b32.xlu2 %v5033_v48, %s4100_s14  ;;  %v5075_v3 = vand.u32 4294901760, %v2683_v17 }
 0x42a   :  { %2690 = vrot.lane.b32.xlu0 %v2510_v56, %s4099_s13  ;;  %v5542_v56 = vand.u32 4294901760, %v5039_v1  ;;  %2916 = vmatpush.msrb.mxu1 %v5061_v11  ;;  %v2755_v24 = vand.u32 4294901760, %v2754_v37  ;;  %v2761_v21 = vand.u32 4294901760, %v2760_v6  ;;  %v5531_v37 = vand.u32 4294901760, %v5118_v58  ;;  %v2677_v6 = vld [vmem:[#allocation8 + $0x1b0] sm:$0xff] }
 0x42b   :  { %2861 = vmatpush.msrb.mxu0 %v5071_v47  ;;  %v5086_v49 = vsub.f32 %v2683_v17, %v5075_v3  ;;  %2705 = vmatpush.msra.mxu2 %v5075_v3  ;;  %v2779_v17 = vand.u32 4294901760, %v2778_v8  ;;  %v5140_v22 = vand.u32 4294901760, %v2677_v6  ;;  %v2796_v8 = vsub.f32 %v5130_v41, %v5532_v25 }
 0x42c   :  { %v2748_v31 = vsub.f32 %v5039_v1, %v5542_v56  ;;  %2918 = vmatpush.msrb.mxu1 %v5075_v3 }
 0x42d   :  { %v5535_v35 = vand.u32 4294901760, %v5086_v49  ;;  %2864 = vmatpush.msrb.mxu0 %v5086_v49  ;;  %2707 = vmatpush.msra.mxu2 %v5082_v23 }
 0x42e   :  { %v2749_v30 = vand.u32 4294901760, %v2748_v31  ;;  %2920 = vmatpush.msrb.mxu1 %v5082_v23  ;;  %v2678_v31 = vld [vmem:[#allocation8 + $0x1b8] sm:$0xff] }
 0x42f   :  { %v2772_v2 = vsub.f32 %v5086_v49, %v5535_v35  ;;  %2867 = vmatpush.msrb.mxu0 %v5094_v16  ;;  %2709 = vmatpush.msra.mxu2 %v5096_v7 }
 0x430   :  { %2750 = vmatpush.msra.mxu3 %v2749_v30  ;;  %2922 = vmatpush.msrb.mxu1 %v5096_v7  ;;  %v2784_v30 = vsub.f32 %v5103_v42, %v5533_v44  ;;  %v2674_v44 = vld [vmem:[#allocation8 + $0x198] sm:$0xff] }
 0x431   :  { %v2773_v15 = vand.u32 4294901760, %v2772_v2  ;;  %2870 = vmatpush.msrb.mxu0 %v5103_v42  ;;  %2711 = vmatpush.msra.mxu2 %v5105_v46  ;;  %v2676_v2 = vld [vmem:[#allocation8 + $0x1a8] sm:$0xff]  ;;  %v5179_v35 = vand.u32 4294901760, %v2674_v44 }
 0x432   :  { %2756 = vmatpush.msra.mxu3 %v2755_v24  ;;  %2924 = vmatpush.msrb.mxu1 %v5105_v46  ;;  %v5133_v24 = vand.u32 4294901760, %v2678_v31  ;;  %v2785_v29 = vand.u32 4294901760, %v2784_v30  ;;  %v5154_v30 = vand.u32 4294901760, %v2676_v2 }
 0x433   :  { %2873 = vmatpush.msrb.mxu0 %v5118_v58  ;;  %2713 = vmatpush.msra.mxu2 %v5120_v33 }
 0x434   :  { %2762 = vmatpush.msra.mxu3 %v2761_v21  ;;  %v2790_v21 = vsub.f32 %v5118_v58, %v5531_v37  ;;  %2926 = vmatpush.msrb.mxu1 %v5120_v33  ;;  %v5162_v25 = vsub.f32 %v2676_v2, %v5154_v30 }
 0x435   :  { %2876 = vmatpush.msrb.mxu0 %v5130_v41  ;;  %2715 = vmatpush.msra.mxu2 %v5133_v24 }
 0x436   :  { %2768 = vmatpush.msra.mxu3 %v2767_v62  ;;  %v5145_v62 = vsub.f32 %v2678_v31, %v5133_v24  ;;  %v2791_v34 = vand.u32 4294901760, %v2790_v21  ;;  %2928 = vmatpush.msrb.mxu1 %v5133_v24  ;;  %v2797_v21 = vand.u32 4294901760, %v2796_v8  ;;  %v5540_v2 = vand.u32 4294901760, %v5162_v25 }
 0x437   :  { %2717 = vmatpush.msra.mxu2 %v5140_v22 }
 0x438   :  { %2774 = vmatpush.msra.mxu3 %v2773_v15  ;;  %v5152_v15 = vsub.f32 %v2677_v6, %v5140_v22  ;;  %v5536_v31 = vand.u32 4294901760, %v5145_v62  ;;  %2879 = vmatpush.msrb.mxu0 %v5145_v62 }
 0x439   :  { %2930 = vmatpush.msrb.mxu1 %v5140_v22  ;;  %2719 = vmatpush.msra.mxu2 %v5154_v30 }
 0x43a   :  { %2780 = vmatpush.msra.mxu3 %v2779_v17  ;;  %v2675_v17 = vld [vmem:[#allocation8 + $0x1a0] sm:$0xff]  ;;  %v5538_v37 = vand.u32 4294901760, %v5152_v15  ;;  %2882 = vmatpush.msrb.mxu0 %v5152_v15 }
 0x43b   :  { %v5164_v6 = vand.u32 4294901760, %v2675_v17  ;;  %2932 = vmatpush.msrb.mxu1 %v5154_v30 }
 0x43c   :  { %2786 = vmatpush.msra.mxu3 %v2785_v29  ;;  %v2802_v29 = vsub.f32 %v5145_v62, %v5536_v31  ;;  %v2808_v8 = vsub.f32 %v5152_v15, %v5538_v37  ;;  %v2673_v31 = vld [vmem:[#allocation8 + $0x190] sm:$0xff]  ;;  %2885 = vmatpush.msrb.mxu0 %v5162_v25  ;;  %v2814_v37 = vsub.f32 %v5162_v25, %v5540_v2 }
 0x43d   :  { %v5177_v9 = vsub.f32 %v2675_v17, %v5164_v6  ;;  %v5189_v17 = vsub.f32 %v2674_v44, %v5179_v35  ;;  %2721 = vmatpush.msra.mxu2 %v5164_v6  ;;  %2934 = vmatpush.msrb.mxu1 %v5164_v6 }
 0x43e   :  { %2792 = vmatpush.msra.mxu3 %v2791_v34  ;;  %v2803_v34 = vand.u32 4294901760, %v2802_v29  ;;  %v2809_v38 = vand.u32 4294901760, %v2808_v8  ;;  %v2672_v29 = vld [vmem:[#allocation8 + $0x188] sm:$0xff]  ;;  %v2815_v8 = vand.u32 4294901760, %v2814_v37 }
 0x43f   :  { %v5544_v52 = vand.u32 4294901760, %v5177_v9  ;;  %2888 = vmatpush.msrb.mxu0 %v5177_v9  ;;  %v2825_v43 = vand.u32 4294901760, %v5189_v17  ;;  %v5200_v56 = vand.u32 4294901760, %v2672_v29  ;;  %2723 = vmatpush.msra.mxu2 %v5179_v35 }
 0x440   :  { %2798 = vmatpush.msra.mxu3 %v2797_v21  ;;  %v5193_v21 = vand.u32 4294901760, %v2673_v31  ;;  %2936 = vmatpush.msrb.mxu1 %v5179_v35 }
 0x441   :  { %v2820_v2 = vsub.f32 %v5177_v9, %v5544_v52  ;;  %2891 = vmatpush.msrb.mxu0 %v5189_v17  ;;  %v2826_v37 = vsub.f32 %v5189_v17, %v2825_v43  ;;  %v2836_v20 = vsub.f32 %v2672_v29, %v5200_v56 }
 0x442   :  { %2804 = vmatpush.msra.mxu3 %v2803_v34  ;;  %v2830_v44 = vsub.f32 %v2673_v31, %v5193_v21  ;;  %2725 = vmatpush.msra.mxu2 %v5193_v21 }
 0x443   :  { %v2821_v34 = vand.u32 4294901760, %v2820_v2  ;;  %2938 = vmatpush.msrb.mxu1 %v5193_v21  ;;  %v2827_v60 = vand.u32 4294901760, %v2826_v37  ;;  %v2837_v48 = vand.u32 4294901760, %v2836_v20  ;;  %v5598_v2 = vand.u32 4294901760, %v5039_v1 }
 0x444   :  { %2810 = vmatpush.msra.mxu3 %v2809_v38  ;;  %v2831_v52 = vand.u32 4294901760, %v2830_v44  ;;  %2894 = vmatpush.msrb.mxu0 %v2830_v44  ;;  %v5600_v37 = vand.u32 4294901760, %v5059_v45  ;;  %v5604_v1 = vand.u32 4294901760, %v5103_v42  ;;  %v5606_v45 = vand.u32 4294901760, %v5130_v41 }
 0x445   :  { %2727 = vmatpush.msra.mxu2 %v5200_v56  ;;  %2940 = vmatpush.msrb.mxu1 %v5200_v56  ;;  %v2838_v31 = vsub.f32 %v2836_v20, %v2837_v48 }
 0x446   :  { %2816 = vmatpush.msra.mxu3 %v2815_v8  ;;  %v2832_v38 = vsub.f32 %v2830_v44, %v2831_v52  ;;  %2897 = vmatpush.msrb.mxu0 %v2836_v20  ;;  %v5599_v8 = vand.u32 4294901760, %v5047_v40  ;;  %v5601_v44 = vand.u32 4294901760, %v5071_v47  ;;  %v5602_v20 = vand.u32 4294901760, %v5086_v49  ;;  %v2524_v40 = vpop.permute.xlu1 %2523 }
 0x447   :  { %2957 = vmatpush.msrb.mxu2 %v5598_v2  ;;  %v2839_v29 = vand.u32 4294901760, %v2838_v31  ;;  %v5609_v49 = vand.u32 4294901760, %v5162_v25 }
 0x448   :  { %2822 = vmatpush.msra.mxu3 %v2821_v34  ;;  %v2833_v17 = vand.u32 4294901760, %v2832_v38 }
 0x449   :  { %2961 = vmatpush.msrb.mxu2 %v5599_v8 }
 0x44a   :  { %2828 = vmatpush.msra.mxu3 %v2827_v60  ;;  %v5603_v60 = vand.u32 4294901760, %v5094_v16  ;;  %v5610_v16 = vand.u32 4294901760, %v5177_v9 }
 0x44b   :  { %2965 = vmatpush.msrb.mxu2 %v5600_v37 }
 0x44c   :  { %2834 = vmatpush.msra.mxu3 %v2833_v17 }
 0x44d   :  { %2969 = vmatpush.msrb.mxu2 %v5601_v44 }
 0x44e   :  { %2840 = vmatpush.msra.mxu3 %v2839_v29 }
 0x44f   :  { %2973 = vmatpush.msrb.mxu2 %v5602_v20 }
 0x450   :  { %3028 = vmatpush.msrb.mxu3 %v5036_v50  ;;  %v5605_v50 = vand.u32 4294901760, %v5118_v58 }
 0x451   :  { %2977 = vmatpush.msrb.mxu2 %v5603_v60 }
 0x452   :  { %3030 = vmatpush.msrb.mxu3 %v5041_v4  ;;  %v2528_v4 = vpop.permute.xlu2 %2527 }
 0x453   :  { %2981 = vmatpush.msrb.mxu2 %v5604_v1 }
 0x454   :  { %3032 = vmatpush.msrb.mxu3 %v5049_v27  ;;  %v5607_v27 = vand.u32 4294901760, %v5145_v62  ;;  %v2531_v62 = vmul.f32 %v2528_v4, %v5005_v51 }
 0x455   :  { %2985 = vmatpush.msrb.mxu2 %v5605_v50 }
 0x456   :  { %3034 = vmatpush.msrb.mxu3 %v5061_v11  ;;  %v5608_v11 = vand.u32 4294901760, %v5152_v15 }
 0x457   :  { %2989 = vmatpush.msrb.mxu2 %v5606_v45 }
 0x458   :  { %3036 = vmatpush.msrb.mxu3 %v5075_v3 }
 0x459   :  { %2993 = vmatpush.msrb.mxu2 %v5607_v27  ;;  %v3932_v27 = vld [vmem:[#allocation8 + $0x10] ss:$0 sm:$0xff] }
 0x45a   :  { %3038 = vmatpush.msrb.mxu3 %v5082_v23  ;;  %v2605_v23 = vpop.permute.xlu2 %2604 }
 0x45b   :  { %2997 = vmatpush.msrb.mxu2 %v5608_v11  ;;  %v3076_v11 = vld [vmem:[#allocation8 + $0x220] sm:$0xff] }
 0x45c   :  { %3040 = vmatpush.msrb.mxu3 %v5096_v7  ;;  %v2530_v7 = vmul.f32 %v2524_v40, %v4991_v39 }
 0x45d   :  { %3001 = vmatpush.msrb.mxu2 %v5609_v49  ;;  %v134_v49 = vadd.f32 %v3932_v27, %v4196_v18 }
 0x45e   :  { %3042 = vmatpush.msrb.mxu3 %v5105_v46  ;;  %v2658_v42 = vsel %vm771_vm9, %v2530_v7, %v2605_v23  ;;  %v3075_v23 = vld [vmem:[#allocation8 + $0x218] sm:$0xff] }
 0x45f   :  { %3005 = vmatpush.msrb.mxu2 %v5610_v16  ;;  %v5277_v7 = vand.u32 4294901760, %v3075_v23 }
 0x460   :  { %3044 = vmatpush.msrb.mxu3 %v5120_v33 }
 0x461   :  { %3009 = vmatpush.msrb.mxu2 %v2825_v43 }
 0x462   :  { %3046 = vmatpush.msrb.mxu3 %v5133_v24  ;;  %v2629_v39 = vpop.permute.xlu2 %2628 }
 0x463   :  { %3013 = vmatpush.msrb.mxu2 %v2831_v52 }
 0x464   :  { %3048 = vmatpush.msrb.mxu3 %v5140_v22 }
 0x465   :  { %3017 = vmatpush.msrb.mxu2 %v2837_v48 }
 0x466   :  { %3050 = vmatpush.msrb.mxu3 %v5154_v30 }
 0x468   :  { %3052 = vmatpush.msrb.mxu3 %v5164_v6 }
 0x46a   :  { %3054 = vmatpush.msrb.mxu3 %v5179_v35  ;;  %v2615_v35 = vpop.permute.xlu2 %2614 }
 0x46b   :  { %v2621_v47 = vpop.permute.xlu1 %2620 }
 0x46c   :  { %v2613_v3 = vpop.permute.xlu0 %2612  ;;  %3056 = vmatpush.msrb.mxu3 %v5193_v21 }
 0x46d   :  { %v2660_v46 = vsel %vm774_vm8, %v2658_v42, %v2613_v3  ;;  %v5270_v3 = vand.u32 4294901760, %v3076_v11 }
 0x46e   :  { %v2662_v9 = vsel %vm777_vm10, %v2660_v46, %v2621_v47  ;;  %3058 = vmatpush.msrb.mxu3 %v5200_v56 }
 0x46f   :  { %v2664_v41 = vsel %vm780_vm11, %v2662_v9, %v2629_v39  ;;  %3095 = vmatpush.msra.mxu0 %v5270_v3  ;;  %v5275_v16 = vsub.f32 %v3076_v11, %v5270_v3  ;;  %v5283_v39 = vsub.f32 %v3075_v23, %v5277_v7 }
 0x471   :  { %v3125_v9 = vand.u32 4294901760, %v5275_v16  ;;  %3097 = vmatpush.msra.mxu0 %v5277_v7 }
 0x472   :  { %v2639_v51 = vpop.permute.xlu2 %2638 }
 0x473   :  { %v2645_v58 = vpop.permute.xlu1 %2644 }
 0x474   :  { %v2637_v33 = vpop.permute.xlu0 %2636 }
 0x475   :  { %v2666_v43 = vsel %vm783_vm12, %v2664_v41, %v2637_v33  ;;  %v3074_v33 = vld [vmem:[#allocation8 + $0x210] sm:$0xff]  ;;  %v5289_v41 = vadd.f32 %v4198_v19, %v134_v49  ;;  %v5303_v19 = vadd.f32 %v4212_v26, %v4214_v28 }
 0x476   :  { %v2668_v52 = vsel %vm786_vm13, %v2666_v43, %v2645_v58  ;;  %v5286_v18 = vand.u32 4294901760, %v3074_v33  ;;  %v3073_v43 = vld [vmem:[#allocation8 + $0x208] sm:$0xff] }
 0x478   :  { %3099 = vmatpush.msra.mxu0 %v5286_v18 }
 0x47a   :  { %v811_v45 = vpop.permute.xlu2 %810 }
 0x47b   :  { %v2607_v24 = vpop.permute.xlu1 %2606  ;;  %v855_v42 = vadd.f32 %v4593_v5, %v811_v45  ;;  %v3126_v5 = vsub.f32 %v5275_v16, %v3125_v9 }
 0x47c   :  { %v2653_v25 = vpop.permute.xlu0 %2652  ;;  %v2659_v30 = vsel %vm771_vm9, %v2531_v62, %v2607_v24  ;;  %v3270_v24 = vld [vmem:[#allocation8 + $0x240] sm:$0xff]  ;;  %v5611_v62 = vld [vmem:[#allocation28_spill] sm:$0xff] }
 0x47d   :  { %v2670_v22 = vsel %vm789_vm14, %v2668_v52, %v2653_v25  ;;  %v2661_v38 = vsel %vm774_vm8, %v2659_v30, %v2615_v35  ;;  %v5296_v25 = vsub.f32 %v3074_v33, %v5286_v18  ;;  %v5309_v30 = vand.u32 4294901760, %v3270_v24 }
 0x47e   :  { %v2728_v48 = vand.u32 4294901760, %v2670_v22 }
 0x480   :  { %v2729_v15 = vsub.f32 %v2670_v22, %v2728_v48  ;;  %2842 = vmatmul.f32.vlgmr.msra.gmra.mxu3 %v2728_v48  ;;  %v5298_v22 = vand.u32 4294901760, %v3073_v43 }
 0x482   :  { %v2730_v6 = vand.u32 4294901760, %v2729_v15  ;;  %2900 = vmatmul.f32.vlgmr.msrb.gmra.mxu0 %v2729_v15  ;;  %v1753_v46 = vpop.permute.xlu2 %1752 }
 0x483   :  { %v2631_v21 = vpop.permute.xlu1 %2630  ;;  %3101 = vmatpush.msra.mxu0 %v5298_v22  ;;  %v1803_v26 = vadd.f32 %v4977_v10, %v1753_v46 }
 0x484   :  { %v2731_v34 = vsub.f32 %v2729_v15, %v2730_v6  ;;  %2944 = vmatmul.f32.vlgmr.msrb.gmra.mxu1 %v2730_v6  ;;  %v2623_v56 = vpop.permute.xlu0 %2622  ;;  %v3269_v6 = vld [vmem:[#allocation8 + $0x238] sm:$0xff] }
 0x485   :  { %v2663_v31 = vsel %vm777_vm10, %v2661_v38, %v2623_v56  ;;  %v3137_v56 = vand.u32 4294901760, %v5296_v25  ;;  %v5316_v38 = vsub.f32 %v3073_v43, %v5298_v22  ;;  %3166 = vmatpush.msrb.mxu0 %v5275_v16  ;;  %v1908_v46 = vadd.f32 %v4975_v53, %v1803_v26  ;;  %v3938_v16 = vld [vmem:[#allocation8 + $0x248] ss:$0 sm:$0xff] }
 0x486   :  { %v2732_v2 = vand.u32 4294901760, %v2731_v34  ;;  %v2665_v17 = vsel %vm780_vm11, %v2663_v31, %v2631_v21  ;;  %v3127_v21 = vand.u32 4294901760, %v3126_v5  ;;  %v5323_v31 = vsub.f32 %v3270_v24, %v5309_v30 }
 0x487   :  { %v2667_v8 = vsel %vm783_vm12, %v2665_v17, %v2639_v51  ;;  %v3268_v17 = vld [vmem:[#allocation8 + $0x230] sm:$0xff]  ;;  %v3143_v10 = vand.u32 4294901760, %v5316_v38  ;;  %3169 = vmatpush.msrb.mxu0 %v5283_v39 }
 0x488   :  { %2733 = vmatmul.f32.vlgmr.msra.gmra.mxu2 %v2732_v2  ;;  %v5325_v2 = vand.u32 4294901760, %v3269_v6  ;;  %3128 = vmatpush.msra.mxu1 %v3127_v21 }
 0x489   :  { %3290 = vmatpush.msra.mxu2 %v5309_v30  ;;  %v3144_v27 = vsub.f32 %v5316_v38, %v3143_v10  ;;  %3172 = vmatpush.msrb.mxu0 %v5296_v25 }
 0x48b   :  { %v2655_v29 = vpop.permute.xlu1 %2654  ;;  %3292 = vmatpush.msra.mxu2 %v5325_v2  ;;  %v3145_v33 = vand.u32 4294901760, %v3144_v27  ;;  %3175 = vmatpush.msrb.mxu0 %v5316_v38 }
 0x48c   :  { %v2647_v37 = vpop.permute.xlu0 %2646 }
 0x48d   :  { %v2669_v44 = vsel %vm786_vm13, %v2667_v8, %v2647_v37  ;;  %v5612_v8 = vld [vmem:[#allocation24_spill] sm:$0xff] }
 0x48e   :  { %v2671_v20 = vsel %vm789_vm14, %v2669_v44, %v2655_v29  ;;  %v3138_v29 = vsub.f32 %v5296_v25, %v3137_v56  ;;  %v5613_v44 = vld [vmem:[#allocation26_spill] sm:$0xff] }
 0x48f   :  { %v2736_v60 = vand.u32 4294901760, %v2671_v20 }
 0x490   :  { %v3139_v45 = vand.u32 4294901760, %v3138_v29 }
 0x491   :  { %2846 = vmatmul.f32.gmra.mxu3 %v2736_v60  ;;  %v2737_v1 = vsub.f32 %v2671_v20, %v2736_v60 }
 0x493   :  { %2905 = vmatmul.f32.gmra.mxu0 %v2737_v1  ;;  %v2738_v40 = vand.u32 4294901760, %v2737_v1  ;;  %v1751_v52 = vpop.permute.xlu1 %1750 }
 0x494   :  { %v813_v47 = vpop.permute.xlu0 %812  ;;  %v1795_v28 = vadd.f32 %v4973_v57, %v1751_v52  ;;  %v5332_v57 = vand.u32 4294901760, %v3268_v17 }
 0x495   :  { %2950 = vmatmul.f32.gmra.mxu1 %v2738_v40  ;;  %v2739_v50 = vsub.f32 %v2737_v1, %v2738_v40  ;;  %v863_v58 = vadd.f32 %v4597_v12, %v813_v47  ;;  %v3131_v12 = vand.u32 4294901760, %v5283_v39  ;;  %v3320_v1 = vand.u32 4294901760, %v5323_v31 }
 0x496   :  { %v5339_v40 = vsub.f32 %v3269_v6, %v5325_v2  ;;  %v5347_v11 = vsub.f32 %v3268_v17, %v5332_v57  ;;  %3294 = vmatpush.msra.mxu2 %v5332_v57 }
 0x497   :  { %v2740_v4 = vand.u32 4294901760, %v2739_v50  ;;  %v968_v15 = vadd.f32 %v5611_v62, %v863_v58  ;;  %v3132_v34 = vsub.f32 %v5283_v39, %v3131_v12  ;;  %v3267_v50 = vld [vmem:[#allocation8 + $0x228] sm:$0xff]  ;;  %v3321_v49 = vsub.f32 %v5323_v31, %v3320_v1 }
 0x498   :  { %v3326_v23 = vand.u32 4294901760, %v5339_v40  ;;  %v1904_v58 = vadd.f32 %v4967_v36, %v1795_v28  ;;  %v3332_v43 = vand.u32 4294901760, %v5347_v11  ;;  %v5614_v36 = vld [vmem:[#allocation27_spill] sm:$0xff] }
 0x499   :  { %2741 = vmatmul.f32.gmra.mxu2 %v2740_v4  ;;  %3060 = vmatmul.f32.vlgmr.msrb.gmra.mxu3 %v2728_v48  ;;  %v3133_v51 = vand.u32 4294901760, %v3132_v34  ;;  %v1027_v20 = vadd.f32 %v5613_v44, %v968_v15  ;;  %v5615_v34 = vld [vmem:[#allocation20_spill] sm:$0xff] }
 0x49a   :  { %v3327_v62 = vsub.f32 %v5339_v40, %v3326_v23  ;;  %v3333_v21 = vsub.f32 %v5347_v11, %v3332_v43  ;;  %v191_v26 = vadd.f32 %v5615_v34, %v5289_v41  ;;  %v1967_v41 = vadd.f32 %v4969_v55, %v1908_v46  ;;  %v5619_v46 = vld [vmem:[#allocation30_spill] sm:$0xff] }
 0x49b   :  { %3134 = vmatpush.msra.mxu1 %v3133_v51  ;;  %v1072_v53 = vadd.f32 %v5614_v36, %v1027_v20 }
 0x49c   :  { %v2691_v24 = vpop.permute.xlu0 %2690  ;;  %v3328_v51 = vand.u32 4294901760, %v3327_v62  ;;  %v5621_v62 = vld [vmem:[#allocation21_spill] sm:$0xff] }
 0x49d   :  { %3140 = vmatpush.msra.mxu1 %v3139_v45 }
 0x49f   :  { %3146 = vmatpush.msra.mxu1 %v3145_v33 }
 0x4a1   :  { %3019 = vmatmul.f32.vlgmr.msrb.gmra.mxu2 %v2728_v48  ;;  %3064 = vmatmul.f32.gmra.mxu3 %v2736_v60  ;;  %v964_v48 = vadd.f32 %v4587_v61, %v855_v42  ;;  %v5354_v42 = vand.u32 4294901760, %v3267_v50 }
 0x4a2   :  { %3195 = vmatpush.msrb.mxu1 %v5270_v3 }
 0x4a3   :  { %v1022_v37 = vadd.f32 %v5612_v8, %v964_v48  ;;  %v3322_v48 = vand.u32 4294901760, %v3321_v49  ;;  %3296 = vmatpush.msra.mxu2 %v5354_v42  ;;  %v5366_v15 = vsub.f32 %v3267_v50, %v5354_v42  ;;  %v5616_v8 = vld [vmem:[#allocation19_spill] sm:$0xff]  ;;  %v2693_v50 = vpop.permute.xlu1 %2692 }
 0x4a4   :  { %v360_v44 = vadd.f32 %v5616_v8, %v5303_v19  ;;  %3197 = vmatpush.msrb.mxu1 %v5277_v7  ;;  %v5618_v19 = vld [vmem:[#allocation32_spill] sm:$0xff] }
 0x4a5   :  { %3419 = vmatpush.msrb.mxu2 %v3320_v1  ;;  %3323 = vmatpush.msra.mxu3 %v3322_v48  ;;  %v3338_v29 = vand.u32 4294901760, %v5366_v15  ;;  %v3334_v1 = vand.u32 4294901760, %v3333_v21  ;;  %v1145_v49 = vadd.f32 %v5618_v19, %v1072_v53  ;;  %v2012_v53 = vadd.f32 %v4971_v54, %v1967_v41  ;;  %v5627_v19 = vld [vmem:[#allocation17_spill] sm:$0xff] }
 0x4a6   :  { %3199 = vmatpush.msrb.mxu1 %v5286_v18  ;;  %v385_v36 = vadd.f32 %v5621_v62, %v360_v44  ;;  %v5625_v44 = vld [vmem:[#allocation16_spill] sm:$0xff] }
 0x4a7   :  { %3423 = vmatpush.msrb.mxu2 %v3326_v23  ;;  %3329 = vmatpush.msra.mxu3 %v3328_v51  ;;  %v3339_v27 = vsub.f32 %v5366_v15, %v3338_v29 }
 0x4a8   :  { %3201 = vmatpush.msrb.mxu1 %v5298_v22 }
 0x4a9   :  { %3023 = vmatmul.f32.gmra.mxu2 %v2736_v60  ;;  %v3274_v60 = vpop.permute.xlu2 %3273  ;;  %3335 = vmatpush.msra.mxu3 %v3334_v1  ;;  %v3340_v55 = vand.u32 4294901760, %v3339_v27 }
 0x4aa   :  { %v3275_v4 = vsel %vm774_vm8, %v3274_v60, 0  ;;  %v1962_v60 = vadd.f32 %v4963_v0, %v1904_v58  ;;  %3427 = vmatpush.msrb.mxu2 %v3332_v43 }
 0x4ab   :  { %v5349_v47 = vand.u32 4294901760, %v3275_v4  ;;  %3341 = vmatpush.msra.mxu3 %v3340_v55 }
 0x4ac   :  { %v2006_v33 = vadd.f32 %v4965_v59, %v1962_v60  ;;  %3431 = vmatpush.msrb.mxu2 %v3338_v29 }
 0x4ad   :  { %v5361_v5 = vsub.f32 %v3275_v4, %v5349_v47  ;;  %3343 = vmatmul.f32.vlgmr.msra.gmra.mxu3 %v5349_v47 }
 0x4ae   :  { %3450 = vmatpush.msrb.mxu3 %v5309_v30  ;;  %v2081_v54 = vadd.f32 %v4981_v32, %v2006_v33 }
 0x4af   :  { %v3299_v17 = vand.u32 4294901760, %v5361_v5 }
 0x4b0   :  { %3452 = vmatpush.msrb.mxu3 %v5325_v2  ;;  %v2122_v27 = vadd.f32 %v4979_v14, %v2081_v54 }
 0x4b1   :  { %v3300_v45 = vsub.f32 %v5361_v5, %v3299_v17 }
 0x4b2   :  { %3454 = vmatpush.msrb.mxu3 %v5332_v57  ;;  %v2128_v33 = vsel %vm774_vm8, %v2122_v27, 0.0 }
 0x4b3   :  { %v3301_v23 = vand.u32 4294901760, %v3300_v45 }
 0x4b4   :  { %3456 = vmatpush.msrb.mxu3 %v5354_v42 }
 0x4b5   :  { %3302 = vmatmul.f32.vlgmr.msra.gmra.mxu2 %v3301_v23  ;;  %3458 = vmatmul.f32.vlgmr.msrb.gmra.mxu3 %v5349_v47 }
 0x4bd   :  { %3433 = vmatmul.f32.vlgmr.msrb.gmra.mxu2 %v5349_v47 }
 0x4ff   :  { %v2901_v4 = vpop.f32.mrf.mxu0 }
 0x501   :  { %v2945_v21 = vpop.f32.mrf.mxu1 }
 0x503   :  { %v5307_v35 = vpop.f32.mrf.mxu3 }
 0x50b   :  { %v2734_v61 = vpop.f32.mrf.mxu2 }
 0x50c   :  { %v2735_v6 = vadd.f32 %v2734_v61, %v2691_v24  ;;  %v5617_v61 = vld [vmem:[#allocation25_spill] sm:$0xff]  ;;  %v5620_v24 = vld [vmem:[#allocation18_spill] sm:$0xff] }
 0x50d   :  { %v1066_v20 = vadd.f32 %v5617_v61, %v1022_v37  ;;  %v216_v48 = vadd.f32 %v5620_v24, %v191_v26  ;;  %v5624_v26 = vld [vmem:[#allocation29_spill] sm:$0xff] }
 0x50e   :  { %v2844_v37 = vadd.f32 %v5307_v35, %v2735_v6  ;;  %v5622_v35 = vld [vmem:[#allocation31_spill] sm:$0xff] }
 0x50f   :  { %v1141_v58 = vadd.f32 %v5619_v46, %v1066_v20  ;;  %v1186_v43 = vadd.f32 %v5622_v35, %v1145_v49  ;;  %v243_v61 = vadd.f32 %v5625_v44, %v216_v48 }
 0x510   :  { %v2902_v34 = vadd.f32 %v2901_v4, %v2844_v37  ;;  %v2906_v20 = vpop.f32.mrf.mxu0 }
 0x511   :  { %v1182_v8 = vadd.f32 %v5624_v26, %v1141_v58  ;;  %v1189_v60 = vsel %vm774_vm8, %v1186_v43, 0.0  ;;  %v266_v49 = vadd.f32 %v5627_v19, %v243_v61 }
 0x512   :  { %v2946_v1 = vadd.f32 %v2945_v21, %v2902_v34  ;;  %v2951_v37 = vpop.f32.mrf.mxu1 }
 0x513   :  { %v1188_v45 = vsel %vm774_vm8, %v1182_v8, 0.0 }
 0x514   :  { %v2847_v52 = vpop.f32.mrf.mxu3 }
 0x51c   :  { %v2742_v28 = vpop.f32.mrf.mxu2  ;;  %v3061_v51 = vpop.f32.mrf.mxu3 }
 0x51d   :  { %v2743_v0 = vadd.f32 %v2742_v28, %v2693_v50  ;;  %v5623_v28 = vld [vmem:[#allocation23_spill] sm:$0xff]  ;;  %v5626_v50 = vld [vmem:[#allocation22_spill] sm:$0xff] }
 0x51e   :  { %v412_v59 = vadd.f32 %v5623_v28, %v385_v36 }
 0x51f   :  { %v2848_v6 = vadd.f32 %v2847_v52, %v2743_v0  ;;  %v2085_v52 = vadd.f32 %v4985_v13, %v2012_v53  ;;  %v1190_v0 = vadd.f32 %v1189_v60, %v1188_v45 }
 0x520   :  { %v435_v4 = vadd.f32 %v5626_v50, %v412_v59 }
 0x521   :  { %v2907_v41 = vadd.f32 %v2906_v20, %v2848_v6  ;;  %v2126_v13 = vadd.f32 %v4983_v63, %v2085_v52  ;;  %v5628_v20 = vld [vmem:[#allocation37_spill] sm:$0xff]  ;;  %v5629_v52 = vld [vmem:[#allocation35_spill] sm:$0xff] }
 0x522   :  { %v437_v55 = vadd.f32 %v435_v4, %v266_v49 }
 0x523   :  { %v2952_v23 = vadd.f32 %v2951_v37, %v2907_v41  ;;  %v2129_v62 = vsel %vm774_vm8, %v2126_v13, 0.0 }
 0x524   :  { %v3020_v29 = vpop.f32.mrf.mxu2  ;;  %v3065_v24 = vpop.f32.mrf.mxu3  ;;  %v1191_v48 = vadd.f32 %v1190_v0, %v437_v55  ;;  %v2130_v53 = vadd.f32 %v2129_v62, %v2128_v33  ;;  %v5631_v33 = vld [vmem:[#allocation36_spill] sm:$0xff]  ;;  %v5632_v62 = vld [vmem:[#allocation34_spill] sm:$0xff] }
 0x525   :  { %v3021_v32 = vadd.f32 %v3020_v29, %v2946_v1 }
 0x526   :  { %v2131_v63 = vadd.f32 %v2130_v53, %v1191_v48  ;;  %v3506_v53 = vld [vmem:[#allocation8 + $0x268] sm:$0xff] }
 0x527   :  { %v3062_v58 = vadd.f32 %v3061_v51, %v3021_v32 }
 0x529   :  { %v3068_v21 = vsel %vm774_vm8, %v3062_v58, 0.0  ;;  %v5630_v58 = vld [vmem:[#allocation33_spill] sm:$0xff] }
 0x52c   :  { %v3024_v46 = vpop.f32.mrf.mxu2 }
 0x52d   :  { %v3025_v14 = vadd.f32 %v3024_v46, %v2952_v23 }
 0x52f   :  { %v3066_v36 = vadd.f32 %v3065_v24, %v3025_v14 }
 0x531   :  { %v3069_v35 = vsel %vm774_vm8, %v3066_v36, 0.0  ;;  %v3507_v36 = vld [vmem:[#allocation8 + $0x270] sm:$0xff] }
 0x532   :  { %v3070_v43 = vadd.f32 %v3069_v35, %v3068_v21  ;;  %v3527_v21 = vand.u32 4294901760, %v3507_v36  ;;  %v3529_v35 = vand.u32 4294901760, %v3506_v53 }
 0x534   :  { %v3071_v6 = vadd.f32 %v3070_v43, %v2131_v63  ;;  %v3557_v63 = vsub.f32 %v3507_v36, %v3527_v21  ;;  %v3563_v43 = vsub.f32 %v3506_v53, %v3529_v35  ;;  %3628 = vmatpush.msra.mxu3 %v3527_v21 }
 0x536   :  { %v3072_v47 = vmax.f32 %v3071_v6, 0.0  ;;  %v3558_v6 = vand.u32 4294901760, %v3557_v63  ;;  %3599 = vmatpush.msra.mxu2 %v3557_v63  ;;  %3630 = vmatpush.msra.mxu3 %v3529_v35 }
 0x538   :  { %v3080_v34 = vsel %vm774_vm8, %v3072_v47, 0  ;;  %v3564_v47 = vand.u32 4294901760, %v3563_v43  ;;  %3602 = vmatpush.msra.mxu2 %v3563_v43 }
 0x539   :  { %v3102_v28 = vand.u32 4294901760, %v3080_v34 }
 0x53b   :  { %v3103_v59 = vsub.f32 %v3080_v34, %v3102_v28  ;;  %3148 = vmatmul.f32.vlgmr.msra.gmra.mxu1 %v3102_v28  ;;  %v3559_v34 = vsub.f32 %v3557_v63, %v3558_v6  ;;  %v5633_v63 = vld [vmem:[#allocation15_spill] sm:$0xff] }
 0x53c   :  { %3255 = vmatpush.msra.mxu1 %v5270_v3 }
 0x53d   :  { %v3104_v51 = vand.u32 4294901760, %v3103_v59 }
 0x53e   :  { %3257 = vmatpush.msra.mxu1 %v5277_v7 }
 0x53f   :  { %v3105_v29 = vsub.f32 %v3103_v59, %v3104_v51 }
 0x540   :  { %3259 = vmatpush.msra.mxu1 %v5286_v18 }
 0x541   :  { %v3106_v26 = vand.u32 4294901760, %v3105_v29 }
 0x542   :  { %3261 = vmatpush.msra.mxu1 %v5298_v22 }
 0x543   :  { %3107 = vmatmul.f32.vlgmr.msra.gmra.mxu0 %v3106_v26  ;;  %3205 = vmatmul.f32.vlgmr.msrb.gmra.mxu1 %v3104_v51 }
 0x544   :  { %3224 = vmatpush.msra.mxu0 %v3125_v9  ;;  %3390 = vmatpush.msrb.mxu1 %v5309_v30  ;;  %v3939_v30 = vld [vmem:[#allocation8 + $0x250] ss:$0 sm:$0xff] }
 0x546   :  { %3228 = vmatpush.msra.mxu0 %v3131_v12  ;;  %3392 = vmatpush.msrb.mxu1 %v5325_v2  ;;  %v3303_v2 = vpop.f32.mrf.mxu2 }
 0x548   :  { %3232 = vmatpush.msra.mxu0 %v3137_v56  ;;  %3394 = vmatpush.msrb.mxu1 %v5332_v57 }
 0x54a   :  { %3236 = vmatpush.msra.mxu0 %v3143_v10  ;;  %3396 = vmatpush.msrb.mxu1 %v5354_v42  ;;  %v3304_v10 = vadd.f32 %v3939_v30, %v3303_v2 }
 0x54b   :  { %3178 = vmatmul.f32.vlgmr.msrb.gmra.mxu0 %v3103_v59  ;;  %3263 = vmatmul.f32.vlgmr.msra.gmra.mxu1 %v3102_v28  ;;  %v3560_v59 = vand.u32 4294901760, %v3559_v34 }
 0x54c   :  { %3361 = vmatpush.msrb.mxu0 %v5323_v31 }
 0x54d   :  { %3561 = vmatpush.msra.mxu1 %v3560_v59 }
 0x54e   :  { %3364 = vmatpush.msrb.mxu0 %v5339_v40  ;;  %v3344_v40 = vpop.f32.mrf.mxu3  ;;  %v3434_v8 = vpop.f32.mrf.mxu2 }
 0x550   :  { %3367 = vmatpush.msrb.mxu0 %v5347_v11  ;;  %v3345_v11 = vadd.f32 %v3344_v40, %v3304_v10  ;;  %v3504_v10 = vld [vmem:[#allocation8 + $0x258] sm:$0xff] }
 0x551   :  { %v3533_v40 = vand.u32 4294901760, %v3504_v10 }
 0x552   :  { %3370 = vmatpush.msrb.mxu0 %v5366_v15 }
 0x553   :  { %3238 = vmatmul.f32.vlgmr.msra.gmra.mxu0 %v3102_v28  ;;  %3400 = vmatmul.f32.vlgmr.msrb.gmra.mxu1 %v3299_v17  ;;  %v3565_v28 = vsub.f32 %v3563_v43, %v3564_v47 }
 0x554   :  { %3528 = vmatpush.msra.mxu0 %v3527_v21 }
 0x555   :  { %v3566_v51 = vand.u32 4294901760, %v3565_v28 }
 0x556   :  { %v3459_v44 = vpop.f32.mrf.mxu3  ;;  %3530 = vmatpush.msra.mxu0 %v3529_v35 }
 0x557   :  { %3567 = vmatpush.msra.mxu1 %v3566_v51  ;;  %v3940_v51 = vld [vmem:[#allocation8 + $0x278] ss:$0 sm:$0xff] }
 0x55b   :  { %3373 = vmatmul.f32.vlgmr.msrb.gmra.mxu0 %v5361_v5 }
 0x5b8   :  { %v3149_v3 = vpop.f32.mrf.mxu1 }
 0x5c0   :  { %v3108_v7 = vpop.f32.mrf.mxu0  ;;  %v3206_v18 = vpop.f32.mrf.mxu1 }
 0x5c1   :  { %v3109_v9 = vadd.f32 %v3938_v16, %v3108_v7 }
 0x5c3   :  { %v3150_v39 = vadd.f32 %v3149_v3, %v3109_v9 }
 0x5c8   :  { %v3179_v12 = vpop.f32.mrf.mxu0  ;;  %v3264_v56 = vpop.f32.mrf.mxu1 }
 0x5c9   :  { %v3180_v25 = vadd.f32 %v3179_v12, %v3150_v39 }
 0x5cb   :  { %v3207_v22 = vadd.f32 %v3206_v18, %v3180_v25 }
 0x5d0   :  { %v3239_v38 = vpop.f32.mrf.mxu0  ;;  %v3401_v15 = vpop.f32.mrf.mxu1 }
 0x5d1   :  { %v3240_v31 = vadd.f32 %v3239_v38, %v3207_v22 }
 0x5d3   :  { %v3265_v57 = vadd.f32 %v3264_v56, %v3240_v31  ;;  %v3505_v31 = vld [vmem:[#allocation8 + $0x260] sm:$0xff] }
 0x5d4   :  { %v3531_v2 = vand.u32 4294901760, %v3505_v31 }
 0x5d6   :  { %3632 = vmatpush.msra.mxu3 %v3531_v2  ;;  %3532 = vmatpush.msra.mxu0 %v3531_v2 }
 0x5d8   :  { %v3374_v42 = vpop.f32.mrf.mxu0  ;;  %3634 = vmatpush.msra.mxu3 %v3533_v40  ;;  %3534 = vmatpush.msra.mxu0 %v3533_v40 }
 0x5d9   :  { %v3375_v5 = vadd.f32 %v3374_v42, %v3345_v11  ;;  %v3575_v42 = vsub.f32 %v3504_v10, %v3533_v40 }
 0x5da   :  { %3657 = vmatpush.msrb.mxu0 %v3558_v6 }
 0x5db   :  { %v3402_v17 = vadd.f32 %v3401_v15, %v3375_v5  ;;  %v3576_v15 = vand.u32 4294901760, %v3575_v42 }
 0x5dc   :  { %3661 = vmatpush.msrb.mxu0 %v3564_v47 }
 0x5dd   :  { %v3435_v54 = vadd.f32 %v3434_v8, %v3402_v17  ;;  %v3577_v8 = vsub.f32 %v3575_v42, %v3576_v15 }
 0x5df   :  { %v3460_v61 = vadd.f32 %v3459_v44, %v3435_v54  ;;  %v3578_v54 = vand.u32 4294901760, %v3577_v8 }
 0x5e1   :  { %3483 = vrot.lane.b32.xlu0 %v3460_v61, %s4098_s12  ;;  %v3462_v60 = vadd.f32 %v3460_v61, %v3265_v57 }
 0x5e3   :  { %v3844_v1 = vmul.f32 -1.442695, %v3462_v60 }
 0x5e5   :  { %3941 = vpow2.f32 %v3844_v1 }
 0x5e9   :  { %3499 = vrot.lane.b32.xlu0 %v5628_v20, %s4101_s15 }
 0x5eb   :  { %v3942_v41 = vpop.eup %3941 }
 0x5ec   :  { %v3466_v50 = vadd.f32 1.0, %v3942_v41 }
 0x5ee   :  { %3943 = vrcp.f32 %v3466_v50  ;;  %v3478_v49 = vand.u32 2147483648, %v3466_v50  ;;  %vm3472_vm0 = vweird.f32 %v3466_v50  ;;  %v3476_v37 = vand.u32 2147483647, %v3466_v50 }
 0x5f0   :  { %v3479_v13 = vor.u32 1.1754944e-38, %v3478_v49  ;;  %vm3477_vm3 = vcmp.eq.f32.partialorder %v3476_v37, 8.507059e+37 }
 0x5f1   :  { %3708 = vrot.lane.b32.xlu0 %v5629_v52, %s4094_s3 }
 0x5f4   :  { %v3944_v4 = vpop.eup %3943 }
 0x5f5   :  { %v3468_v45 = vmul.f32 %v3944_v4, %v3466_v50  ;;  %vm3473_vm15 = vweird.f32 %v3944_v4 }
 0x5f6   :  { %vm3474_vm1 = vmor %vm3472_vm0, %vm3473_vm15 }
 0x5f7   :  { %v3469_v27 = vsub.f32 1.0, %v3468_v45 }
 0x5f9   :  { %v3470_v32 = vmul.f32 %v3944_v4, %v3469_v27 }
 0x5fb   :  { %v3471_v19 = vadd.f32 %v3944_v4, %v3470_v32 }
 0x5fd   :  { %v3475_v0 = vsel %vm3474_vm1, %v3944_v4, %v3471_v19 }
 0x5fe   :  { %v3480_v55 = vsel %vm3477_vm3, %v3479_v13, %v3475_v0  ;;  %v4102_v13 = vmov 32  }
 0x5ff   :  { %v3493_v26 = vsub.f32 1.0, %v3480_v55  ;;  %3931 = vset.pattern.permute.xlu0 %v4102_v13  ;;  %3929 = vset.pattern.permute.xlu1 %v4102_v13 }
 0x600   :  { %3930 = vset.pattern.permute.xlu2 %v4102_v13 }
 0x653   :  { %v3484_v23 = vpop.permute.xlu0 %3483 }
 0x654   :  { %v3486_v46 = vmul.f32 %v3484_v23, %v3480_v55 }
 0x656   :  { %3488 = vrot.lane.b32.xlu1 %v3486_v46, %s4098_s12 }
 0x65b   :  { %v3500_v29 = vpop.permute.xlu0 %3499 }
 0x65c   :  { %v3502_v16 = vmul.f32 %v3500_v29, %v3480_v55 }
 0x65e   :  { %3704 = vrot.lane.b32.xlu1 %v5630_v58, %s4094_s3 }
 0x663   :  { %v3709_v22 = vpop.permute.xlu0 %3708 }
 0x666   :  { %3710 = vrot.lane.b32.xlu1 %v5631_v33, %s4094_s3 }
 0x6c8   :  { %v3489_v14 = vpop.permute.xlu1 %3488 }
 0x6c9   :  { %v3491_v24 = vadd.f32 %v3489_v14, %v3265_v57  ;;  %v3569_v57 = vsub.f32 %v3505_v31, %v3531_v2 }
 0x6cb   :  { %3945 = vtanh.f32 %v3491_v24  ;;  %v3570_v11 = vand.u32 4294901760, %v3569_v57  ;;  %3605 = vmatpush.msra.mxu2 %v3569_v57 }
 0x6cd   :  { %v3571_v5 = vsub.f32 %v3569_v57, %v3570_v11  ;;  %3608 = vmatpush.msra.mxu2 %v3575_v42  ;;  %3665 = vmatpush.msrb.mxu0 %v3570_v11 }
 0x6cf   :  { %v3572_v17 = vand.u32 4294901760, %v3571_v5  ;;  %3669 = vmatpush.msrb.mxu0 %v3576_v15 }
 0x6d0   :  { %v3705_v9 = vpop.permute.xlu1 %3704 }
 0x6d1   :  { %v3946_v48 = vpop.eup %3945  ;;  %3573 = vmatpush.msra.mxu1 %v3572_v17 }
 0x6d2   :  { %3495 = vrot.lane.b32.xlu2 %v3946_v48, %s4096_s10 }
 0x6d3   :  { %3579 = vmatpush.msra.mxu1 %v3578_v54 }
 0x6d5   :  { %3688 = vmatpush.msrb.mxu1 %v3527_v21 }
 0x6d7   :  { %3690 = vmatpush.msrb.mxu1 %v3529_v35 }
 0x6d8   :  { %v3711_v56 = vpop.permute.xlu1 %3710 }
 0x6d9   :  { %3692 = vmatpush.msrb.mxu1 %v3531_v2 }
 0x6da   :  { %3706 = vrot.lane.b32.xlu2 %v5632_v62, %s4094_s3 }
 0x6db   :  { %3694 = vmatpush.msrb.mxu1 %v3533_v40 }
 0x72c   :  { %v3496_v3 = vpop.permute.xlu2 %3495 }
 0x72d   :  { %v3498_v7 = vmul.f32 %v3496_v3, %v3493_v26 }
 0x72f   :  { %v5454_v39 = vadd.f32 %v3502_v16, %v3498_v7 }
 0x731   :  { %3511 = vrot.lane.b32.xlu2 %v5454_v39, %s4096_s10  ;;  %v3716_v18 = vmul.f32 %v3705_v9, %v5454_v39  ;;  %v3718_v30 = vmul.f32 %v3709_v22, %v5454_v39  ;;  %v3719_v38 = vmul.f32 %v3711_v56, %v5454_v39 }
 0x733   :  { %3724 = vrot.lane.b32.xlu0 %v3716_v18, %s4096_s10 }
 0x734   :  { %v3707_v12 = vpop.permute.xlu2 %3706 }
 0x735   :  { %v3717_v25 = vmul.f32 %v3707_v12, %v5454_v39 }
 0x737   :  { %3726 = vrot.lane.b32.xlu1 %v3717_v25, %s4096_s10 }
 0x739   :  { %3728 = vrot.lane.b32.xlu2 %v3718_v30, %s4096_s10 }
 0x73b   :  { %3730 = vrot.lane.b32.xlu0 %v3719_v38, %s4096_s10 }
 0x78b   :  { %v3512_v44 = vpop.permute.xlu2 %3511 }
 0x78c   :  { %v3513_v61 = vsel %vm774_vm8, %v3512_v44, 0 }
 0x78d   :  { %v3535_v20 = vand.u32 4294901760, %v3513_v61 }
 0x78f   :  { %v3536_v60 = vsub.f32 %v3513_v61, %v3535_v20  ;;  %3581 = vmatmul.f32.vlgmr.msra.gmra.mxu1 %v3535_v20 }
 0x791   :  { %v3537_v1 = vand.u32 4294901760, %v3536_v60  ;;  %3611 = vmatmul.f32.vlgmr.msra.gmra.mxu2 %v3536_v60 }
 0x793   :  { %v3538_v41 = vsub.f32 %v3536_v60, %v3537_v1  ;;  %3638 = vmatmul.f32.vlgmr.msra.gmra.mxu3 %v3537_v1  ;;  %v3729_v50 = vpop.permute.xlu2 %3728 }
 0x794   :  { %v3742_v4 = vsel %vm774_vm8, %v3729_v50, 0.0 }
 0x795   :  { %v3539_v45 = vand.u32 4294901760, %v3538_v41  ;;  %3743 = vadd.xlane.f32.xlu0 %v3742_v4 }
 0x797   :  { %3540 = vmatmul.f32.vlgmr.msra.gmra.mxu0 %v3539_v45  ;;  %3696 = vmatmul.f32.vlgmr.msrb.gmra.mxu1 %v3535_v20 }
 0x79f   :  { %3671 = vmatmul.f32.vlgmr.msrb.gmra.mxu0 %v3535_v20 }
 0x7a5   :  { %v3725_v27 = vpop.permute.xlu0 %3724 }
 0x7a6   :  { %v3736_v32 = vsel %vm774_vm8, %v3725_v27, 0.0 }
 0x7a7   :  { %3737 = vadd.xlane.f32.xlu1 %v3736_v32 }
 0x7a9   :  { %v3727_v19 = vpop.permute.xlu1 %3726 }
 0x7aa   :  { %v3739_v49 = vsel %vm774_vm8, %v3727_v19, 0.0 }
 0x7ab   :  { %3740 = vadd.xlane.f32.xlu2 %v3739_v49 }
 0x7ad   :  { %v3731_v37 = vpop.permute.xlu0 %3730 }
 0x7ae   :  { %v3745_v0 = vsel %vm774_vm8, %v3731_v37, 0.0 }
 0x7b3   :  { %3746 = vadd.xlane.f32.xlu2 %v3745_v0 }
 0x808   :  { %v3744_v23 = vpop.xlane.xlu0 %3743 }
 0x809   :  { %v3750_v55 = vadd.f32 %v3744_v23, %v5629_v52 }
 0x80b   :  { %3763 = vperm.xlu0 %3931, %v3750_v55  }
 0x80c   :  { %v3582_v3 = vpop.f32.mrf.mxu1 }
 0x814   :  { %v3541_v29 = vpop.f32.mrf.mxu0  ;;  %v3612_v7 = vpop.f32.mrf.mxu2 }
 0x815   :  { %v3542_v26 = vadd.f32 %v3940_v51, %v3541_v29  ;;  %v3697_v56 = vpop.f32.mrf.mxu1 }
 0x816   :  { %v3639_v18 = vpop.f32.mrf.mxu3 }
 0x817   :  { %v3583_v16 = vadd.f32 %v3582_v3, %v3542_v26 }
 0x819   :  { %v3613_v9 = vadd.f32 %v3612_v7, %v3583_v16 }
 0x81a   :  { %v3738_v46 = vpop.xlane.xlu1 %3737 }
 0x81b   :  { %v3748_v14 = vadd.f32 %v3738_v46, %v5630_v58  ;;  %v3640_v12 = vadd.f32 %v3639_v18, %v3613_v9 }
 0x81c   :  { %v3672_v25 = vpop.f32.mrf.mxu0 }
 0x81d   :  { %3757 = vperm.xlu1 %3929, %v3748_v14   ;;  %v3673_v22 = vadd.f32 %v3672_v25, %v3640_v12 }
 0x81e   :  { %v3741_v24 = vpop.xlane.xlu2 %3740 }
 0x81f   :  { %v3749_v48 = vadd.f32 %v3741_v24, %v5632_v62  ;;  %v3698_v38 = vadd.f32 %v3697_v56, %v3673_v22 }
 0x821   :  { %3760 = vperm.xlu2 %3930, %v3749_v48  }
 0x826   :  { %v3747_v36 = vpop.xlane.xlu2 %3746 }
 0x827   :  { %v3751_v53 = vadd.f32 %v3747_v36, %v5631_v33 }
 0x829   :  { %3766 = vperm.xlu1 %3929, %v3751_v53  }
 0x87b   :  { %v3761_v35 = vpop.permute.xlu2 %3760 }
 0x87c   :  { %v3769_v52 = vperm.slane %v3761_v35, %v5633_v63 }
 0x87d   :  { %v3764_v6 = vpop.permute.xlu0 %3763 }
 0x87e   :  { %v3770_v58 = vperm.slane %v3764_v6, %v5633_v63 }
 0x88f   :  { %v3758_v21 = vpop.permute.xlu1 %3757 }
 0x890   :  { %v3768_v43 = vperm.slane %v3758_v21, %v5633_v63 }
 0x892   :  { %v3773_v47 = vsel %vm3772_vm4, %v3769_v52, %v3768_v43 }
 0x893   :  { %v3775_v28 = vsel %vm3774_vm5, %v3770_v58, %v3773_v47 }
 0x89b   :  { %v3767_v34 = vpop.permute.xlu1 %3766 }
 0x89c   :  { %v3771_v62 = vperm.slane %v3767_v34, %v5633_v63 }
 0x89e   :  { %v3777_v59 = vsel %vm3776_vm6, %v3771_v62, %v3775_v28 }
 0x89f   :  { %3779 = vxpose.xlu2.b32.start.end [1/1] (short) (narrow) %v3777_v59, 8 }
 0x938   :  { %v3795_v33 = vpop.trf.xlu2 }
 0x939   :  { %3812 = vrot.lane.b32.xlu1 %v3795_v33, %s4103_s16 }
 0x941   :  { %3815 = vrot.lane.b32.xlu1 %v5454_v39, %s4098_s12 }
 0x9ab   :  { %v3813_v30 = vpop.permute.xlu1 %3812 }
 0x9ac   :  { %v3819_v31 = vsel %vm3818_vm7, %v3698_v38, %v3813_v30 }
 0x9ad   :  { %v3820_v39 = vsel %vm101_vm2, %v3819_v31, 0.0 }
 0x9b3   :  { %v3816_v2 = vpop.permute.xlu1 %3815 }
 0x9b4   :  { %v3821_v10 = vsel %vm786_vm13, %v3820_v39, %v3816_v2 }
 0x9b5   :  { %3822 = vst [vmem:[#allocation10] sm:$0xff] %v3821_v10 }
 0x9b6   :  { %3833 = dma.vmem_to_hbm [thread:$0]  %s3829_s18, 128, %s3831_s21, [#allocation4]  }
 0x9b7   :  { %4074 = dma.done.wait [#allocation4], 128  }
 0x9b8   :  { %4075 = vsyncadd [#allocation4], 4294967168 }
 0x9b9   :  { %3838 = vsyncpa [#allocation3], 1 }
 0x9ba   :  { %3839 = vsyncpa [#allocation6], 1 }
 0x9bb   :  { %3840 = vsyncpa [#allocation9], 1 }
 0x9bc   :  { %3841 = vsyncpa [#allocation4], 1 }

</bundles_post_ra>
